<compile_context>
chip_gen: v7x
topology: tpu7x:2x2x1
jax: 0.10.0
libtpu: 0.0.40
codegen_flags: <defaults>
</compile_context>

<pallas_src>
import functools
import math

import jax
import jax.numpy as jnp
from jax.experimental import pallas as pl
from jax.experimental.pallas import tpu as pltpu

# ---------------------------------------------------------------------------
# config (mirrors cfg['tracking'][...] defaults of the reference system)
# ---------------------------------------------------------------------------
MOTION_FILTER_THRESH = 2.4     # cfg['tracking']['motion_filter']['thresh']
FRONTEND_WINDOW = 25           # cfg['tracking']['frontend']['window'] (unused here)
STRIDE = 8                     # feature stride (1/8 resolution patches)

IMAGENET_MEAN = jnp.array([0.485, 0.456, 0.406], dtype=jnp.float32)
IMAGENET_STD = jnp.array([0.229, 0.224, 0.225], dtype=jnp.float32)


# ---------------------------------------------------------------------------
# glue (plain JAX): fold normalization into encoder params, im2col
# ---------------------------------------------------------------------------
def fold_normalization(w_enc, b_enc, num_channels):
    """Fold (x/255 - mean)/std into the (linear) encoder. Exact.

    im2col K ordering is ((dy*stride)+dx)*C + c, so channel(k) = k % C.
      W'[k,:] = W[k,:] / (255*std[c(k)])
      b'      = b - (mean/std)^T @ W
    """
    K = w_enc.shape[0]
    ch = jnp.arange(K, dtype=jnp.int32) % num_channels
    std = IMAGENET_STD[ch]                       # (K,)
    mean = IMAGENET_MEAN[ch]                     # (K,)
    scale = 1.0 / (255.0 * std)
    offset = mean / std
    w_fold = (w_enc * scale[:, None]).astype(jnp.bfloat16)      # MXU operand
    b_fold = (b_enc - offset[None, :] @ w_enc).astype(jnp.float32)
    return w_fold, b_fold


def im2col(image_chw, stride=STRIDE):
    """(C,H,W) raw image -> (P, stride*stride*C) patches (layout plumbing)."""
    C, H, W = image_chw.shape
    ph, pw = H // stride, W // stride
    x = image_chw.reshape(C, ph, stride, pw, stride)
    return jnp.transpose(x, (1, 3, 2, 4, 0)).reshape(ph * pw, stride * stride * C)


def _pick_query_tile(P, requested=512):
    """Largest multiple of 8 that divides P and is <= requested."""
    best = 8
    for t in range(8, min(requested, P) + 1, 8):
        if P % t == 0:
            best = t
    return best


# ---------------------------------------------------------------------------
# fused kernel: encoder + correlation + deferred-softmax soft-argmax motion
# score.  grid = (P // TQ,), one query row-tile per step ("parallel": every
# step writes disjoint output blocks, no cross-step accumulation).
# ---------------------------------------------------------------------------
def _fused_track_kernel(patches_ref, w_ref, b_ref, fprev_ref, mk_ref, mq_ref,
                        fcur_ref, corr_ref, score_ref, *, inv_sqrt_d):
    # --- patch feature encoder: bf16 MXU, f32 accumulate, bias + ReLU in f32 ---
    f = jnp.dot(patches_ref[...], w_ref[...],
                preferred_element_type=jnp.float32)              # (TQ, D) f32
    f = jnp.maximum(f + b_ref[...], 0.0)
    fcur_ref[...] = f.astype(fcur_ref.dtype)                     # bf16 writeback

    # --- correlation: (TQ,D) @ (P,D)^T, 1/sqrt(D) folded into the query cast ---
    q = (f * inv_sqrt_d).astype(jnp.bfloat16)
    corr = jax.lax.dot_general(
        q, fprev_ref[...],
        dimension_numbers=(((1,), (1,)), ((), ())),
        preferred_element_type=jnp.float32)                      # (TQ, P) f32
    corr_ref[...] = corr.astype(corr_ref.dtype)                  # bf16, lane-dense
    # TODO(synk): downstream update network only needs a local-radius corr
    # lookup; storing fp8/e4m3 (or no dense volume at all) would halve the HBM
    # roofline at realistic P.

    # --- softmax numerator only (normalization deferred; attn never built) ---
    mrow = jnp.max(corr, axis=-1, keepdims=True)
    e = jnp.exp(corr - mrow)                                     # f32 EUP (v5e-safe)

    # --- denominator + soft-argmax reductions on the MXU:
    #     s = e @ M with M columns [1, y, x, 0...]  ->  [denom, ey_u, ex_u] ---
    s = jnp.dot(e.astype(jnp.bfloat16), mk_ref[...],
                preferred_element_type=jnp.float32)              # (TQ, 128)
    inv = pl.reciprocal(s[:, 0:1], approx=True)                  # EUP slot
    ey = s[:, 1:2] * inv                                         # E[y]  (TQ,1)
    ex = s[:, 2:3] * inv                                         # E[x]  (TQ,1)

    # --- expected displacement vs. this tile's own patch coordinates ---
    mq = mq_ref[...]                                             # (TQ,128) bf16
    dy = ey - mq[:, 1:2].astype(jnp.float32)
    dx = ex - mq[:, 2:3].astype(jnp.float32)
    disp = jnp.sqrt(dx * dx + dy * dy)                           # (TQ, 1)

    # --- per-tile partial score, written lane-dense (no cross-step carry) ---
    total = jnp.sum(disp, axis=0, keepdims=True)                 # (1, 1)
    score_ref[...] = jnp.broadcast_to(total, (8, 128))


@functools.partial(jax.jit, static_argnames=("tq",))
def motion_filter_track(image_chw, prev_fmap_bf16, w_fold, b_fold, coords, *, tq=None):
    """One MotionFilter.track step: returns (f_cur bf16, corr bf16, score f32)."""
    patches = im2col(image_chw).astype(jnp.bfloat16)             # (P, K)
    P, K = patches.shape
    D = w_fold.shape[1]
    assert P % 8 == 0, "patch count must be a multiple of 8"
    if tq is None:
        tq = _pick_query_tile(P, requested=512)
    n_tiles = P // tq

    # Packed MXU reduction matrix: lane-dense (P, 128) bf16 with columns
    # [1, y, x, 0...]; patch-grid coords are small integers -> exact in bf16.
    m_mat = jnp.zeros((P, 128), jnp.float32)
    m_mat = m_mat.at[:, 0].set(1.0)
    m_mat = m_mat.at[:, 1].set(coords[:, 0].astype(jnp.float32))
    m_mat = m_mat.at[:, 2].set(coords[:, 1].astype(jnp.float32))
    m_mat = m_mat.astype(jnp.bfloat16)

    kernel = functools.partial(_fused_track_kernel, inv_sqrt_d=1.0 / math.sqrt(D))

    fcur, corr, partials = pl.pallas_call(
        kernel,
        out_shape=(
            jax.ShapeDtypeStruct((P, D), jnp.bfloat16),          # f_cur (next frame's f_prev)
            jax.ShapeDtypeStruct((P, P), jnp.bfloat16),          # demoted corr volume
            jax.ShapeDtypeStruct((n_tiles * 8, 128), jnp.float32),  # per-tile partial scores
        ),
        grid=(n_tiles,),
        in_specs=[
            pl.BlockSpec((tq, K), lambda i: (i, 0)),             # patches row-tile
            pl.BlockSpec((K, D), lambda i: (0, 0)),              # folded weights (resident)
            pl.BlockSpec((1, D), lambda i: (0, 0)),              # folded bias (resident)
            pl.BlockSpec((P, D), lambda i: (0, 0)),              # prev features (resident)
            pl.BlockSpec((P, 128), lambda i: (0, 0)),            # coord/ones MXU matrix (resident)
            pl.BlockSpec((tq, 128), lambda i: (i, 0)),           # same matrix, query row-tile
        ],
        out_specs=(
            pl.BlockSpec((tq, D), lambda i: (i, 0)),
            pl.BlockSpec((tq, P), lambda i: (i, 0)),
            pl.BlockSpec((8, 128), lambda i: (i, 0)),
        ),
        compiler_params=pltpu.CompilerParams(
            # Every grid step writes disjoint output blocks -> fully parallel
            # (shards across both TensorCores on v7x; neutral on v5e/v6e).
            dimension_semantics=("parallel",)),
    )(patches, w_fold, b_fold, prev_fmap_bf16, m_mat, m_mat)

    # Tiny (n_tiles,) reduce + mean in plain JAX (each (8,128) block is a
    # replicated scalar; pick one lane per tile).
    score = jnp.sum(partials[::8, 0]) * (1.0 / P)
    return fcur, corr, score


# ---------------------------------------------------------------------------
# Tracker.forward equivalent
# ---------------------------------------------------------------------------
def tracker_forward(timestamp, image, depth, intrinsic, prev_fmap,
                    w_fold, b_fold, coords, gt_pose=None):
    # --- self.motion_filter.track(...) hot path ---
    f_cur, corr, score = motion_filter_track(image, prev_fmap, w_fold, b_fold, coords)
    is_keyframe = score > MOTION_FILTER_THRESH
    # TODO(synk): learned ConvGRU update operator (slam.net) is an external
    # checkpointed network; soft-argmax displacement is used as the motion score.
    # --- self.frontend() ---
    # TODO(synk): Frontend factor-graph bundle adjustment (sparse Gauss-Newton,
    # keyframe graph management) has no clean single-kernel Pallas equivalent.
    return corr, score, is_keyframe, f_cur


# ---------------------------------------------------------------------------
if __name__ == "__main__":
    key = jax.random.PRNGKey(0)
    k_img, k_prev, k_depth, k_w = jax.random.split(key, 4)

    C, H, W = 3, 128, 128
    D = 128
    P = (H // STRIDE) * (W // STRIDE)          # 256 patches
    K = STRIDE * STRIDE * C                    # 192

    # deterministic synthetic inputs: integer-valued "uint8-like" images
    # (exact under the bf16 patch cast), channel-first.
    image = jnp.floor(jax.random.uniform(k_img, (C, H, W), jnp.float32, 0.0, 256.0))
    prev_image = jnp.floor(jax.random.uniform(k_prev, (C, H, W), jnp.float32, 0.0, 256.0))
    depth = jax.random.uniform(k_depth, (H, W), jnp.float32, 0.5, 4.0)
    intrinsic = jnp.array([float(H), float(W), H / 2.0, W / 2.0], dtype=jnp.float32)

    # deterministic encoder parameters (synthetic, not checkpoint-loaded)
    w_enc = 0.05 * jax.random.normal(k_w, (K, D), dtype=jnp.float32)
    b_enc = jnp.zeros((1, D), dtype=jnp.float32)
    w_fold, b_fold = fold_normalization(w_enc, b_enc, C)   # normalization folded in

    # patch-center coordinates at 1/8 resolution: (P, 2) float32 = [y, x]
    gy, gx = jnp.meshgrid(
        jnp.arange(H // STRIDE, dtype=jnp.float32),
        jnp.arange(W // STRIDE, dtype=jnp.float32),
        indexing="ij",
    )
    coords = jnp.stack([gy.reshape(-1), gx.reshape(-1)], axis=-1)  # (256, 2)

    # bootstrap the "previous keyframe" feature map by tracking the previous
    # frame against a zero feature map (same fused kernel produces f_cur).
    zero_fmap = jnp.zeros((P, D), dtype=jnp.bfloat16)
    _, _, _, prev_fmap = tracker_forward(
        timestamp=-1, image=prev_image, depth=depth, intrinsic=intrinsic,
        prev_fmap=zero_fmap, w_fold=w_fold, b_fold=b_fold, coords=coords,
    )

    corr, score, is_kf, f_cur = tracker_forward(
        timestamp=0, image=image, depth=depth, intrinsic=intrinsic,
        prev_fmap=prev_fmap, w_fold=w_fold, b_fold=b_fold, coords=coords,
    )
    jax.block_until_ready((corr, score, is_kf, f_cur))
    print("KERNEL_OK")
</pallas_src>

<mosaic_0001>
module attributes {stable_mosaic.version = 11 : i64} {
  func.func @_fused_track_kernel(%arg0: i32, %arg1: memref<256x192xbf16, #tpu.memory_space<vmem>>, %arg2: memref<192x128xbf16, #tpu.memory_space<vmem>>, %arg3: memref<1x128xf32, #tpu.memory_space<vmem>>, %arg4: memref<256x128xbf16, #tpu.memory_space<vmem>>, %arg5: memref<256x128xbf16, #tpu.memory_space<vmem>>, %arg6: memref<256x128xbf16, #tpu.memory_space<vmem>>, %arg7: memref<256x128xbf16, #tpu.memory_space<vmem>>, %arg8: memref<256x256xbf16, #tpu.memory_space<vmem>>, %arg9: memref<8x128xf32, #tpu.memory_space<vmem>>) attributes {dimension_semantics = [#tpu.dimension_semantics<parallel>], iteration_bounds = array<i64: 1>, scalar_prefetch = 0 : i64, scratch_operands = 0 : i64, tpu.core_type = #tpu.core_type<tc>, window_params = [{transform_indices = @transform_0, window_bounds = array<i64: 256, 192>}, {pipeline_mode = #tpu.pipeline_mode<synchronous>, transform_indices = @transform_1, window_bounds = array<i64: 192, 128>}, {pipeline_mode = #tpu.pipeline_mode<synchronous>, transform_indices = @transform_2, window_bounds = array<i64: 1, 128>}, {pipeline_mode = #tpu.pipeline_mode<synchronous>, transform_indices = @transform_3, window_bounds = array<i64: 256, 128>}, {pipeline_mode = #tpu.pipeline_mode<synchronous>, transform_indices = @transform_4, window_bounds = array<i64: 256, 128>}, {transform_indices = @transform_5, window_bounds = array<i64: 256, 128>}, {transform_indices = @transform_6, window_bounds = array<i64: 256, 128>}, {transform_indices = @transform_7, window_bounds = array<i64: 256, 256>}, {transform_indices = @transform_8, window_bounds = array<i64: 8, 128>}]} {
    %c0 = arith.constant 0 : index
    %c0_0 = arith.constant 0 : index
    %0 = vector.load %arg1[%c0, %c0_0] : memref<256x192xbf16, #tpu.memory_space<vmem>>, vector<256x192xbf16>
    %c0_1 = arith.constant 0 : index
    %c0_2 = arith.constant 0 : index
    %1 = vector.load %arg2[%c0_1, %c0_2] : memref<192x128xbf16, #tpu.memory_space<vmem>>, vector<192x128xbf16>
    %cst = arith.constant dense<0.000000e+00> : vector<256x128xf32>
    %2 = tpu.matmul %0, %1, %cst {dimension_numbers = #tpu.dot_dimension_numbers<[1], [0], [0], [1], [0, 0, 1, 1], [], []>} : vector<256x192xbf16>, vector<192x128xbf16>, vector<256x128xf32> -> vector<256x128xf32>
    %c0_3 = arith.constant 0 : index
    %c0_4 = arith.constant 0 : index
    %3 = vector.load %arg3[%c0_3, %c0_4] : memref<1x128xf32, #tpu.memory_space<vmem>>, vector<1x128xf32>
    %4 = vector.broadcast %3 : vector<1x128xf32> to vector<256x128xf32>
    %5 = arith.addf %2, %4 : vector<256x128xf32>
    %cst_5 = arith.constant 0.000000e+00 : f32
    %6 = vector.broadcast %cst_5 : f32 to vector<256x128xf32>
    %7 = arith.maximumf %5, %6 : vector<256x128xf32>
    %8 = arith.truncf %7 : vector<256x128xf32> to vector<256x128xbf16>
    %c0_6 = arith.constant 0 : index
    %c0_7 = arith.constant 0 : index
    %9 = vector.load %arg7[%c0_6, %c0_7] : memref<256x128xbf16, #tpu.memory_space<vmem>>, vector<256x128xbf16>
    tpu.vector_store %arg7[%c0_6, %c0_7], %8 {strides = array<i32>} : memref<256x128xbf16, #tpu.memory_space<vmem>>, vector<256x128xbf16>,
    %cst_8 = arith.constant 0.0883883461 : f32
    %10 = vector.broadcast %cst_8 : f32 to vector<256x128xf32>
    %11 = arith.mulf %7, %10 : vector<256x128xf32>
    %12 = arith.truncf %11 : vector<256x128xf32> to vector<256x128xbf16>
    %c0_9 = arith.constant 0 : index
    %c0_10 = arith.constant 0 : index
    %13 = vector.load %arg4[%c0_9, %c0_10] : memref<256x128xbf16, #tpu.memory_space<vmem>>, vector<256x128xbf16>
    %cst_11 = arith.constant dense<0.000000e+00> : vector<256x256xf32>
    %14 = tpu.matmul %12, %13, %cst_11 {dimension_numbers = #tpu.dot_dimension_numbers<[1], [1], [0], [0], [0, 0, 1, 0], [], []>} : vector<256x128xbf16>, vector<256x128xbf16>, vector<256x256xf32> -> vector<256x256xf32>
    %15 = arith.truncf %14 : vector<256x256xf32> to vector<256x256xbf16>
    %c0_12 = arith.constant 0 : index
    %c0_13 = arith.constant 0 : index
    %16 = vector.load %arg8[%c0_12, %c0_13] : memref<256x256xbf16, #tpu.memory_space<vmem>>, vector<256x256xbf16>
    tpu.vector_store %arg8[%c0_12, %c0_13], %15 {strides = array<i32>} : memref<256x256xbf16, #tpu.memory_space<vmem>>, vector<256x256xbf16>,
    %cst_14 = arith.constant dense<0xFF800000> : vector<256xf32>
    %17 = vector.multi_reduction <maximumf>, %14, %cst_14 [1] : vector<256x256xf32> to vector<256xf32>
    %18 = vector.shape_cast %17 : vector<256xf32> to vector<256x1xf32>
    %19 = vector.broadcast %18 : vector<256x1xf32> to vector<256x256xf32>
    %20 = arith.subf %14, %19 : vector<256x256xf32>
    %21 = math.exp %20 : vector<256x256xf32>
    %22 = arith.truncf %21 : vector<256x256xf32> to vector<256x256xbf16>
    %c0_15 = arith.constant 0 : index
    %c0_16 = arith.constant 0 : index
    %23 = vector.load %arg5[%c0_15, %c0_16] : memref<256x128xbf16, #tpu.memory_space<vmem>>, vector<256x128xbf16>
    %cst_17 = arith.constant dense<0.000000e+00> : vector<256x128xf32>
    %24 = tpu.matmul %22, %23, %cst_17 {dimension_numbers = #tpu.dot_dimension_numbers<[1], [0], [0], [1], [0, 0, 1, 1], [], []>} : vector<256x256xbf16>, vector<256x128xbf16>, vector<256x128xf32> -> vector<256x128xf32>
    %25 = vector.extract_strided_slice %24 {offsets = [0, 0], sizes = [256, 1], strides = [1, 1]} : vector<256x128xf32> to vector<256x1xf32>
    %26 = tpu.reciprocal %25 {approx = true} : vector<256x1xf32> -> vector<256x1xf32>
    %27 = vector.extract_strided_slice %24 {offsets = [0, 1], sizes = [256, 1], strides = [1, 1]} : vector<256x128xf32> to vector<256x1xf32>
    %28 = arith.mulf %27, %26 : vector<256x1xf32>
    %29 = vector.extract_strided_slice %24 {offsets = [0, 2], sizes = [256, 1], strides = [1, 1]} : vector<256x128xf32> to vector<256x1xf32>
    %30 = arith.mulf %29, %26 : vector<256x1xf32>
    %c0_18 = arith.constant 0 : index
    %c0_19 = arith.constant 0 : index
    %31 = vector.load %arg6[%c0_18, %c0_19] : memref<256x128xbf16, #tpu.memory_space<vmem>>, vector<256x128xbf16>
    %32 = vector.extract_strided_slice %31 {offsets = [0, 1], sizes = [256, 1], strides = [1, 1]} : vector<256x128xbf16> to vector<256x1xbf16>
    %33 = arith.extf %32 : vector<256x1xbf16> to vector<256x1xf32>
    %34 = arith.subf %28, %33 : vector<256x1xf32>
    %35 = vector.extract_strided_slice %31 {offsets = [0, 2], sizes = [256, 1], strides = [1, 1]} : vector<256x128xbf16> to vector<256x1xbf16>
    %36 = arith.extf %35 : vector<256x1xbf16> to vector<256x1xf32>
    %37 = arith.subf %30, %36 : vector<256x1xf32>
    %38 = arith.mulf %37, %37 : vector<256x1xf32>
    %39 = arith.mulf %34, %34 : vector<256x1xf32>
    %40 = arith.addf %38, %39 : vector<256x1xf32>
    %41 = math.sqrt %40 : vector<256x1xf32>
    %cst_20 = arith.constant dense<0.000000e+00> : vector<1xf32>
    %42 = vector.multi_reduction <add>, %41, %cst_20 [0] : vector<256x1xf32> to vector<1xf32>
    %43 = vector.shape_cast %42 : vector<1xf32> to vector<1x1xf32>
    %44 = vector.shape_cast %43 : vector<1x1xf32> to vector<1x1xf32>
    %45 = vector.broadcast %44 : vector<1x1xf32> to vector<8x128xf32>
    %c0_21 = arith.constant 0 : index
    %c0_22 = arith.constant 0 : index
    %46 = vector.load %arg9[%c0_21, %c0_22] : memref<8x128xf32, #tpu.memory_space<vmem>>, vector<8x128xf32>
    tpu.vector_store %arg9[%c0_21, %c0_22], %45 {strides = array<i32>} : memref<8x128xf32, #tpu.memory_space<vmem>>, vector<8x128xf32>,
    return
  }
  func.func @transform_0(%arg0: i32) -> (i32, i32) {
    %c0_i32 = arith.constant 0 : i32
    %c0_i32_0 = arith.constant 0 : i32
    return %arg0, %c0_i32 : i32, i32
  }
  func.func @transform_1(%arg0: i32) -> (i32, i32) {
    %c0_i32 = arith.constant 0 : i32
    %c0_i32_0 = arith.constant 0 : i32
    %c0_i32_1 = arith.constant 0 : i32
    return %c0_i32, %c0_i32_0 : i32, i32
  }
  func.func @transform_2(%arg0: i32) -> (i32, i32) {
    %c0_i32 = arith.constant 0 : i32
    %c0_i32_0 = arith.constant 0 : i32
    %c0_i32_1 = arith.constant 0 : i32
    return %c0_i32, %c0_i32_0 : i32, i32
  }
  func.func @transform_3(%arg0: i32) -> (i32, i32) {
    %c0_i32 = arith.constant 0 : i32
    %c0_i32_0 = arith.constant 0 : i32
    %c0_i32_1 = arith.constant 0 : i32
    return %c0_i32, %c0_i32_0 : i32, i32
  }
  func.func @transform_4(%arg0: i32) -> (i32, i32) {
    %c0_i32 = arith.constant 0 : i32
    %c0_i32_0 = arith.constant 0 : i32
    %c0_i32_1 = arith.constant 0 : i32
    return %c0_i32, %c0_i32_0 : i32, i32
  }
  func.func @transform_5(%arg0: i32) -> (i32, i32) {
    %c0_i32 = arith.constant 0 : i32
    %c0_i32_0 = arith.constant 0 : i32
    return %arg0, %c0_i32 : i32, i32
  }
  func.func @transform_6(%arg0: i32) -> (i32, i32) {
    %c0_i32 = arith.constant 0 : i32
    %c0_i32_0 = arith.constant 0 : i32
    return %arg0, %c0_i32 : i32, i32
  }
  func.func @transform_7(%arg0: i32) -> (i32, i32) {
    %c0_i32 = arith.constant 0 : i32
    %c0_i32_0 = arith.constant 0 : i32
    return %arg0, %c0_i32 : i32, i32
  }
  func.func @transform_8(%arg0: i32) -> (i32, i32) {
    %c0_i32 = arith.constant 0 : i32
    %c0_i32_0 = arith.constant 0 : i32
    return %arg0, %c0_i32 : i32, i32
  }
}

</mosaic_0001>

<bundles_post_ra>
// kernel: motion_filter_track.1
= control target key start
LH: loop header
LB: loop body
LE: loop exit
PB: predicated region body
PF: predicated region fallthrough
CT: control target
= control target key end

     0   :  { %14 = vsyncpa [#allocation3], 0  ;;  %v3906_v1 = vmov 0   ;;  %vm308_vm0 = vcmask 523264   ;;  %s5261_s0 = inlined_call_operand.vmem [shape: bf16[256,192], index: 0, kind: input, shape index: {}]   ;;  %s5262_s1 = inlined_call_operand.vmem [shape: bf16[192,128], index: 1, kind: input, shape index: {}]   ;;  %s5263_s2 = inlined_call_operand.vmem [shape: f32[1,128], index: 2, kind: input, shape index: {}]   ;;  %s5264_s3 = inlined_call_operand.vmem [shape: bf16[256,128], index: 3, kind: input, shape index: {}]   ;;  %s5265_s4 = inlined_call_operand.vmem [shape: bf16[256,128], index: 4, kind: input, shape index: {}, may-alias: {4,5}]   ;;  %s5266_s5 = inlined_call_operand.vmem [shape: bf16[256,128], index: 5, kind: input, shape index: {}, may-alias: {4,5}]   ;;  %s5267_s6 = inlined_call_operand.hbm [shape: bf16[256,128], index: 6, kind: output, shape index: {0}]   ;;  %s5268_s7 = inlined_call_operand.hbm [shape: bf16[256,256], index: 7, kind: output, shape index: {1}]   ;;  %s5269_s8 = inlined_call_operand.vmem [shape: f32[8,128], index: 8, kind: output, shape index: {2}]  }
   0x1   :  { %v3510_v0 = vld [vmem:[%s5262_s1] sm:$0xff]   ;;  %357 = vmatprep.subr.bf16.mxu0 %v3906_v1  ;;  %3475 = vmatprep.subr.bf16.mxu1 %v3906_v1  ;;  %v3511_v2 = vld [vmem:[%s5262_s1 + $0x8] sm:$0xff]   ;;  %v3512_v3 = vld [vmem:[%s5262_s1 + $0x10] sm:$0xff]  }
   0x2   :  { %358 = vmatpush1.bf16.msra.mxu0 %v3510_v0  ;;  %3487 = vmatpush1.bf16.msra.mxu1 %v3510_v0  ;;  %v3513_v4 = vld [vmem:[%s5262_s1 + $0x18] sm:$0xff]   ;;  %v3524_v5 = vld [vmem:[%s5261_s0 + $0x4] ss:$8 sps:$4 sm:$0xff]   ;;  %v3516_v8 = vld [vmem:[%s5262_s1 + $0x30] sm:$0xff]  }
   0x3   :  { %359 = vmatprep.subr.bf16.mxu0 %v3906_v1  ;;  %3476 = vmatprep.subr.bf16.mxu1 %v3906_v1  ;;  %v3514_v6 = vld [vmem:[%s5262_s1 + $0x20] sm:$0xff]   ;;  %v3515_v7 = vld [vmem:[%s5262_s1 + $0x28] sm:$0xff]   ;;  %v3517_v10 = vld [vmem:[%s5262_s1 + $0x38] sm:$0xff]  }
   0x4   :  { %2965 = vmatprep.mubr.msk.bf16.mxu0 %vm308_vm0, %v3524_v5  ;;  %v3548_v9 = vld [vmem:[%s5261_s0 + $0x84] ss:$8 sps:$4 sm:$0xff]   ;;  %v3520_v13 = vld [vmem:[%s5262_s1 + $0x50] sm:$0xff]   ;;  %v3521_v14 = vld [vmem:[%s5262_s1 + $0x58] sm:$0xff]  }
   0x5   :  { %2973 = vmatprep.mubr.msk.bf16.mxu1 %vm308_vm0, %v3548_v9  ;;  %v3518_v11 = vld [vmem:[%s5262_s1 + $0x40] sm:$0xff]   ;;  %v3519_v12 = vld [vmem:[%s5262_s1 + $0x48] sm:$0xff]   ;;  %v3525_v17 = vld [vmem:[%s5261_s0 + $0x14] ss:$8 sps:$4 sm:$0xff]  }
   0x6   :  { %360 = vmatpush1.bf16.msra.mxu0 %v3511_v2  ;;  %3488 = vmatpush1.bf16.msra.mxu1 %v3511_v2  ;;  %v3522_v15 = vld [vmem:[%s5261_s0] ss:$8 sps:$4 sm:$0xff]   ;;  %v3549_v19 = vld [vmem:[%s5261_s0 + $0x94] ss:$8 sps:$4 sm:$0xff]   ;;  %v3527_v22 = vld [vmem:[%s5261_s0 + $0x10] ss:$8 sps:$4 sm:$0xff]  }
   0x7   :  { %361 = vmatprep.subr.bf16.mxu0 %v3906_v1  ;;  %3477 = vmatprep.subr.bf16.mxu1 %v3906_v1  ;;  %v3570_v16 = vld [vmem:[%s5264_s3 + $0x40] sm:$0xff]   ;;  %v3572_v21 = vld [vmem:[%s5264_s3 + $0x48] sm:$0xff]   ;;  %v3551_v23 = vld [vmem:[%s5261_s0 + $0x90] ss:$8 sps:$4 sm:$0xff]  }
   0x8   :  { %v3546_v18 = vld [vmem:[%s5261_s0 + $0x80] ss:$8 sps:$4 sm:$0xff]   ;;  %v3528_v24 = vld [vmem:[%s5261_s0 + $0x24] ss:$8 sps:$4 sm:$0xff]  }
   0x9   :  { %v3571_v20 = vld [vmem:[%s5264_s3] sm:$0xff]   ;;  %v3573_v26 = vld [vmem:[%s5264_s3 + $0x8] sm:$0xff]  }
   0xa   :  { %362 = vmatpush1.bf16.msra.mxu0 %v3512_v3  ;;  %3489 = vmatpush1.bf16.msra.mxu1 %v3512_v3  ;;  %v3552_v25 = vld [vmem:[%s5261_s0 + $0xa4] ss:$8 sps:$4 sm:$0xff]  }
   0xb   :  { %363 = vmatprep.subr.bf16.mxu0 %v3906_v1  ;;  %3478 = vmatprep.subr.bf16.mxu1 %v3906_v1 }
   0xe   :  { %364 = vmatpush1.bf16.msra.mxu0 %v3513_v4  ;;  %3490 = vmatpush1.bf16.msra.mxu1 %v3513_v4 }
   0xf   :  { %365 = vmatprep.subr.bf16.mxu0 %v3906_v1  ;;  %3479 = vmatprep.subr.bf16.mxu1 %v3906_v1 }
  0x12   :  { %366 = vmatpush1.bf16.msra.mxu0 %v3514_v6  ;;  %3491 = vmatpush1.bf16.msra.mxu1 %v3514_v6 }
  0x13   :  { %367 = vmatprep.subr.bf16.mxu0 %v3906_v1  ;;  %3480 = vmatprep.subr.bf16.mxu1 %v3906_v1 }
  0x16   :  { %368 = vmatpush1.bf16.msra.mxu0 %v3515_v7  ;;  %3492 = vmatpush1.bf16.msra.mxu1 %v3515_v7 }
  0x17   :  { %369 = vmatprep.subr.bf16.mxu0 %v3906_v1  ;;  %3481 = vmatprep.subr.bf16.mxu1 %v3906_v1 }
  0x1a   :  { %370 = vmatpush1.bf16.msra.mxu0 %v3516_v8  ;;  %3493 = vmatpush1.bf16.msra.mxu1 %v3516_v8 }
  0x1b   :  { %371 = vmatprep.subr.bf16.mxu0 %v3906_v1  ;;  %3482 = vmatprep.subr.bf16.mxu1 %v3906_v1 }
  0x1e   :  { %372 = vmatpush1.bf16.msra.mxu0 %v3517_v10  ;;  %3494 = vmatpush1.bf16.msra.mxu1 %v3517_v10 }
  0x1f   :  { %373 = vmatprep.subr.bf16.mxu0 %v3906_v1  ;;  %3483 = vmatprep.subr.bf16.mxu1 %v3906_v1 }
  0x22   :  { %374 = vmatpush1.bf16.msra.mxu0 %v3518_v11  ;;  %3495 = vmatpush1.bf16.msra.mxu1 %v3518_v11 }
  0x23   :  { %375 = vmatprep.subr.bf16.mxu0 %v3906_v1  ;;  %3484 = vmatprep.subr.bf16.mxu1 %v3906_v1 }
  0x26   :  { %376 = vmatpush1.bf16.msra.mxu0 %v3519_v12  ;;  %3496 = vmatpush1.bf16.msra.mxu1 %v3519_v12 }
  0x27   :  { %377 = vmatprep.subr.bf16.mxu0 %v3906_v1  ;;  %3485 = vmatprep.subr.bf16.mxu1 %v3906_v1 }
  0x2a   :  { %378 = vmatpush1.bf16.msra.mxu0 %v3520_v13  ;;  %3497 = vmatpush1.bf16.msra.mxu1 %v3520_v13 }
  0x2b   :  { %379 = vmatprep.subr.bf16.mxu0 %v3906_v1  ;;  %3486 = vmatprep.subr.bf16.mxu1 %v3906_v1 }
  0x2e   :  { %380 = vmatpush1.bf16.msra.mxu0 %v3521_v14  ;;  %3498 = vmatpush1.bf16.msra.mxu1 %v3521_v14 }
  0x2f   :  { %3315 = vmatprep.subr.bf16.mxu1 %v3570_v16 }
  0x31   :  { %390 = vmatmul.mubr.bf16.vlgmr.msra.gmra.mrb[0].mxu0 %v3522_v15  ;;  %454 = vmatmul.mubr.bf16.vlgmr.msra.gmra.mrb[0].mxu1 %v3546_v18 }
  0x32   :  { %2966 = vmatprep.mubr.msk.bf16.mxu0 %vm308_vm0, %v3525_v17  ;;  %2974 = vmatprep.mubr.msk.bf16.mxu1 %vm308_vm0, %v3549_v19 }
  0x37   :  { %3316 = vmatpush3.bf16.xpose.msra.mxu1 %v3571_v20 }
  0x38   :  { %3317 = vmatprep.subr.bf16.mxu1 %v3572_v21 }
  0x39   :  { %398 = vmatmul.mubr.bf16.gmra.mrb[4].mxu0 %v3527_v22  ;;  %462 = vmatmul.mubr.bf16.gmra.mrb[4].mxu1 %v3551_v23 }
  0x3a   :  { %2967 = vmatprep.mubr.msk.bf16.mxu0 %vm308_vm0, %v3528_v24  ;;  %2975 = vmatprep.mubr.msk.bf16.mxu1 %vm308_vm0, %v3552_v25 }
  0x3b   :  { %15 = vsyncpa [#allocation5], 0  ;;  %v3574_v27 = vld [vmem:[%s5264_s3 + $0x50] sm:$0xff]   ;;  %v3530_v28 = vld [vmem:[%s5261_s0 + $0x20] ss:$8 sps:$4 sm:$0xff]   ;;  %s3908_s16 = smov 2  }
  0x3c   :  { %v3554_v29 = vld [vmem:[%s5261_s0 + $0xa0] ss:$8 sps:$4 sm:$0xff]   ;;  %v3531_v30 = vld [vmem:[%s5261_s0 + $0x34] ss:$8 sps:$4 sm:$0xff]   ;;  %v3533_v34 = vld [vmem:[%s5261_s0 + $0x30] ss:$8 sps:$4 sm:$0xff]  }
  0x3d   :  { %v3555_v31 = vld [vmem:[%s5261_s0 + $0xb4] ss:$8 sps:$4 sm:$0xff]   ;;  %v3557_v35 = vld [vmem:[%s5261_s0 + $0xb0] ss:$8 sps:$4 sm:$0xff]   ;;  %v3534_v36 = vld [vmem:[%s5261_s0 + $0x44] ss:$8 sps:$4 sm:$0xff]  }
  0x3e   :  { %v3575_v32 = vld [vmem:[%s5264_s3 + $0x10] sm:$0xff]   ;;  %v3576_v33 = vld [vmem:[%s5264_s3 + $0x58] sm:$0xff]   ;;  %v3558_v37 = vld [vmem:[%s5261_s0 + $0xc4] ss:$8 sps:$4 sm:$0xff]   ;;  %vm2808_vm1 = vcmask 23568  }
  0x3f   :  { %3318 = vmatpush3.bf16.xpose.msra.mxu1 %v3573_v26  ;;  %v3577_v38 = vld [vmem:[%s5264_s3 + $0x18] sm:$0xff]   ;;  %v3578_v39 = vld [vmem:[%s5264_s3 + $0x60] sm:$0xff]   ;;  %v3580_v45 = vld [vmem:[%s5264_s3 + $0x68] sm:$0xff]  }
  0x40   :  { %3319 = vmatprep.subr.bf16.mxu1 %v3574_v27  ;;  %v3536_v40 = vld [vmem:[%s5261_s0 + $0x40] ss:$8 sps:$4 sm:$0xff]   ;;  %v3537_v42 = vld [vmem:[%s5261_s0 + $0x54] ss:$8 sps:$4 sm:$0xff]   ;;  %v3539_v46 = vld [vmem:[%s5261_s0 + $0x50] ss:$8 sps:$4 sm:$0xff]  }
  0x41   :  { %406 = vmatmul.mubr.bf16.gmra.mrb[8].mxu0 %v3530_v28  ;;  %470 = vmatmul.mubr.bf16.gmra.mrb[8].mxu1 %v3554_v29  ;;  %v3560_v41 = vld [vmem:[%s5261_s0 + $0xc0] ss:$8 sps:$4 sm:$0xff]   ;;  %v3561_v43 = vld [vmem:[%s5261_s0 + $0xd4] ss:$8 sps:$4 sm:$0xff]   ;;  %v3563_v47 = vld [vmem:[%s5261_s0 + $0xd0] ss:$8 sps:$4 sm:$0xff]  }
  0x42   :  { %2968 = vmatprep.mubr.msk.bf16.mxu0 %vm308_vm0, %v3531_v30  ;;  %2976 = vmatprep.mubr.msk.bf16.mxu1 %vm308_vm0, %v3555_v31  ;;  %v3579_v44 = vld [vmem:[%s5264_s3 + $0x20] sm:$0xff]   ;;  %v3581_v50 = vld [vmem:[%s5264_s3 + $0x28] sm:$0xff]   ;;  %v3582_v51 = vld [vmem:[%s5264_s3 + $0x70] sm:$0xff]  }
  0x43   :  { %v3540_v48 = vld [vmem:[%s5261_s0 + $0x64] ss:$8 sps:$4 sm:$0xff]   ;;  %v3542_v52 = vld [vmem:[%s5261_s0 + $0x60] ss:$8 sps:$4 sm:$0xff]   ;;  %v3543_v54 = vld [vmem:[%s5261_s0 + $0x74] ss:$8 sps:$4 sm:$0xff]  }
  0x44   :  { %v3564_v49 = vld [vmem:[%s5261_s0 + $0xe4] ss:$8 sps:$4 sm:$0xff]   ;;  %v3566_v53 = vld [vmem:[%s5261_s0 + $0xe0] ss:$8 sps:$4 sm:$0xff]   ;;  %v3567_v55 = vld [vmem:[%s5261_s0 + $0xf4] ss:$8 sps:$4 sm:$0xff]  }
  0x45   :  { %v3583_v56 = vld [vmem:[%s5264_s3 + $0x30] sm:$0xff]   ;;  %v3584_v59 = vld [vmem:[%s5264_s3 + $0x78] sm:$0xff]   ;;  %v4160_v61 = vld [vmem:[%s5263_s2] ss:$0 sm:$0xff] }
  0x46   :  { %v3545_v57 = vld [vmem:[%s5261_s0 + $0x70] ss:$8 sps:$4 sm:$0xff]  }
  0x47   :  { %3320 = vmatpush3.bf16.xpose.msra.mxu1 %v3575_v32  ;;  %v3569_v58 = vld [vmem:[%s5261_s0 + $0xf0] ss:$8 sps:$4 sm:$0xff]  }
  0x48   :  { %3321 = vmatprep.subr.bf16.mxu1 %v3576_v33  ;;  %v3585_v60 = vld [vmem:[%s5264_s3 + $0x38] sm:$0xff]  }
  0x49   :  { %414 = vmatmul.mubr.bf16.gmra.mrb[12].mxu0 %v3533_v34  ;;  %478 = vmatmul.mubr.bf16.gmra.mrb[12].mxu1 %v3557_v35 }
  0x4a   :  { %2969 = vmatprep.mubr.msk.bf16.mxu0 %vm308_vm0, %v3534_v36  ;;  %2977 = vmatprep.mubr.msk.bf16.mxu1 %vm308_vm0, %v3558_v37 }
  0x4f   :  { %3322 = vmatpush3.bf16.xpose.msra.mxu1 %v3577_v38 }
  0x50   :  { %3323 = vmatprep.subr.bf16.mxu1 %v3578_v39 }
  0x51   :  { %422 = vmatmul.mubr.bf16.gmra.mrb[16].mxu0 %v3536_v40  ;;  %486 = vmatmul.mubr.bf16.gmra.mrb[16].mxu1 %v3560_v41 }
  0x52   :  { %2970 = vmatprep.mubr.msk.bf16.mxu0 %vm308_vm0, %v3537_v42  ;;  %2978 = vmatprep.mubr.msk.bf16.mxu1 %vm308_vm0, %v3561_v43 }
  0x57   :  { %3324 = vmatpush3.bf16.xpose.msra.mxu1 %v3579_v44 }
  0x58   :  { %3325 = vmatprep.subr.bf16.mxu1 %v3580_v45 }
  0x59   :  { %430 = vmatmul.mubr.bf16.gmra.mrb[20].mxu0 %v3539_v46  ;;  %494 = vmatmul.mubr.bf16.gmra.mrb[20].mxu1 %v3563_v47 }
  0x5a   :  { %2971 = vmatprep.mubr.msk.bf16.mxu0 %vm308_vm0, %v3540_v48  ;;  %2979 = vmatprep.mubr.msk.bf16.mxu1 %vm308_vm0, %v3564_v49 }
  0x5f   :  { %3326 = vmatpush3.bf16.xpose.msra.mxu1 %v3581_v50 }
  0x60   :  { %3327 = vmatprep.subr.bf16.mxu1 %v3582_v51 }
  0x61   :  { %438 = vmatmul.mubr.bf16.gmra.mrb[24].mxu0 %v3542_v52  ;;  %502 = vmatmul.mubr.bf16.gmra.mrb[24].mxu1 %v3566_v53 }
  0x62   :  { %2972 = vmatprep.mubr.msk.bf16.mxu0 %vm308_vm0, %v3543_v54  ;;  %2980 = vmatprep.mubr.msk.bf16.mxu1 %vm308_vm0, %v3567_v55 }
  0x67   :  { %3328 = vmatpush3.bf16.xpose.msra.mxu1 %v3583_v56 }
  0x68   :  { %3329 = vmatprep.subr.bf16.mxu1 %v3584_v59 }
  0x69   :  { %446 = vmatmul.mubr.bf16.gmra.mrb[28].mxu0 %v3545_v57  ;;  %510 = vmatmul.mubr.bf16.gmra.mrb[28].mxu1 %v3569_v58 }
  0x6f   :  { %3330 = vmatpush3.bf16.xpose.msra.mxu1 %v3585_v60 }
 0x104   :  { %v391_v62 = vpop.f32.mrb[0].mxu0  ;;  %v455_v63 = vpop.f32.mrb[0].mxu1 }
 0x105   :  { %v392_v0 = vadd.f32 %v4160_v61, %v391_v62  ;;  %v393_v1 = vpop.f32.mrb[1].mxu0  ;;  %v456_v2 = vadd.f32 %v4160_v61, %v455_v63  ;;  %v457_v3 = vpop.f32.mrb[1].mxu1 }
 0x106   :  { %v394_v4 = vpop.f32.mrb[2].mxu0  ;;  %v458_v5 = vpop.f32.mrb[2].mxu1 }
 0x107   :  { %v518_v6 = vmax.f32 %v392_v0, 0.0  ;;  %v395_v7 = vadd.f32 %v4160_v61, %v394_v4  ;;  %v396_v8 = vpop.f32.mrb[3].mxu0  ;;  %v534_v9 = vmax.f32 %v456_v2, 0.0  ;;  %v459_v10 = vadd.f32 %v4160_v61, %v458_v5  ;;  %v460_v11 = vpop.f32.mrb[3].mxu1 }
 0x109   :  { %v519_v12 = vmax.f32 %v395_v7, 0.0  ;;  %v726_v13 = vmul.f32 0.088388346, %v534_v9  ;;  %v535_v14 = vmax.f32 %v459_v10, 0.0  ;;  %v710_v15 = vmul.f32 0.088388346, %v518_v6 }
 0x10b   :  { %v3144_v16 = vpack.c.bf16 %v519_v12, %v518_v6  ;;  %v711_v17 = vmul.f32 0.088388346, %v519_v12  ;;  %v3184_v18 = vpack.c.bf16 %v535_v14, %v534_v9  ;;  %v727_v19 = vmul.f32 0.088388346, %v535_v14 }
 0x10c   :  { %v399_v20 = vpop.f32.mrb[4].mxu0  ;;  %v463_v21 = vpop.f32.mrb[4].mxu1 }
 0x10d   :  { %3145 = vst [vmem:[#allocation2] sm:$0xff] %v3144_v16   ;;  %v400_v22 = vadd.f32 %v4160_v61, %v399_v20  ;;  %v401_v23 = vpop.f32.mrb[5].mxu0  ;;  %v742_v24 = vpack.c.bf16 %v711_v17, %v710_v15  ;;  %3292 = vst [vmem:[#allocation2 + $0x40] sm:$0xff] %v3184_v18   ;;  %v464_v25 = vadd.f32 %v4160_v61, %v463_v21  ;;  %v465_v26 = vpop.f32.mrb[5].mxu1 }
 0x10e   :  { %v4168_v27 = vpack.c.bf16 %v727_v19, %v726_v13  ;;  %v402_v28 = vpop.f32.mrb[6].mxu0  ;;  %v466_v29 = vpop.f32.mrb[6].mxu1 }
 0x10f   :  { %v520_v30 = vmax.f32 %v400_v22, 0.0  ;;  %v403_v31 = vadd.f32 %v4160_v61, %v402_v28  ;;  %v404_v32 = vpop.f32.mrb[7].mxu0  ;;  %3331 = vmatprep.mubr.bf16.mxu1 %v742_v24  ;;  %v536_v33 = vmax.f32 %v464_v25, 0.0  ;;  %v467_v34 = vadd.f32 %v4160_v61, %v466_v29  ;;  %v468_v35 = vpop.f32.mrb[7].mxu1 }
 0x110   :  { %3332 = vmatmul.mubr.bf16.vlgmr.msra.gmra.mrb[32].mxu1 %v742_v24 }
 0x111   :  { %v521_v36 = vmax.f32 %v403_v31, 0.0  ;;  %v728_v37 = vmul.f32 0.088388346, %v536_v33  ;;  %v537_v38 = vmax.f32 %v467_v34, 0.0  ;;  %v712_v39 = vmul.f32 0.088388346, %v520_v30 }
 0x113   :  { %v3149_v40 = vpack.c.bf16 %v521_v36, %v520_v30  ;;  %v713_v41 = vmul.f32 0.088388346, %v521_v36  ;;  %v3189_v42 = vpack.c.bf16 %v537_v38, %v536_v33  ;;  %v729_v43 = vmul.f32 0.088388346, %v537_v38 }
 0x114   :  { %v407_v44 = vpop.f32.mrb[8].mxu0  ;;  %v471_v45 = vpop.f32.mrb[8].mxu1 }
 0x115   :  { %3285 = vst [vmem:[#allocation2 + $0x8] sm:$0xff] %v3149_v40   ;;  %v408_v46 = vadd.f32 %v4160_v61, %v407_v44  ;;  %v409_v47 = vpop.f32.mrb[9].mxu0  ;;  %v743_v48 = vpack.c.bf16 %v713_v41, %v712_v39  ;;  %3293 = vst [vmem:[#allocation2 + $0x48] sm:$0xff] %v3189_v42   ;;  %v472_v49 = vadd.f32 %v4160_v61, %v471_v45  ;;  %v473_v50 = vpop.f32.mrb[9].mxu1 }
 0x116   :  { %v4174_v51 = vpack.c.bf16 %v729_v43, %v728_v37  ;;  %v410_v52 = vpop.f32.mrb[10].mxu0  ;;  %v474_v53 = vpop.f32.mrb[10].mxu1 }
 0x117   :  { %v522_v54 = vmax.f32 %v408_v46, 0.0  ;;  %v411_v55 = vadd.f32 %v4160_v61, %v410_v52  ;;  %3333 = vmatprep.mubr.bf16.mxu1 %v743_v48  ;;  %v412_v56 = vpop.f32.mrb[11].mxu0  ;;  %v538_v57 = vmax.f32 %v472_v49, 0.0  ;;  %v475_v58 = vadd.f32 %v4160_v61, %v474_v53  ;;  %v476_v59 = vpop.f32.mrb[11].mxu1 }
 0x118   :  { %3334 = vmatmul.mubr.bf16.gmra.mrb[36].mxu1 %v743_v48 }
 0x119   :  { %v714_v60 = vmul.f32 0.088388346, %v522_v54  ;;  %v523_v62 = vmax.f32 %v411_v55, 0.0  ;;  %v730_v63 = vmul.f32 0.088388346, %v538_v57  ;;  %v539_v0 = vmax.f32 %v475_v58, 0.0 }
 0x11b   :  { %v3154_v1 = vpack.c.bf16 %v523_v62, %v522_v54  ;;  %v715_v2 = vmul.f32 0.088388346, %v523_v62  ;;  %v3194_v3 = vpack.c.bf16 %v539_v0, %v538_v57  ;;  %v731_v4 = vmul.f32 0.088388346, %v539_v0 }
 0x11c   :  { %v415_v5 = vpop.f32.mrb[12].mxu0  ;;  %v479_v6 = vpop.f32.mrb[12].mxu1 }
 0x11d   :  { %3286 = vst [vmem:[#allocation2 + $0x10] sm:$0xff] %v3154_v1   ;;  %v416_v7 = vadd.f32 %v4160_v61, %v415_v5  ;;  %v417_v8 = vpop.f32.mrb[13].mxu0  ;;  %v744_v9 = vpack.c.bf16 %v715_v2, %v714_v60  ;;  %3294 = vst [vmem:[#allocation2 + $0x50] sm:$0xff] %v3194_v3   ;;  %v480_v10 = vadd.f32 %v4160_v61, %v479_v6  ;;  %v481_v11 = vpop.f32.mrb[13].mxu1 }
 0x11e   :  { %v4180_v12 = vpack.c.bf16 %v731_v4, %v730_v63  ;;  %v418_v13 = vpop.f32.mrb[14].mxu0  ;;  %v482_v14 = vpop.f32.mrb[14].mxu1 }
 0x11f   :  { %v524_v15 = vmax.f32 %v416_v7, 0.0  ;;  %v419_v16 = vadd.f32 %v4160_v61, %v418_v13  ;;  %3335 = vmatprep.mubr.bf16.mxu1 %v744_v9  ;;  %v420_v17 = vpop.f32.mrb[15].mxu0  ;;  %v540_v18 = vmax.f32 %v480_v10, 0.0  ;;  %v483_v19 = vadd.f32 %v4160_v61, %v482_v14  ;;  %v484_v20 = vpop.f32.mrb[15].mxu1 }
 0x120   :  { %3336 = vmatmul.mubr.bf16.gmra.mrb[40].mxu1 %v744_v9 }
 0x121   :  { %v716_v21 = vmul.f32 0.088388346, %v524_v15  ;;  %v525_v22 = vmax.f32 %v419_v16, 0.0  ;;  %v732_v23 = vmul.f32 0.088388346, %v540_v18  ;;  %v541_v24 = vmax.f32 %v483_v19, 0.0 }
 0x123   :  { %v3159_v25 = vpack.c.bf16 %v525_v22, %v524_v15  ;;  %v717_v26 = vmul.f32 0.088388346, %v525_v22  ;;  %v3199_v28 = vpack.c.bf16 %v541_v24, %v540_v18  ;;  %v733_v29 = vmul.f32 0.088388346, %v541_v24 }
 0x124   :  { %v423_v30 = vpop.f32.mrb[16].mxu0  ;;  %v487_v31 = vpop.f32.mrb[16].mxu1 }
 0x125   :  { %3287 = vst [vmem:[#allocation2 + $0x18] sm:$0xff] %v3159_v25   ;;  %v424_v32 = vadd.f32 %v4160_v61, %v423_v30  ;;  %v425_v33 = vpop.f32.mrb[17].mxu0  ;;  %v745_v34 = vpack.c.bf16 %v717_v26, %v716_v21  ;;  %3295 = vst [vmem:[#allocation2 + $0x58] sm:$0xff] %v3199_v28   ;;  %v488_v35 = vadd.f32 %v4160_v61, %v487_v31  ;;  %v489_v36 = vpop.f32.mrb[17].mxu1 }
 0x126   :  { %v4186_v37 = vpack.c.bf16 %v733_v29, %v732_v23  ;;  %v426_v38 = vpop.f32.mrb[18].mxu0  ;;  %v490_v39 = vpop.f32.mrb[18].mxu1 }
 0x127   :  { %v526_v40 = vmax.f32 %v424_v32, 0.0  ;;  %v427_v41 = vadd.f32 %v4160_v61, %v426_v38  ;;  %3337 = vmatprep.mubr.bf16.mxu1 %v745_v34  ;;  %v428_v42 = vpop.f32.mrb[19].mxu0  ;;  %v542_v43 = vmax.f32 %v488_v35, 0.0  ;;  %v491_v44 = vadd.f32 %v4160_v61, %v490_v39  ;;  %v492_v45 = vpop.f32.mrb[19].mxu1 }
 0x128   :  { %3338 = vmatmul.mubr.bf16.gmra.mrb[44].mxu1 %v745_v34 }
 0x129   :  { %v718_v46 = vmul.f32 0.088388346, %v526_v40  ;;  %v527_v47 = vmax.f32 %v427_v41, 0.0  ;;  %v734_v48 = vmul.f32 0.088388346, %v542_v43  ;;  %v543_v49 = vmax.f32 %v491_v44, 0.0 }
 0x12b   :  { %v3164_v50 = vpack.c.bf16 %v527_v47, %v526_v40  ;;  %v719_v52 = vmul.f32 0.088388346, %v527_v47  ;;  %v3204_v53 = vpack.c.bf16 %v543_v49, %v542_v43  ;;  %v735_v54 = vmul.f32 0.088388346, %v543_v49 }
 0x12c   :  { %v431_v55 = vpop.f32.mrb[20].mxu0  ;;  %v495_v56 = vpop.f32.mrb[20].mxu1 }
 0x12d   :  { %3288 = vst [vmem:[#allocation2 + $0x20] sm:$0xff] %v3164_v50   ;;  %v432_v57 = vadd.f32 %v4160_v61, %v431_v55  ;;  %v433_v58 = vpop.f32.mrb[21].mxu0  ;;  %v746_v59 = vpack.c.bf16 %v719_v52, %v718_v46  ;;  %3296 = vst [vmem:[#allocation2 + $0x60] sm:$0xff] %v3204_v53   ;;  %v496_v60 = vadd.f32 %v4160_v61, %v495_v56  ;;  %v497_v62 = vpop.f32.mrb[21].mxu1 }
 0x12e   :  { %v4192_v63 = vpack.c.bf16 %v735_v54, %v734_v48  ;;  %v434_v0 = vpop.f32.mrb[22].mxu0  ;;  %v498_v1 = vpop.f32.mrb[22].mxu1 }
 0x12f   :  { %v528_v2 = vmax.f32 %v432_v57, 0.0  ;;  %v435_v3 = vadd.f32 %v4160_v61, %v434_v0  ;;  %3339 = vmatprep.mubr.bf16.mxu1 %v746_v59  ;;  %v436_v4 = vpop.f32.mrb[23].mxu0  ;;  %v544_v5 = vmax.f32 %v496_v60, 0.0  ;;  %v499_v6 = vadd.f32 %v4160_v61, %v498_v1  ;;  %v500_v7 = vpop.f32.mrb[23].mxu1 }
 0x130   :  { %3340 = vmatmul.mubr.bf16.gmra.mrb[48].mxu1 %v746_v59 }
 0x131   :  { %v720_v8 = vmul.f32 0.088388346, %v528_v2  ;;  %v529_v9 = vmax.f32 %v435_v3, 0.0  ;;  %v736_v10 = vmul.f32 0.088388346, %v544_v5  ;;  %v545_v11 = vmax.f32 %v499_v6, 0.0 }
 0x133   :  { %v3169_v13 = vpack.c.bf16 %v529_v9, %v528_v2  ;;  %v721_v14 = vmul.f32 0.088388346, %v529_v9  ;;  %v3209_v15 = vpack.c.bf16 %v545_v11, %v544_v5  ;;  %v737_v16 = vmul.f32 0.088388346, %v545_v11  ;;  %v3593_v9 = vld [vmem:[%s5265_s4 + $0x18] sm:$0xff]  }
 0x134   :  { %v439_v17 = vpop.f32.mrb[24].mxu0  ;;  %v503_v18 = vpop.f32.mrb[24].mxu1 }
 0x135   :  { %3289 = vst [vmem:[#allocation2 + $0x28] sm:$0xff] %v3169_v13   ;;  %v440_v19 = vadd.f32 %v4160_v61, %v439_v17  ;;  %v441_v20 = vpop.f32.mrb[25].mxu0  ;;  %v747_v21 = vpack.c.bf16 %v721_v14, %v720_v8  ;;  %3297 = vst [vmem:[#allocation2 + $0x68] sm:$0xff] %v3209_v15   ;;  %v504_v22 = vadd.f32 %v4160_v61, %v503_v18  ;;  %v505_v23 = vpop.f32.mrb[25].mxu1  ;;  %v3592_v8 = vld [vmem:[%s5265_s4 + $0x58] sm:$0xff]   ;;  %v3595_v14 = vld [vmem:[%s5265_s4 + $0x20] sm:$0xff]  }
 0x136   :  { %v4198_v24 = vpack.c.bf16 %v737_v16, %v736_v10  ;;  %v442_v25 = vpop.f32.mrb[26].mxu0  ;;  %v506_v26 = vpop.f32.mrb[26].mxu1  ;;  %v3594_v10 = vld [vmem:[%s5265_s4 + $0x60] sm:$0xff]   ;;  %v3596_v18 = vld [vmem:[%s5265_s4 + $0x68] sm:$0xff]  }
 0x137   :  { %v530_v28 = vmax.f32 %v440_v19, 0.0  ;;  %v443_v29 = vadd.f32 %v4160_v61, %v442_v25  ;;  %3341 = vmatprep.mubr.bf16.mxu1 %v747_v21  ;;  %v444_v30 = vpop.f32.mrb[27].mxu0  ;;  %v546_v31 = vmax.f32 %v504_v22, 0.0  ;;  %v507_v32 = vadd.f32 %v4160_v61, %v506_v26  ;;  %v508_v33 = vpop.f32.mrb[27].mxu1  ;;  %v3597_v22 = vld [vmem:[%s5265_s4 + $0x28] sm:$0xff]  }
 0x138   :  { %3342 = vmatmul.mubr.bf16.gmra.mrb[52].mxu1 %v747_v21 }
 0x139   :  { %v722_v34 = vmul.f32 0.088388346, %v530_v28  ;;  %v531_v35 = vmax.f32 %v443_v29, 0.0  ;;  %v738_v36 = vmul.f32 0.088388346, %v546_v31  ;;  %v547_v38 = vmax.f32 %v507_v32, 0.0 }
 0x13b   :  { %v3174_v39 = vpack.c.bf16 %v531_v35, %v530_v28  ;;  %v723_v40 = vmul.f32 0.088388346, %v531_v35  ;;  %v3214_v41 = vpack.c.bf16 %v547_v38, %v546_v31  ;;  %v739_v42 = vmul.f32 0.088388346, %v547_v38 }
 0x13c   :  { %v447_v43 = vpop.f32.mrb[28].mxu0  ;;  %v511_v44 = vpop.f32.mrb[28].mxu1 }
 0x13d   :  { %3290 = vst [vmem:[#allocation2 + $0x30] sm:$0xff] %v3174_v39   ;;  %v448_v45 = vadd.f32 %v4160_v61, %v447_v43  ;;  %v449_v46 = vpop.f32.mrb[29].mxu0  ;;  %v748_v47 = vpack.c.bf16 %v723_v40, %v722_v34  ;;  %3298 = vst [vmem:[#allocation2 + $0x70] sm:$0xff] %v3214_v41   ;;  %v512_v48 = vadd.f32 %v4160_v61, %v511_v44  ;;  %v513_v49 = vpop.f32.mrb[29].mxu1 }
 0x13e   :  { %v756_v50 = vpack.c.bf16 %v739_v42, %v738_v36  ;;  %v450_v52 = vpop.f32.mrb[30].mxu0  ;;  %v514_v53 = vpop.f32.mrb[30].mxu1 }
 0x13f   :  { %v532_v54 = vmax.f32 %v448_v45, 0.0  ;;  %v451_v55 = vadd.f32 %v4160_v61, %v450_v52  ;;  %3343 = vmatprep.mubr.bf16.mxu1 %v748_v47  ;;  %v452_v56 = vpop.f32.mrb[31].mxu0  ;;  %v548_v57 = vmax.f32 %v512_v48, 0.0  ;;  %v515_v58 = vadd.f32 %v4160_v61, %v514_v53  ;;  %v516_v59 = vpop.f32.mrb[31].mxu1  ;;  %v3586_v61 = vld [vmem:[%s5265_s4 + $0x40] sm:$0xff]   ;;  %v3599_v48 = vld [vmem:[%s5265_s4 + $0x30] sm:$0xff]  }
 0x140   :  { %3344 = vmatmul.mubr.bf16.gmra.mrb[56].mxu1 %v748_v47  ;;  %3363 = vmatprep.subr.bf16.mxu0 %v3586_v61  ;;  %v3598_v47 = vld [vmem:[%s5265_s4 + $0x70] sm:$0xff]   ;;  %v3601_v59 = vld [vmem:[%s5265_s4 + $0x38] sm:$0xff]  }
 0x141   :  { %v724_v60 = vmul.f32 0.088388346, %v532_v54  ;;  %v533_v62 = vmax.f32 %v451_v55, 0.0  ;;  %v740_v0 = vmul.f32 0.088388346, %v548_v57  ;;  %v549_v1 = vmax.f32 %v515_v58, 0.0 }
 0x142   :  { %v3600_v58 = vld [vmem:[%s5265_s4 + $0x78] sm:$0xff]  }
 0x143   :  { %v3179_v2 = vpack.c.bf16 %v533_v62, %v532_v54  ;;  %v725_v3 = vmul.f32 0.088388346, %v533_v62  ;;  %v3219_v4 = vpack.c.bf16 %v549_v1, %v548_v57  ;;  %v741_v5 = vmul.f32 0.088388346, %v549_v1 }
 0x145   :  { %3291 = vst [vmem:[#allocation2 + $0x38] sm:$0xff] %v3179_v2   ;;  %v749_v6 = vpack.c.bf16 %v725_v3, %v724_v60  ;;  %3299 = vst [vmem:[#allocation2 + $0x78] sm:$0xff] %v3219_v4   ;;  %v757_v7 = vpack.c.bf16 %v741_v5, %v740_v0 }
 0x147   :  { %3345 = vmatprep.mubr.bf16.mxu1 %v749_v6 }
 0x148   :  { %3346 = vmatmul.mubr.bf16.gmra.mrb[60].mxu1 %v749_v6 }
 0x149   :  { %3347 = vmatprep.mubr.bf16.mxu1 %v4168_v27 }
 0x150   :  { %3348 = vmatmul.mubr.bf16.gmra.mrb[64].mxu1 %v4168_v27  ;;  %v3587_v27 = vld [vmem:[%s5265_s4] sm:$0xff]  }
 0x151   :  { %3349 = vmatprep.mubr.bf16.mxu1 %v4174_v51  ;;  %3364 = vmatpush3.bf16.msra.mxu0 %v3587_v27 }
 0x158   :  { %3350 = vmatmul.mubr.bf16.gmra.mrb[68].mxu1 %v4174_v51  ;;  %v3588_v51 = vld [vmem:[%s5265_s4 + $0x48] sm:$0xff]  }
 0x159   :  { %3351 = vmatprep.mubr.bf16.mxu1 %v4180_v12  ;;  %3365 = vmatprep.subr.bf16.mxu0 %v3588_v51 }
 0x160   :  { %3352 = vmatmul.mubr.bf16.gmra.mrb[72].mxu1 %v4180_v12  ;;  %v3589_v12 = vld [vmem:[%s5265_s4 + $0x8] sm:$0xff]  }
 0x161   :  { %3353 = vmatprep.mubr.bf16.mxu1 %v4186_v37  ;;  %3366 = vmatpush3.bf16.msra.mxu0 %v3589_v12 }
 0x168   :  { %3354 = vmatmul.mubr.bf16.gmra.mrb[76].mxu1 %v4186_v37  ;;  %v3590_v37 = vld [vmem:[%s5265_s4 + $0x50] sm:$0xff]  }
 0x169   :  { %3355 = vmatprep.mubr.bf16.mxu1 %v4192_v63  ;;  %3367 = vmatprep.subr.bf16.mxu0 %v3590_v37 }
 0x170   :  { %3356 = vmatmul.mubr.bf16.gmra.mrb[80].mxu1 %v4192_v63  ;;  %v3591_v63 = vld [vmem:[%s5265_s4 + $0x10] sm:$0xff]   ;;  %s3907_s4 = smov 1  }
 0x171   :  { %3357 = vmatprep.mubr.bf16.mxu1 %v4198_v24  ;;  %3368 = vmatpush3.bf16.msra.mxu0 %v3591_v63 }
 0x172   :  { %3369 = vmatprep.subr.bf16.mxu0 %v3592_v8 }
 0x175   :  { %3370 = vmatpush3.bf16.msra.mxu0 %v3593_v9 }
 0x176   :  { %3371 = vmatprep.subr.bf16.mxu0 %v3594_v10 }
 0x178   :  { %3358 = vmatmul.mubr.bf16.gmra.mrb[84].mxu1 %v4198_v24 }
 0x179   :  { %3359 = vmatprep.mubr.bf16.mxu1 %v756_v50  ;;  %3372 = vmatpush3.bf16.msra.mxu0 %v3595_v14 }
 0x17a   :  { %3373 = vmatprep.subr.bf16.mxu0 %v3596_v18 }
 0x17d   :  { %3374 = vmatpush3.bf16.msra.mxu0 %v3597_v22 }
 0x17e   :  { %3375 = vmatprep.subr.bf16.mxu0 %v3598_v47 }
 0x180   :  { %3360 = vmatmul.mubr.bf16.gmra.mrb[88].mxu1 %v756_v50 }
 0x181   :  { %3361 = vmatprep.mubr.bf16.mxu1 %v757_v7  ;;  %3376 = vmatpush3.bf16.msra.mxu0 %v3599_v48 }
 0x182   :  { %3377 = vmatprep.subr.bf16.mxu0 %v3600_v58 }
 0x185   :  { %3378 = vmatpush3.bf16.msra.mxu0 %v3601_v59 }
 0x188   :  { %3362 = vmatmul.mubr.bf16.gmra.mrb[92].mxu1 %v757_v7 }
 0x1e3   :  { %v4245_v11 = vpop.f32.mrb[32].mxu1 }
 0x1e4   :  { %v4247_v13 = vpop.f32.mrb[33].mxu1 }
 0x1e5   :  { %v3109_v15 = vpack.c.bf16 %v4247_v13, %v4245_v11  ;;  %v4254_v16 = vpop.f32.mrb[34].mxu1  ;;  %v1303_v17 = vmax.f32 %v4245_v11, %v4247_v13 }
 0x1e6   :  { %v4261_v19 = vpop.f32.mrb[35].mxu1 }
 0x1e7   :  { %1271 = vst [vmem:[#allocation4] sm:$0xff] %v3109_v15  ;;  %v3110_v20 = vpack.c.bf16 %v4261_v19, %v4254_v16  ;;  %1304 = vmax.xlane.f32.xlu0 %v1303_v17  ;;  %v1306_v21 = vmax.f32 %v4254_v16, %v4261_v19 }
 0x1e9   :  { %1272 = vst [vmem:[#allocation4 + $0x8] sm:$0xff] %v3110_v20 }
 0x1eb   :  { %1307 = vmax.xlane.f32.xlu0 %v1306_v21  ;;  %v4270_v23 = vpop.f32.mrb[36].mxu1 }
 0x1ec   :  { %v4272_v24 = vpop.f32.mrb[37].mxu1 }
 0x1ed   :  { %v3111_v25 = vpack.c.bf16 %v4272_v24, %v4270_v23  ;;  %v4276_v26 = vpop.f32.mrb[38].mxu1  ;;  %v1309_v28 = vmax.f32 %v4270_v23, %v4272_v24 }
 0x1ee   :  { %v4280_v29 = vpop.f32.mrb[39].mxu1 }
 0x1ef   :  { %1273 = vst [vmem:[#allocation4 + $0x10] sm:$0xff] %v3111_v25  ;;  %v3112_v30 = vpack.c.bf16 %v4280_v29, %v4276_v26  ;;  %1310 = vmax.xlane.f32.xlu1 %v1309_v28  ;;  %v1312_v31 = vmax.f32 %v4276_v26, %v4280_v29 }
 0x1f1   :  { %1274 = vst [vmem:[#allocation4 + $0x18] sm:$0xff] %v3112_v30 }
 0x1f3   :  { %1313 = vmax.xlane.f32.xlu1 %v1312_v31  ;;  %v4286_v32 = vpop.f32.mrb[40].mxu1 }
 0x1f4   :  { %v4288_v33 = vpop.f32.mrb[41].mxu1 }
 0x1f5   :  { %v3113_v34 = vpack.c.bf16 %v4288_v33, %v4286_v32  ;;  %v4292_v35 = vpop.f32.mrb[42].mxu1  ;;  %v1315_v36 = vmax.f32 %v4286_v32, %v4288_v33 }
 0x1f6   :  { %v4296_v38 = vpop.f32.mrb[43].mxu1 }
 0x1f7   :  { %1275 = vst [vmem:[#allocation4 + $0x20] sm:$0xff] %v3113_v34  ;;  %v3114_v39 = vpack.c.bf16 %v4296_v38, %v4292_v35  ;;  %1316 = vmax.xlane.f32.xlu0 %v1315_v36  ;;  %v1318_v40 = vmax.f32 %v4292_v35, %v4296_v38 }
 0x1f9   :  { %1276 = vst [vmem:[#allocation4 + $0x28] sm:$0xff] %v3114_v39  ;;  %1319 = vmax.xlane.f32.xlu1 %v1318_v40 }
 0x1fb   :  { %v4302_v41 = vpop.f32.mrb[44].mxu1 }
 0x1fc   :  { %v4304_v42 = vpop.f32.mrb[45].mxu1 }
 0x1fd   :  { %v3115_v43 = vpack.c.bf16 %v4304_v42, %v4302_v41  ;;  %v4308_v44 = vpop.f32.mrb[46].mxu1  ;;  %v1321_v45 = vmax.f32 %v4302_v41, %v4304_v42 }
 0x1fe   :  { %v4312_v46 = vpop.f32.mrb[47].mxu1 }
 0x1ff   :  { %1277 = vst [vmem:[#allocation4 + $0x30] sm:$0xff] %v3115_v43  ;;  %v3116_v49 = vpack.c.bf16 %v4312_v46, %v4308_v44  ;;  %1322 = vmax.xlane.f32.xlu0 %v1321_v45  ;;  %v1324_v50 = vmax.f32 %v4308_v44, %v4312_v46 }
 0x201   :  { %1278 = vst [vmem:[#allocation4 + $0x38] sm:$0xff] %v3116_v49  ;;  %1325 = vmax.xlane.f32.xlu1 %v1324_v50 }
 0x203   :  { %v4324_v52 = vpop.f32.mrb[48].mxu1 }
 0x204   :  { %v4326_v53 = vpop.f32.mrb[49].mxu1 }
 0x205   :  { %v3117_v54 = vpack.c.bf16 %v4326_v53, %v4324_v52  ;;  %v4330_v55 = vpop.f32.mrb[50].mxu1  ;;  %v1327_v56 = vmax.f32 %v4324_v52, %v4326_v53 }
 0x206   :  { %v4334_v57 = vpop.f32.mrb[51].mxu1 }
 0x207   :  { %1279 = vst [vmem:[#allocation4 + $0x40] sm:$0xff] %v3117_v54  ;;  %v3118_v60 = vpack.c.bf16 %v4334_v57, %v4330_v55  ;;  %1328 = vmax.xlane.f32.xlu0 %v1327_v56  ;;  %v1330_v62 = vmax.f32 %v4330_v55, %v4334_v57 }
 0x209   :  { %1280 = vst [vmem:[#allocation4 + $0x48] sm:$0xff] %v3118_v60  ;;  %1331 = vmax.xlane.f32.xlu1 %v1330_v62 }
 0x20b   :  { %v4346_v0 = vpop.f32.mrb[52].mxu1 }
 0x20c   :  { %v4348_v1 = vpop.f32.mrb[53].mxu1 }
 0x20d   :  { %v3119_v2 = vpack.c.bf16 %v4348_v1, %v4346_v0  ;;  %v4352_v3 = vpop.f32.mrb[54].mxu1  ;;  %v1333_v4 = vmax.f32 %v4346_v0, %v4348_v1 }
 0x20e   :  { %v4356_v5 = vpop.f32.mrb[55].mxu1 }
 0x20f   :  { %1281 = vst [vmem:[#allocation4 + $0x50] sm:$0xff] %v3119_v2  ;;  %v3120_v6 = vpack.c.bf16 %v4356_v5, %v4352_v3  ;;  %1334 = vmax.xlane.f32.xlu0 %v1333_v4  ;;  %v1336_v7 = vmax.f32 %v4352_v3, %v4356_v5 }
 0x211   :  { %1282 = vst [vmem:[#allocation4 + $0x58] sm:$0xff] %v3120_v6  ;;  %1337 = vmax.xlane.f32.xlu1 %v1336_v7 }
 0x213   :  { %v4362_v61 = vpop.f32.mrb[56].mxu1 }
 0x214   :  { %v4364_v27 = vpop.f32.mrb[57].mxu1 }
 0x215   :  { %v3121_v51 = vpack.c.bf16 %v4364_v27, %v4362_v61  ;;  %v4368_v12 = vpop.f32.mrb[58].mxu1  ;;  %v1339_v37 = vmax.f32 %v4362_v61, %v4364_v27 }
 0x216   :  { %v4372_v63 = vpop.f32.mrb[59].mxu1 }
 0x217   :  { %1283 = vst [vmem:[#allocation4 + $0x60] sm:$0xff] %v3121_v51  ;;  %v3122_v8 = vpack.c.bf16 %v4372_v63, %v4368_v12  ;;  %1340 = vmax.xlane.f32.xlu0 %v1339_v37  ;;  %v1342_v9 = vmax.f32 %v4368_v12, %v4372_v63 }
 0x219   :  { %1284 = vst [vmem:[#allocation4 + $0x68] sm:$0xff] %v3122_v8  ;;  %1343 = vmax.xlane.f32.xlu1 %v1342_v9 }
 0x21b   :  { %v4378_v10 = vpop.f32.mrb[60].mxu1 }
 0x21c   :  { %v4380_v14 = vpop.f32.mrb[61].mxu1 }
 0x21d   :  { %v3123_v15 = vpack.c.bf16 %v4380_v14, %v4378_v10  ;;  %v4384_v17 = vpop.f32.mrb[62].mxu1  ;;  %v1345_v18 = vmax.f32 %v4378_v10, %v4380_v14 }
 0x21e   :  { %v4388_v20 = vpop.f32.mrb[63].mxu1 }
 0x21f   :  { %1285 = vst [vmem:[#allocation4 + $0x70] sm:$0xff] %v3123_v15  ;;  %v3124_v21 = vpack.c.bf16 %v4388_v20, %v4384_v17  ;;  %1346 = vmax.xlane.f32.xlu0 %v1345_v18  ;;  %v1348_v22 = vmax.f32 %v4384_v17, %v4388_v20 }
 0x221   :  { %1286 = vst [vmem:[#allocation4 + $0x78] sm:$0xff] %v3124_v21  ;;  %1349 = vmax.xlane.f32.xlu1 %v1348_v22 }
 0x223   :  { %v4394_v25 = vpop.f32.mrb[64].mxu1 }
 0x224   :  { %v4396_v28 = vpop.f32.mrb[65].mxu1 }
 0x225   :  { %v3125_v30 = vpack.c.bf16 %v4396_v28, %v4394_v25  ;;  %v4400_v31 = vpop.f32.mrb[66].mxu1  ;;  %v1351_v34 = vmax.f32 %v4394_v25, %v4396_v28 }
 0x226   :  { %v4404_v36 = vpop.f32.mrb[67].mxu1 }
 0x227   :  { %1287 = vst [vmem:[#allocation4 + $0x80] sm:$0xff] %v3125_v30  ;;  %v3126_v39 = vpack.c.bf16 %v4404_v36, %v4400_v31  ;;  %1352 = vmax.xlane.f32.xlu0 %v1351_v34  ;;  %v1354_v40 = vmax.f32 %v4400_v31, %v4404_v36 }
 0x229   :  { %1288 = vst [vmem:[#allocation4 + $0x88] sm:$0xff] %v3126_v39  ;;  %1355 = vmax.xlane.f32.xlu1 %v1354_v40 }
 0x22b   :  { %v4410_v43 = vpop.f32.mrb[68].mxu1 }
 0x22c   :  { %v4412_v45 = vpop.f32.mrb[69].mxu1 }
 0x22d   :  { %v3127_v47 = vpack.c.bf16 %v4412_v45, %v4410_v43  ;;  %v4416_v48 = vpop.f32.mrb[70].mxu1  ;;  %v1357_v49 = vmax.f32 %v4410_v43, %v4412_v45 }
 0x22e   :  { %v4420_v50 = vpop.f32.mrb[71].mxu1 }
 0x22f   :  { %1289 = vst [vmem:[#allocation4 + $0x90] sm:$0xff] %v3127_v47  ;;  %v3128_v54 = vpack.c.bf16 %v4420_v50, %v4416_v48  ;;  %1358 = vmax.xlane.f32.xlu0 %v1357_v49  ;;  %v1360_v56 = vmax.f32 %v4416_v48, %v4420_v50 }
 0x231   :  { %1290 = vst [vmem:[#allocation4 + $0x98] sm:$0xff] %v3128_v54  ;;  %1361 = vmax.xlane.f32.xlu1 %v1360_v56 }
 0x233   :  { %v4426_v58 = vpop.f32.mrb[72].mxu1 }
 0x234   :  { %v4428_v59 = vpop.f32.mrb[73].mxu1 }
 0x235   :  { %v3129_v60 = vpack.c.bf16 %v4428_v59, %v4426_v58  ;;  %v4432_v62 = vpop.f32.mrb[74].mxu1  ;;  %v1363_v2 = vmax.f32 %v4426_v58, %v4428_v59 }
 0x236   :  { %v4436_v4 = vpop.f32.mrb[75].mxu1 }
 0x237   :  { %1291 = vst [vmem:[#allocation4 + $0xa0] sm:$0xff] %v3129_v60  ;;  %v3130_v6 = vpack.c.bf16 %v4436_v4, %v4432_v62  ;;  %1364 = vmax.xlane.f32.xlu0 %v1363_v2  ;;  %v1366_v7 = vmax.f32 %v4432_v62, %v4436_v4 }
 0x239   :  { %1292 = vst [vmem:[#allocation4 + $0xa8] sm:$0xff] %v3130_v6  ;;  %1367 = vmax.xlane.f32.xlu1 %v1366_v7 }
 0x23b   :  { %v4442_v51 = vpop.f32.mrb[76].mxu1 }
 0x23c   :  { %v4444_v37 = vpop.f32.mrb[77].mxu1 }
 0x23d   :  { %v3131_v8 = vpack.c.bf16 %v4444_v37, %v4442_v51  ;;  %v4448_v9 = vpop.f32.mrb[78].mxu1  ;;  %v1369_v15 = vmax.f32 %v4442_v51, %v4444_v37 }
 0x23e   :  { %v4452_v18 = vpop.f32.mrb[79].mxu1 }
 0x23f   :  { %1293 = vst [vmem:[#allocation4 + $0xb0] sm:$0xff] %v3131_v8  ;;  %v3132_v21 = vpack.c.bf16 %v4452_v18, %v4448_v9  ;;  %1370 = vmax.xlane.f32.xlu0 %v1369_v15  ;;  %v1372_v22 = vmax.f32 %v4448_v9, %v4452_v18 }
 0x241   :  { %1294 = vst [vmem:[#allocation4 + $0xb8] sm:$0xff] %v3132_v21  ;;  %1373 = vmax.xlane.f32.xlu1 %v1372_v22 }
 0x243   :  { %v4458_v30 = vpop.f32.mrb[80].mxu1 }
 0x244   :  { %v4460_v34 = vpop.f32.mrb[81].mxu1 }
 0x245   :  { %5290 = vst [vmem:[#allocation8_spill] sm:$0xff] %v4460_v34  ;;  %v3133_v39 = vpack.c.bf16 %v4460_v34, %v4458_v30  ;;  %v4464_v40 = vpop.f32.mrb[82].mxu1  ;;  %v1375_v47 = vmax.f32 %v4458_v30, %v4460_v34 }
 0x246   :  { %5291 = vst [vmem:[#allocation9_spill] sm:$0xff] %v4464_v40  ;;  %v4468_v49 = vpop.f32.mrb[83].mxu1 }
 0x247   :  { %5292 = vst [vmem:[#allocation10_spill] sm:$0xff] %v4468_v49  ;;  %1295 = vst [vmem:[#allocation4 + $0xc0] sm:$0xff] %v3133_v39  ;;  %v3134_v54 = vpack.c.bf16 %v4468_v49, %v4464_v40  ;;  %1376 = vmax.xlane.f32.xlu0 %v1375_v47  ;;  %v1378_v56 = vmax.f32 %v4464_v40, %v4468_v49 }
 0x249   :  { %1296 = vst [vmem:[#allocation4 + $0xc8] sm:$0xff] %v3134_v54  ;;  %1379 = vmax.xlane.f32.xlu1 %v1378_v56 }
 0x24b   :  { %v4474_v60 = vpop.f32.mrb[84].mxu1 }
 0x24c   :  { %5293 = vst [vmem:[#allocation11_spill] sm:$0xff] %v4474_v60  ;;  %v4476_v2 = vpop.f32.mrb[85].mxu1 }
 0x24d   :  { %5294 = vst [vmem:[#allocation12_spill] sm:$0xff] %v4476_v2  ;;  %v3135_v6 = vpack.c.bf16 %v4476_v2, %v4474_v60  ;;  %v4480_v7 = vpop.f32.mrb[86].mxu1  ;;  %v1381_v8 = vmax.f32 %v4474_v60, %v4476_v2 }
 0x24e   :  { %5295 = vst [vmem:[#allocation13_spill] sm:$0xff] %v4480_v7  ;;  %v4484_v15 = vpop.f32.mrb[87].mxu1 }
 0x24f   :  { %5296 = vst [vmem:[#allocation14_spill] sm:$0xff] %v4484_v15  ;;  %1297 = vst [vmem:[#allocation4 + $0xd0] sm:$0xff] %v3135_v6  ;;  %v3136_v21 = vpack.c.bf16 %v4484_v15, %v4480_v7  ;;  %1382 = vmax.xlane.f32.xlu0 %v1381_v8  ;;  %v1384_v22 = vmax.f32 %v4480_v7, %v4484_v15 }
 0x251   :  { %1298 = vst [vmem:[#allocation4 + $0xd8] sm:$0xff] %v3136_v21  ;;  %1385 = vmax.xlane.f32.xlu1 %v1384_v22 }
 0x253   :  { %v4490_v39 = vpop.f32.mrb[88].mxu1 }
 0x254   :  { %5297 = vst [vmem:[#allocation15_spill] sm:$0xff] %v4490_v39  ;;  %v4492_v47 = vpop.f32.mrb[89].mxu1 }
 0x255   :  { %5298 = vst [vmem:[#allocation16_spill] sm:$0xff] %v4492_v47  ;;  %v3137_v54 = vpack.c.bf16 %v4492_v47, %v4490_v39  ;;  %v4496_v56 = vpop.f32.mrb[90].mxu1  ;;  %v1387_v6 = vmax.f32 %v4490_v39, %v4492_v47 }
 0x256   :  { %5299 = vst [vmem:[#allocation17_spill] sm:$0xff] %v4496_v56  ;;  %v4500_v2 = vpop.f32.mrb[91].mxu1 }
 0x257   :  { %5300 = vst [vmem:[#allocation18_spill] sm:$0xff] %v4500_v2  ;;  %1299 = vst [vmem:[#allocation4 + $0xe0] sm:$0xff] %v3137_v54  ;;  %v3138_v8 = vpack.c.bf16 %v4500_v2, %v4496_v56  ;;  %1388 = vmax.xlane.f32.xlu0 %v1387_v6  ;;  %v1390_v21 = vmax.f32 %v4496_v56, %v4500_v2 }
 0x259   :  { %1300 = vst [vmem:[#allocation4 + $0xe8] sm:$0xff] %v3138_v8  ;;  %1391 = vmax.xlane.f32.xlu1 %v1390_v21 }
 0x25b   :  { %v4506_v22 = vpop.f32.mrb[92].mxu1 }
 0x25c   :  { %5301 = vst [vmem:[#allocation19_spill] sm:$0xff] %v4506_v22  ;;  %v4508_v15 = vpop.f32.mrb[93].mxu1 }
 0x25d   :  { %5302 = vst [vmem:[#allocation20_spill] sm:$0xff] %v4508_v15  ;;  %v3139_v7 = vpack.c.bf16 %v4508_v15, %v4506_v22  ;;  %v4512_v47 = vpop.f32.mrb[94].mxu1  ;;  %v1393_v54 = vmax.f32 %v4506_v22, %v4508_v15 }
 0x25e   :  { %v4516_v39 = vpop.f32.mrb[95].mxu1 }
 0x25f   :  { %1301 = vst [vmem:[#allocation4 + $0xf0] sm:$0xff] %v3139_v7  ;;  %v3140_v6 = vpack.c.bf16 %v4516_v39, %v4512_v47  ;;  %1394 = vmax.xlane.f32.xlu0 %v1393_v54  ;;  %v1396_v8 = vmax.f32 %v4512_v47, %v4516_v39 }
 0x261   :  { %1302 = vst [vmem:[#allocation4 + $0xf8] sm:$0xff] %v3140_v6  ;;  %1397 = vmax.xlane.f32.xlu1 %v1396_v8 }
 0x274   :  { %v1305_v21 = vpop.xlane.xlu0 %1304 }
 0x275   :  { %v1399_v2 = vsub.f32 %v4245_v11, %v1305_v21  ;;  %v1400_v56 = vsub.f32 %v4247_v13, %v1305_v21 }
 0x277   :  { %v1463_v60 = vmul.f32 1.442695, %v1399_v2  ;;  %v1465_v49 = vmul.f32 1.442695, %v1400_v56 }
 0x278   :  { %v1308_v15 = vpop.xlane.xlu0 %1307 }
 0x279   :  { %v1401_v22 = vsub.f32 %v4254_v16, %v1308_v15  ;;  %v1402_v7 = vsub.f32 %v4261_v19, %v1308_v15  ;;  %3602 = vpow2.f32 %v1463_v60 }
 0x27a   :  { %3604 = vpow2.f32 %v1465_v49 }
 0x27b   :  { %v1467_v40 = vmul.f32 1.442695, %v1401_v22  ;;  %v1469_v54 = vmul.f32 1.442695, %v1402_v7 }
 0x27c   :  { %v1311_v34 = vpop.xlane.xlu1 %1310 }
 0x27d   :  { %3606 = vpow2.f32 %v1467_v40  ;;  %v1403_v6 = vsub.f32 %v4270_v23, %v1311_v34  ;;  %v1404_v8 = vsub.f32 %v4272_v24, %v1311_v34 }
 0x27e   :  { %3608 = vpow2.f32 %v1469_v54 }
 0x27f   :  { %v1471_v11 = vmul.f32 1.442695, %v1403_v6  ;;  %v1473_v13 = vmul.f32 1.442695, %v1404_v8 }
 0x280   :  { %v1314_v2 = vpop.xlane.xlu1 %1313 }
 0x281   :  { %v1405_v56 = vsub.f32 %v4276_v26, %v1314_v2  ;;  %v1406_v16 = vsub.f32 %v4280_v29, %v1314_v2  ;;  %3610 = vpow2.f32 %v1471_v11 }
 0x282   :  { %3612 = vpow2.f32 %v1473_v13 }
 0x283   :  { %v1475_v19 = vmul.f32 1.442695, %v1405_v56  ;;  %v1477_v60 = vmul.f32 1.442695, %v1406_v16  ;;  %v3603_v49 = vpop.eup %3602 }
 0x284   :  { %v1317_v15 = vpop.xlane.xlu0 %1316  ;;  %v3605_v24 = vpop.eup %3604 }
 0x285   :  { %3614 = vpow2.f32 %v1475_v19  ;;  %v1407_v40 = vsub.f32 %v4286_v32, %v1317_v15  ;;  %v1408_v23 = vsub.f32 %v4288_v33, %v1317_v15 }
 0x286   :  { %3616 = vpow2.f32 %v1477_v60  ;;  %v1320_v34 = vpop.xlane.xlu1 %1319 }
 0x287   :  { %v3607_v22 = vpop.eup %3606  ;;  %v1479_v21 = vmul.f32 1.442695, %v1407_v40  ;;  %v1409_v26 = vsub.f32 %v4292_v35, %v1320_v34  ;;  %v1410_v29 = vsub.f32 %v4296_v38, %v1320_v34  ;;  %v1481_v6 = vmul.f32 1.442695, %v1408_v23 }
 0x288   :  { %v3609_v7 = vpop.eup %3608  ;;  %v1591_v54 = vpack.c.bf16 %v3607_v22, %v3603_v49 }
 0x289   :  { %v1483_v8 = vmul.f32 1.442695, %v1409_v26  ;;  %v1485_v11 = vmul.f32 1.442695, %v1410_v29  ;;  %v1592_v13 = vpack.c.bf16 %v3609_v7, %v3605_v24  ;;  %3618 = vpow2.f32 %v1479_v21 }
 0x28b   :  { %3620 = vpow2.f32 %v1483_v8  ;;  %1783 = vmatprep.mubr.bf16.mxu0 %v1592_v13  ;;  %v3611_v33 = vpop.eup %3610 }
 0x28c   :  { %3622 = vpow2.f32 %v1485_v11  ;;  %1784 = vmatmul.mubr.bf16.vlgmr.msra.gmra.mrb[32].mxu0 %v1591_v54  ;;  %v1323_v32 = vpop.xlane.xlu0 %1322  ;;  %v3613_v56 = vpop.eup %3612 }
 0x28d   :  { %3624 = vpow2.f32 %v1481_v6  ;;  %v1411_v2 = vsub.f32 %v4302_v41, %v1323_v32  ;;  %v1412_v35 = vsub.f32 %v4304_v42, %v1323_v32 }
 0x28e   :  { %v1326_v38 = vpop.xlane.xlu1 %1325 }
 0x28f   :  { %v3615_v16 = vpop.eup %3614  ;;  %v1487_v19 = vmul.f32 1.442695, %v1411_v2  ;;  %v1413_v60 = vsub.f32 %v4308_v44, %v1326_v38  ;;  %v1414_v15 = vsub.f32 %v4312_v46, %v1326_v38  ;;  %v1489_v23 = vmul.f32 1.442695, %v1412_v35 }
 0x290   :  { %v3617_v49 = vpop.eup %3616  ;;  %v1593_v40 = vpack.c.bf16 %v3615_v16, %v3611_v33 }
 0x291   :  { %v1491_v24 = vmul.f32 1.442695, %v1413_v60  ;;  %v1493_v34 = vmul.f32 1.442695, %v1414_v15  ;;  %v1594_v22 = vpack.c.bf16 %v3617_v49, %v3613_v56  ;;  %3626 = vpow2.f32 %v1487_v19 }
 0x293   :  { %3628 = vpow2.f32 %v1491_v24  ;;  %1791 = vmatprep.mubr.bf16.mxu0 %v1594_v22  ;;  %v3619_v41 = vpop.eup %3618 }
 0x294   :  { %3630 = vpow2.f32 %v1493_v34  ;;  %1792 = vmatmul.mubr.bf16.gmra.mrb[36].mxu0 %v1593_v40  ;;  %v1329_v42 = vpop.xlane.xlu0 %1328 }
 0x295   :  { %v3621_v21 = vpop.eup %3620  ;;  %3632 = vpow2.f32 %v1489_v23  ;;  %v1415_v26 = vsub.f32 %v4324_v52, %v1329_v42  ;;  %v1416_v44 = vsub.f32 %v4326_v53, %v1329_v42 }
 0x296   :  { %v3623_v46 = vpop.eup %3622  ;;  %v1332_v29 = vpop.xlane.xlu1 %1331  ;;  %v1595_v7 = vpack.c.bf16 %v3621_v21, %v3619_v41 }
 0x297   :  { %v3625_v54 = vpop.eup %3624  ;;  %v1495_v6 = vmul.f32 1.442695, %v1415_v26  ;;  %v1417_v8 = vsub.f32 %v4330_v55, %v1332_v29  ;;  %v1418_v11 = vsub.f32 %v4334_v57, %v1332_v29  ;;  %v1497_v32 = vmul.f32 1.442695, %v1416_v44 }
 0x298   :  { %v1596_v13 = vpack.c.bf16 %v3623_v46, %v3625_v54 }
 0x299   :  { %v1499_v33 = vmul.f32 1.442695, %v1417_v8  ;;  %v1501_v2 = vmul.f32 1.442695, %v1418_v11  ;;  %3634 = vpow2.f32 %v1495_v6 }
 0x29a   :  { %1799 = vmatprep.mubr.bf16.mxu0 %v1596_v13 }
 0x29b   :  { %3636 = vpow2.f32 %v1499_v33  ;;  %v3627_v35 = vpop.eup %3626 }
 0x29c   :  { %3638 = vpow2.f32 %v1501_v2  ;;  %1800 = vmatmul.mubr.bf16.gmra.mrb[40].mxu0 %v1595_v7  ;;  %v1335_v52 = vpop.xlane.xlu0 %1334 }
 0x29d   :  { %v3629_v53 = vpop.eup %3628  ;;  %3640 = vpow2.f32 %v1497_v32  ;;  %v1419_v56 = vsub.f32 %v4346_v0, %v1335_v52  ;;  %v1420_v38 = vsub.f32 %v4348_v1, %v1335_v52 }
 0x29e   :  { %v3631_v55 = vpop.eup %3630  ;;  %v1338_v16 = vpop.xlane.xlu1 %1337  ;;  %v1597_v57 = vpack.c.bf16 %v3629_v53, %v3627_v35 }
 0x29f   :  { %v3633_v19 = vpop.eup %3632  ;;  %v1503_v60 = vmul.f32 1.442695, %v1419_v56  ;;  %v1421_v15 = vsub.f32 %v4352_v3, %v1338_v16  ;;  %v1422_v49 = vsub.f32 %v4356_v5, %v1338_v16  ;;  %v1505_v23 = vmul.f32 1.442695, %v1420_v38 }
 0x2a0   :  { %v1598_v40 = vpack.c.bf16 %v3631_v55, %v3633_v19 }
 0x2a1   :  { %v1507_v24 = vmul.f32 1.442695, %v1421_v15  ;;  %v1509_v34 = vmul.f32 1.442695, %v1422_v49  ;;  %3642 = vpow2.f32 %v1503_v60 }
 0x2a2   :  { %1807 = vmatprep.mubr.bf16.mxu0 %v1598_v40 }
 0x2a3   :  { %3644 = vpow2.f32 %v1507_v24  ;;  %v3635_v22 = vpop.eup %3634 }
 0x2a4   :  { %3646 = vpow2.f32 %v1509_v34  ;;  %1808 = vmatmul.mubr.bf16.gmra.mrb[44].mxu0 %v1597_v57  ;;  %v1341_v0 = vpop.xlane.xlu0 %1340 }
 0x2a5   :  { %v3637_v1 = vpop.eup %3636  ;;  %3648 = vpow2.f32 %v1505_v23  ;;  %v1423_v41 = vsub.f32 %v4362_v61, %v1341_v0  ;;  %v1424_v42 = vsub.f32 %v4364_v27, %v1341_v0 }
 0x2a6   :  { %v3639_v3 = vpop.eup %3638  ;;  %v1344_v21 = vpop.xlane.xlu1 %1343  ;;  %v1599_v5 = vpack.c.bf16 %v3637_v1, %v3635_v22 }
 0x2a7   :  { %v3641_v26 = vpop.eup %3640  ;;  %v1511_v44 = vmul.f32 1.442695, %v1423_v41  ;;  %v1425_v46 = vsub.f32 %v4368_v12, %v1344_v21  ;;  %v1426_v29 = vsub.f32 %v4372_v63, %v1344_v21  ;;  %v1513_v54 = vmul.f32 1.442695, %v1424_v42 }
 0x2a8   :  { %v1600_v7 = vpack.c.bf16 %v3639_v3, %v3641_v26 }
 0x2a9   :  { %v1515_v6 = vmul.f32 1.442695, %v1425_v46  ;;  %v1517_v8 = vmul.f32 1.442695, %v1426_v29  ;;  %3650 = vpow2.f32 %v1511_v44 }
 0x2aa   :  { %1815 = vmatprep.mubr.bf16.mxu0 %v1600_v7 }
 0x2ab   :  { %3652 = vpow2.f32 %v1515_v6  ;;  %v3643_v11 = vpop.eup %3642 }
 0x2ac   :  { %3654 = vpow2.f32 %v1517_v8  ;;  %1816 = vmatmul.mubr.bf16.gmra.mrb[48].mxu0 %v1599_v5  ;;  %v1347_v61 = vpop.xlane.xlu0 %1346 }
 0x2ad   :  { %v3645_v27 = vpop.eup %3644  ;;  %3656 = vpow2.f32 %v1513_v54  ;;  %v1427_v13 = vsub.f32 %v4378_v10, %v1347_v61  ;;  %v1428_v32 = vsub.f32 %v4380_v14, %v1347_v61 }
 0x2ae   :  { %v3647_v12 = vpop.eup %3646  ;;  %v1350_v33 = vpop.xlane.xlu1 %1349  ;;  %v1601_v63 = vpack.c.bf16 %v3645_v27, %v3643_v11 }
 0x2af   :  { %v3649_v2 = vpop.eup %3648  ;;  %v1519_v35 = vmul.f32 1.442695, %v1427_v13  ;;  %v1429_v52 = vsub.f32 %v4384_v17, %v1350_v33  ;;  %v1430_v53 = vsub.f32 %v4388_v20, %v1350_v33  ;;  %v1521_v38 = vmul.f32 1.442695, %v1428_v32 }
 0x2b0   :  { %v1602_v56 = vpack.c.bf16 %v3647_v12, %v3649_v2 }
 0x2b1   :  { %v1523_v55 = vmul.f32 1.442695, %v1429_v52  ;;  %v1525_v16 = vmul.f32 1.442695, %v1430_v53  ;;  %3658 = vpow2.f32 %v1519_v35 }
 0x2b2   :  { %1823 = vmatprep.mubr.bf16.mxu0 %v1602_v56 }
 0x2b3   :  { %3660 = vpow2.f32 %v1523_v55  ;;  %v3651_v57 = vpop.eup %3650 }
 0x2b4   :  { %3662 = vpow2.f32 %v1525_v16  ;;  %1824 = vmatmul.mubr.bf16.gmra.mrb[52].mxu0 %v1601_v63  ;;  %v1353_v10 = vpop.xlane.xlu0 %1352 }
 0x2b5   :  { %v3653_v14 = vpop.eup %3652  ;;  %3664 = vpow2.f32 %v1521_v38  ;;  %v1431_v19 = vsub.f32 %v4394_v25, %v1353_v10  ;;  %v1432_v60 = vsub.f32 %v4396_v28, %v1353_v10 }
 0x2b6   :  { %v3655_v17 = vpop.eup %3654  ;;  %v1356_v15 = vpop.xlane.xlu1 %1355  ;;  %v1603_v20 = vpack.c.bf16 %v3653_v14, %v3651_v57 }
 0x2b7   :  { %v3657_v49 = vpop.eup %3656  ;;  %v1527_v40 = vmul.f32 1.442695, %v1431_v19  ;;  %v1433_v23 = vsub.f32 %v4400_v31, %v1356_v15  ;;  %v1434_v24 = vsub.f32 %v4404_v36, %v1356_v15  ;;  %v1529_v22 = vmul.f32 1.442695, %v1432_v60 }
 0x2b8   :  { %v1604_v34 = vpack.c.bf16 %v3655_v17, %v3657_v49 }
 0x2b9   :  { %v1531_v0 = vmul.f32 1.442695, %v1433_v23  ;;  %v1533_v1 = vmul.f32 1.442695, %v1434_v24  ;;  %3666 = vpow2.f32 %v1527_v40  ;;  %v5303_v40 = vld [vmem:[#allocation8_spill] sm:$0xff] }
 0x2ba   :  { %1831 = vmatprep.mubr.bf16.mxu0 %v1604_v34 }
 0x2bb   :  { %3668 = vpow2.f32 %v1531_v0  ;;  %v3659_v41 = vpop.eup %3658  ;;  %v5304_v0 = vld [vmem:[#allocation9_spill] sm:$0xff] }
 0x2bc   :  { %3670 = vpow2.f32 %v1533_v1  ;;  %1832 = vmatmul.mubr.bf16.gmra.mrb[56].mxu0 %v1603_v20  ;;  %v1359_v25 = vpop.xlane.xlu0 %1358 }
 0x2bd   :  { %v3661_v28 = vpop.eup %3660  ;;  %3672 = vpow2.f32 %v1529_v22  ;;  %v1435_v42 = vsub.f32 %v4410_v43, %v1359_v25  ;;  %v1436_v3 = vsub.f32 %v4412_v45, %v1359_v25 }
 0x2be   :  { %v3663_v31 = vpop.eup %3662  ;;  %v1362_v21 = vpop.xlane.xlu1 %1361  ;;  %v1605_v36 = vpack.c.bf16 %v3661_v28, %v3659_v41  ;;  %v5305_v41 = vld [vmem:[#allocation10_spill] sm:$0xff] }
 0x2bf   :  { %v3665_v5 = vpop.eup %3664  ;;  %v1535_v26 = vmul.f32 1.442695, %v1435_v42  ;;  %v1437_v44 = vsub.f32 %v4416_v48, %v1362_v21  ;;  %v1438_v46 = vsub.f32 %v4420_v50, %v1362_v21  ;;  %v1537_v7 = vmul.f32 1.442695, %v1436_v3 }
 0x2c0   :  { %v1606_v29 = vpack.c.bf16 %v3663_v31, %v3665_v5  ;;  %v5306_v5 = vld [vmem:[#allocation11_spill] sm:$0xff] }
 0x2c1   :  { %v1539_v54 = vmul.f32 1.442695, %v1437_v44  ;;  %v1541_v6 = vmul.f32 1.442695, %v1438_v46  ;;  %3674 = vpow2.f32 %v1535_v26  ;;  %v5307_v44 = vld [vmem:[#allocation12_spill] sm:$0xff] }
 0x2c2   :  { %1839 = vmatprep.mubr.bf16.mxu0 %v1606_v29 }
 0x2c3   :  { %3676 = vpow2.f32 %v1539_v54  ;;  %v3667_v8 = vpop.eup %3666 }
 0x2c4   :  { %3678 = vpow2.f32 %v1541_v6  ;;  %1840 = vmatmul.mubr.bf16.gmra.mrb[60].mxu0 %v1605_v36  ;;  %v1365_v43 = vpop.xlane.xlu0 %1364 }
 0x2c5   :  { %v3669_v45 = vpop.eup %3668  ;;  %3680 = vpow2.f32 %v1537_v7  ;;  %v1439_v11 = vsub.f32 %v4426_v58, %v1365_v43  ;;  %v1440_v61 = vsub.f32 %v4428_v59, %v1365_v43  ;;  %v5308_v43 = vld [vmem:[#allocation13_spill] sm:$0xff] }
 0x2c6   :  { %v3671_v48 = vpop.eup %3670  ;;  %v1368_v27 = vpop.xlane.xlu1 %1367  ;;  %v1607_v50 = vpack.c.bf16 %v3669_v45, %v3667_v8 }
 0x2c7   :  { %v3673_v13 = vpop.eup %3672  ;;  %v1543_v32 = vmul.f32 1.442695, %v1439_v11  ;;  %v1441_v12 = vsub.f32 %v4432_v62, %v1368_v27  ;;  %v1442_v33 = vsub.f32 %v4436_v4, %v1368_v27  ;;  %v1545_v2 = vmul.f32 1.442695, %v1440_v61  ;;  %v5309_v11 = vld [vmem:[#allocation14_spill] sm:$0xff] }
 0x2c8   :  { %v1608_v63 = vpack.c.bf16 %v3671_v48, %v3673_v13 }
 0x2c9   :  { %v1547_v35 = vmul.f32 1.442695, %v1441_v12  ;;  %v1549_v52 = vmul.f32 1.442695, %v1442_v33  ;;  %3682 = vpow2.f32 %v1543_v32 }
 0x2ca   :  { %1847 = vmatprep.mubr.bf16.mxu0 %v1608_v63  ;;  %v5310_v63 = vld [vmem:[#allocation15_spill] sm:$0xff] }
 0x2cb   :  { %3684 = vpow2.f32 %v1547_v35  ;;  %v3675_v53 = vpop.eup %3674  ;;  %v5311_v35 = vld [vmem:[#allocation16_spill] sm:$0xff] }
 0x2cc   :  { %3686 = vpow2.f32 %v1549_v52  ;;  %1848 = vmatmul.mubr.bf16.gmra.mrb[64].mxu0 %v1607_v50  ;;  %v1371_v58 = vpop.xlane.xlu0 %1370 }
 0x2cd   :  { %v3677_v59 = vpop.eup %3676  ;;  %3688 = vpow2.f32 %v1545_v2  ;;  %v1443_v56 = vsub.f32 %v4442_v51, %v1371_v58  ;;  %v1444_v38 = vsub.f32 %v4444_v37, %v1371_v58 }
 0x2ce   :  { %v3679_v62 = vpop.eup %3678  ;;  %v1374_v55 = vpop.xlane.xlu1 %1373  ;;  %v1609_v4 = vpack.c.bf16 %v3677_v59, %v3675_v53 }
 0x2cf   :  { %v3681_v16 = vpop.eup %3680  ;;  %v1551_v57 = vmul.f32 1.442695, %v1443_v56  ;;  %v1445_v10 = vsub.f32 %v4448_v9, %v1374_v55  ;;  %v1446_v14 = vsub.f32 %v4452_v18, %v1374_v55  ;;  %v1553_v60 = vmul.f32 1.442695, %v1444_v38  ;;  %v5312_v55 = vld [vmem:[#allocation17_spill] sm:$0xff] }
 0x2d0   :  { %v1610_v19 = vpack.c.bf16 %v3679_v62, %v3681_v16  ;;  %v5313_v16 = vld [vmem:[#allocation18_spill] sm:$0xff] }
 0x2d1   :  { %v1555_v17 = vmul.f32 1.442695, %v1445_v10  ;;  %v1557_v15 = vmul.f32 1.442695, %v1446_v14  ;;  %3690 = vpow2.f32 %v1551_v57 }
 0x2d2   :  { %1855 = vmatprep.mubr.bf16.mxu0 %v1610_v19 }
 0x2d3   :  { %3692 = vpow2.f32 %v1555_v17  ;;  %v3683_v20 = vpop.eup %3682 }
 0x2d4   :  { %3694 = vpow2.f32 %v1557_v15  ;;  %1856 = vmatmul.mubr.bf16.gmra.mrb[68].mxu0 %v1609_v4  ;;  %v1377_v51 = vpop.xlane.xlu0 %1376 }
 0x2d5   :  { %v3685_v37 = vpop.eup %3684  ;;  %3696 = vpow2.f32 %v1553_v60  ;;  %v1447_v49 = vsub.f32 %v4458_v30, %v1377_v51  ;;  %v1448_v23 = vsub.f32 %v5303_v40, %v1377_v51 }
 0x2d6   :  { %v3687_v9 = vpop.eup %3686  ;;  %v1380_v24 = vpop.xlane.xlu1 %1379  ;;  %v1611_v18 = vpack.c.bf16 %v3685_v37, %v3683_v20  ;;  %v5314_v20 = vld [vmem:[#allocation19_spill] sm:$0xff]  ;;  %v5315_v37 = vld [vmem:[#allocation20_spill] sm:$0xff] }
 0x2d7   :  { %v3689_v34 = vpop.eup %3688  ;;  %v1559_v22 = vmul.f32 1.442695, %v1447_v49  ;;  %v1449_v1 = vsub.f32 %v5304_v0, %v1380_v24  ;;  %v1450_v25 = vsub.f32 %v5305_v41, %v1380_v24  ;;  %v1561_v42 = vmul.f32 1.442695, %v1448_v23 }
 0x2d8   :  { %v1612_v28 = vpack.c.bf16 %v3687_v9, %v3689_v34 }
 0x2d9   :  { %v1563_v3 = vmul.f32 1.442695, %v1449_v1  ;;  %v1565_v31 = vmul.f32 1.442695, %v1450_v25  ;;  %3698 = vpow2.f32 %v1559_v22 }
 0x2da   :  { %1863 = vmatprep.mubr.bf16.mxu0 %v1612_v28 }
 0x2db   :  { %3700 = vpow2.f32 %v1563_v3  ;;  %v3691_v21 = vpop.eup %3690 }
 0x2dc   :  { %3702 = vpow2.f32 %v1565_v31  ;;  %1864 = vmatmul.mubr.bf16.gmra.mrb[72].mxu0 %v1611_v18  ;;  %v1383_v30 = vpop.xlane.xlu0 %1382 }
 0x2dd   :  { %v3693_v36 = vpop.eup %3692  ;;  %3704 = vpow2.f32 %v1561_v42  ;;  %v1451_v26 = vsub.f32 %v5306_v5, %v1383_v30  ;;  %v1452_v46 = vsub.f32 %v5307_v44, %v1383_v30 }
 0x2de   :  { %v3695_v29 = vpop.eup %3694  ;;  %v1386_v7 = vpop.xlane.xlu1 %1385  ;;  %v1613_v54 = vpack.c.bf16 %v3693_v36, %v3691_v21 }
 0x2df   :  { %v3697_v6 = vpop.eup %3696  ;;  %v1567_v8 = vmul.f32 1.442695, %v1451_v26  ;;  %v1453_v45 = vsub.f32 %v5308_v43, %v1386_v7  ;;  %v1454_v61 = vsub.f32 %v5309_v11, %v1386_v7  ;;  %v1569_v27 = vmul.f32 1.442695, %v1452_v46 }
 0x2e0   :  { %v1614_v48 = vpack.c.bf16 %v3695_v29, %v3697_v6 }
 0x2e1   :  { %v1571_v50 = vmul.f32 1.442695, %v1453_v45  ;;  %v1573_v13 = vmul.f32 1.442695, %v1454_v61  ;;  %3706 = vpow2.f32 %v1567_v8 }
 0x2e2   :  { %1871 = vmatprep.mubr.bf16.mxu0 %v1614_v48 }
 0x2e3   :  { %3708 = vpow2.f32 %v1571_v50  ;;  %v3699_v32 = vpop.eup %3698 }
 0x2e4   :  { %3710 = vpow2.f32 %v1573_v13  ;;  %1872 = vmatmul.mubr.bf16.gmra.mrb[76].mxu0 %v1613_v54  ;;  %v1389_v12 = vpop.xlane.xlu0 %1388 }
 0x2e5   :  { %v3701_v33 = vpop.eup %3700  ;;  %3712 = vpow2.f32 %v1569_v27  ;;  %v1455_v2 = vsub.f32 %v5310_v63, %v1389_v12  ;;  %v1456_v52 = vsub.f32 %v5311_v35, %v1389_v12 }
 0x2e6   :  { %v3703_v53 = vpop.eup %3702  ;;  %v1392_v58 = vpop.xlane.xlu1 %1391  ;;  %v1615_v59 = vpack.c.bf16 %v3701_v33, %v3699_v32 }
 0x2e7   :  { %v3705_v56 = vpop.eup %3704  ;;  %v1575_v38 = vmul.f32 1.442695, %v1455_v2  ;;  %v1577_v62 = vmul.f32 1.442695, %v1456_v52  ;;  %v1457_v4 = vsub.f32 %v5312_v55, %v1392_v58  ;;  %v1458_v57 = vsub.f32 %v5313_v16, %v1392_v58 }
 0x2e8   :  { %v1616_v10 = vpack.c.bf16 %v3703_v53, %v3705_v56 }
 0x2e9   :  { %3714 = vpow2.f32 %v1575_v38  ;;  %v1579_v14 = vmul.f32 1.442695, %v1457_v4  ;;  %v1581_v19 = vmul.f32 1.442695, %v1458_v57 }
 0x2ea   :  { %3716 = vpow2.f32 %v1577_v62  ;;  %1879 = vmatprep.mubr.bf16.mxu0 %v1616_v10 }
 0x2eb   :  { %3718 = vpow2.f32 %v1579_v14  ;;  %v3707_v60 = vpop.eup %3706 }
 0x2ec   :  { %3720 = vpow2.f32 %v1581_v19  ;;  %1880 = vmatmul.mubr.bf16.gmra.mrb[80].mxu0 %v1615_v59  ;;  %v1395_v17 = vpop.xlane.xlu0 %1394 }
 0x2ed   :  { %v3709_v15 = vpop.eup %3708  ;;  %v1459_v51 = vsub.f32 %v5314_v20, %v1395_v17  ;;  %v1460_v49 = vsub.f32 %v5315_v37, %v1395_v17 }
 0x2ee   :  { %v3711_v40 = vpop.eup %3710  ;;  %v1398_v23 = vpop.xlane.xlu1 %1397  ;;  %v1617_v9 = vpack.c.bf16 %v3709_v15, %v3707_v60 }
 0x2ef   :  { %v3713_v24 = vpop.eup %3712  ;;  %v1583_v18 = vmul.f32 1.442695, %v1459_v51  ;;  %v1585_v34 = vmul.f32 1.442695, %v1460_v49  ;;  %v1461_v22 = vsub.f32 %v4512_v47, %v1398_v23  ;;  %v1462_v0 = vsub.f32 %v4516_v39, %v1398_v23 }
 0x2f0   :  { %v1618_v1 = vpack.c.bf16 %v3711_v40, %v3713_v24 }
 0x2f1   :  { %3722 = vpow2.f32 %v1583_v18  ;;  %v1587_v41 = vmul.f32 1.442695, %v1461_v22  ;;  %v1589_v25 = vmul.f32 1.442695, %v1462_v0 }
 0x2f2   :  { %3724 = vpow2.f32 %v1585_v34  ;;  %1887 = vmatprep.mubr.bf16.mxu0 %v1618_v1 }
 0x2f3   :  { %v3715_v28 = vpop.eup %3714  ;;  %3726 = vpow2.f32 %v1587_v41 }
 0x2f4   :  { %v3717_v42 = vpop.eup %3716  ;;  %3728 = vpow2.f32 %v1589_v25  ;;  %1888 = vmatmul.mubr.bf16.gmra.mrb[84].mxu0 %v1617_v9 }
 0x2f5   :  { %v3719_v3 = vpop.eup %3718 }
 0x2f6   :  { %v3721_v31 = vpop.eup %3720  ;;  %v1619_v21 = vpack.c.bf16 %v3719_v3, %v3715_v28 }
 0x2f7   :  { %v1620_v30 = vpack.c.bf16 %v3721_v31, %v3717_v42 }
 0x2f9   :  { %1895 = vmatprep.mubr.bf16.mxu0 %v1620_v30 }
 0x2fb   :  { %v3723_v36 = vpop.eup %3722 }
 0x2fc   :  { %v3725_v47 = vpop.eup %3724  ;;  %1896 = vmatmul.mubr.bf16.gmra.mrb[88].mxu0 %v1619_v21 }
 0x2fd   :  { %v3727_v39 = vpop.eup %3726 }
 0x2fe   :  { %v3729_v5 = vpop.eup %3728  ;;  %v1621_v26 = vpack.c.bf16 %v3727_v39, %v3723_v36 }
 0x2ff   :  { %v1622_v44 = vpack.c.bf16 %v3729_v5, %v3725_v47 }
 0x301   :  { %1903 = vmatprep.mubr.bf16.mxu0 %v1622_v44 }
 0x304   :  { %1904 = vmatmul.mubr.bf16.gmra.mrb[92].mxu0 %v1621_v26 }
 0x35f   :  { %v3379_v46 = vpop.f32.mrb[32].mxu0 }
 0x360   :  { %v3380_v29 = vpop.f32.mrb[33].mxu0 }
 0x361   :  { %v4586_v7 = vadd.f32 %v3380_v29, %v3379_v46  ;;  %v3382_v54 = vpop.f32.mrb[34].mxu0 }
 0x362   :  { %v3383_v6 = vpop.f32.mrb[35].mxu0 }
 0x363   :  { %3730 = vrcp.f32 %v4586_v7  ;;  %v4589_v8 = vadd.f32 %v3383_v6, %v3382_v54 }
 0x365   :  { %3732 = vrcp.f32 %v4589_v8 }
 0x367   :  { %v3385_v43 = vpop.f32.mrb[36].mxu0 }
 0x368   :  { %v3386_v45 = vpop.f32.mrb[37].mxu0 }
 0x369   :  { %v4592_v11 = vadd.f32 %v3386_v45, %v3385_v43  ;;  %v3388_v61 = vpop.f32.mrb[38].mxu0 }
 0x36a   :  { %v3389_v48 = vpop.f32.mrb[39].mxu0 }
 0x36b   :  { %3734 = vrcp.f32 %v4592_v11  ;;  %v4595_v27 = vadd.f32 %v3389_v48, %v3388_v61 }
 0x36d   :  { %v3731_v50 = vpop.eup %3730  ;;  %3736 = vrcp.f32 %v4595_v27 }
 0x36e   :  { %1976 = vrot.lane.b32.xlu0 %v3731_v50, %s3907_s4  ;;  %2104 = vrot.lane.b32.xlu1 %v3731_v50, %s3908_s16 }
 0x36f   :  { %v3391_v13 = vpop.f32.mrb[40].mxu0  ;;  %v3733_v12 = vpop.eup %3732 }
 0x370   :  { %v3392_v32 = vpop.f32.mrb[41].mxu0 }
 0x371   :  { %v4600_v33 = vadd.f32 %v3392_v32, %v3391_v13  ;;  %v3394_v63 = vpop.f32.mrb[42].mxu0 }
 0x372   :  { %v3395_v2 = vpop.f32.mrb[43].mxu0  ;;  %2106 = vrot.lane.b32.xlu0 %v3733_v12, %s3908_s16  ;;  %1978 = vrot.lane.b32.xlu1 %v3733_v12, %s3907_s4 }
 0x373   :  { %3738 = vrcp.f32 %v4600_v33  ;;  %v4605_v35 = vadd.f32 %v3395_v2, %v3394_v63 }
 0x375   :  { %v3735_v52 = vpop.eup %3734  ;;  %3740 = vrcp.f32 %v4605_v35 }
 0x376   :  { %2108 = vrot.lane.b32.xlu0 %v3735_v52, %s3908_s16  ;;  %1980 = vrot.lane.b32.xlu1 %v3735_v52, %s3907_s4 }
 0x377   :  { %v3397_v53 = vpop.f32.mrb[44].mxu0  ;;  %v3737_v59 = vpop.eup %3736 }
 0x378   :  { %v3398_v58 = vpop.f32.mrb[45].mxu0 }
 0x379   :  { %v4610_v56 = vadd.f32 %v3398_v58, %v3397_v53  ;;  %v3400_v38 = vpop.f32.mrb[46].mxu0 }
 0x37a   :  { %v3401_v62 = vpop.f32.mrb[47].mxu0  ;;  %1982 = vrot.lane.b32.xlu1 %v3737_v59, %s3907_s4 }
 0x37b   :  { %3742 = vrcp.f32 %v4610_v56  ;;  %v4614_v55 = vadd.f32 %v3401_v62, %v3400_v38 }
 0x37d   :  { %v3739_v4 = vpop.eup %3738  ;;  %3744 = vrcp.f32 %v4614_v55 }
 0x37e   :  { %1984 = vrot.lane.b32.xlu0 %v3739_v4, %s3907_s4  ;;  %2110 = vrot.lane.b32.xlu1 %v3737_v59, %s3908_s16 }
 0x37f   :  { %v3403_v16 = vpop.f32.mrb[48].mxu0  ;;  %v3741_v10 = vpop.eup %3740 }
 0x380   :  { %v3404_v57 = vpop.f32.mrb[49].mxu0 }
 0x381   :  { %v4618_v14 = vadd.f32 %v3404_v57, %v3403_v16  ;;  %v3406_v19 = vpop.f32.mrb[50].mxu0 }
 0x382   :  { %v3407_v60 = vpop.f32.mrb[51].mxu0  ;;  %2112 = vrot.lane.b32.xlu0 %v3739_v4, %s3908_s16  ;;  %1986 = vrot.lane.b32.xlu1 %v3741_v10, %s3907_s4 }
 0x383   :  { %3746 = vrcp.f32 %v4618_v14  ;;  %v4624_v17 = vadd.f32 %v3407_v60, %v3406_v19 }
 0x385   :  { %v3743_v15 = vpop.eup %3742 }
 0x386   :  { %1988 = vrot.lane.b32.xlu0 %v3743_v15, %s3907_s4  ;;  %2114 = vrot.lane.b32.xlu1 %v3741_v10, %s3908_s16 }
 0x387   :  { %v3409_v20 = vpop.f32.mrb[52].mxu0  ;;  %v3745_v9 = vpop.eup %3744 }
 0x388   :  { %v3410_v51 = vpop.f32.mrb[53].mxu0 }
 0x389   :  { %v4628_v37 = vadd.f32 %v3410_v51, %v3409_v20  ;;  %v3412_v49 = vpop.f32.mrb[54].mxu0 }
 0x38a   :  { %v3413_v40 = vpop.f32.mrb[55].mxu0  ;;  %2116 = vrot.lane.b32.xlu1 %v3743_v15, %s3908_s16 }
 0x38b   :  { %3748 = vrcp.f32 %v4628_v37  ;;  %v4632_v23 = vadd.f32 %v3413_v40, %v3412_v49 }
 0x38c   :  { %3750 = vrcp.f32 %v4624_v17 }
 0x38d   :  { %v3747_v24 = vpop.eup %3746 }
 0x38e   :  { %1992 = vrot.lane.b32.xlu0 %v3747_v24, %s3907_s4  ;;  %1990 = vrot.lane.b32.xlu1 %v3745_v9, %s3907_s4 }
 0x38f   :  { %v3415_v18 = vpop.f32.mrb[56].mxu0 }
 0x390   :  { %v3416_v34 = vpop.f32.mrb[57].mxu0 }
 0x391   :  { %v4637_v22 = vadd.f32 %v3416_v34, %v3415_v18  ;;  %v3418_v0 = vpop.f32.mrb[58].mxu0 }
 0x392   :  { %v3419_v1 = vpop.f32.mrb[59].mxu0  ;;  %2118 = vrot.lane.b32.xlu1 %v3745_v9, %s3908_s16 }
 0x393   :  { %3752 = vrcp.f32 %v4637_v22  ;;  %v4641_v41 = vadd.f32 %v3419_v1, %v3418_v0 }
 0x394   :  { %3754 = vrcp.f32 %v4632_v23 }
 0x395   :  { %v3749_v25 = vpop.eup %3748 }
 0x396   :  { %1996 = vrot.lane.b32.xlu0 %v3749_v25, %s3907_s4  ;;  %2120 = vrot.lane.b32.xlu1 %v3747_v24, %s3908_s16  ;;  %v3751_v3 = vpop.eup %3750 }
 0x397   :  { %v3421_v28 = vpop.f32.mrb[60].mxu0 }
 0x398   :  { %v3422_v42 = vpop.f32.mrb[61].mxu0 }
 0x399   :  { %v4645_v31 = vadd.f32 %v3422_v42, %v3421_v28  ;;  %v3424_v21 = vpop.f32.mrb[62].mxu0 }
 0x39a   :  { %v3425_v30 = vpop.f32.mrb[63].mxu0  ;;  %1994 = vrot.lane.b32.xlu1 %v3751_v3, %s3907_s4 }
 0x39b   :  { %3756 = vrcp.f32 %v4645_v31  ;;  %v4650_v36 = vadd.f32 %v3425_v30, %v3424_v21 }
 0x39d   :  { %v3753_v47 = vpop.eup %3752 }
 0x39e   :  { %2000 = vrot.lane.b32.xlu0 %v3753_v47, %s3907_s4  ;;  %2122 = vrot.lane.b32.xlu1 %v3751_v3, %s3908_s16  ;;  %v3755_v54 = vpop.eup %3754 }
 0x39f   :  { %v3427_v39 = vpop.f32.mrb[64].mxu0 }
 0x3a0   :  { %v3428_v5 = vpop.f32.mrb[65].mxu0 }
 0x3a1   :  { %v4654_v26 = vadd.f32 %v3428_v5, %v3427_v39  ;;  %v3430_v44 = vpop.f32.mrb[66].mxu0 }
 0x3a2   :  { %v3431_v46 = vpop.f32.mrb[67].mxu0  ;;  %2124 = vrot.lane.b32.xlu1 %v3749_v25, %s3908_s16 }
 0x3a3   :  { %3758 = vrcp.f32 %v4654_v26  ;;  %v4658_v29 = vadd.f32 %v3431_v46, %v3430_v44 }
 0x3a4   :  { %3760 = vrcp.f32 %v4641_v41 }
 0x3a5   :  { %v3757_v6 = vpop.eup %3756 }
 0x3a6   :  { %2004 = vrot.lane.b32.xlu0 %v3757_v6, %s3907_s4  ;;  %1998 = vrot.lane.b32.xlu1 %v3755_v54, %s3907_s4 }
 0x3a7   :  { %v3433_v43 = vpop.f32.mrb[68].mxu0 }
 0x3a8   :  { %v3434_v45 = vpop.f32.mrb[69].mxu0 }
 0x3a9   :  { %v4663_v61 = vadd.f32 %v3434_v45, %v3433_v43  ;;  %v3436_v48 = vpop.f32.mrb[70].mxu0 }
 0x3aa   :  { %v3437_v50 = vpop.f32.mrb[71].mxu0  ;;  %2126 = vrot.lane.b32.xlu1 %v3755_v54, %s3908_s16 }
 0x3ab   :  { %3762 = vrcp.f32 %v4663_v61  ;;  %v4667_v13 = vadd.f32 %v3437_v50, %v3436_v48 }
 0x3ac   :  { %3764 = vrcp.f32 %v4650_v36 }
 0x3ad   :  { %v3759_v32 = vpop.eup %3758 }
 0x3ae   :  { %2008 = vrot.lane.b32.xlu0 %v3759_v32, %s3907_s4  ;;  %2128 = vrot.lane.b32.xlu1 %v3753_v47, %s3908_s16  ;;  %v3761_v2 = vpop.eup %3760 }
 0x3af   :  { %v3439_v12 = vpop.f32.mrb[72].mxu0 }
 0x3b0   :  { %v3440_v63 = vpop.f32.mrb[73].mxu0 }
 0x3b1   :  { %v4671_v52 = vadd.f32 %v3440_v63, %v3439_v12  ;;  %v3442_v53 = vpop.f32.mrb[74].mxu0 }
 0x3b2   :  { %v3443_v58 = vpop.f32.mrb[75].mxu0  ;;  %2002 = vrot.lane.b32.xlu1 %v3761_v2, %s3907_s4 }
 0x3b3   :  { %3766 = vrcp.f32 %v4671_v52  ;;  %v4676_v59 = vadd.f32 %v3443_v58, %v3442_v53  ;;  %v3222_v58 = vld [vmem:[%s5266_s5] sm:$0xff]  }
 0x3b5   :  { %v4678_v38 = vpop.eup %3762 }
 0x3b6   :  { %2012 = vrot.lane.b32.xlu0 %v4678_v38, %s3907_s4  ;;  %2130 = vrot.lane.b32.xlu1 %v3761_v2, %s3908_s16  ;;  %v3765_v60 = vpop.eup %3764 }
 0x3b7   :  { %v3445_v62 = vpop.f32.mrb[76].mxu0 }
 0x3b8   :  { %v3446_v4 = vpop.f32.mrb[77].mxu0 }
 0x3b9   :  { %v4683_v16 = vadd.f32 %v3446_v4, %v3445_v62  ;;  %v3448_v57 = vpop.f32.mrb[78].mxu0  ;;  %v3223_v4 = vunpack.c.l.bf16 %v3222_v58 }
 0x3ba   :  { %v3449_v10 = vpop.f32.mrb[79].mxu0  ;;  %2132 = vrot.lane.b32.xlu1 %v3757_v6, %s3908_s16 }
 0x3bb   :  { %3768 = vrcp.f32 %v4683_v16  ;;  %v4687_v19 = vadd.f32 %v3449_v10, %v3448_v57 }
 0x3bc   :  { %3770 = vrcp.f32 %v4658_v29 }
 0x3bd   :  { %v4689_v15 = vpop.eup %3766 }
 0x3be   :  { %2016 = vrot.lane.b32.xlu0 %v4689_v15, %s3907_s4  ;;  %2006 = vrot.lane.b32.xlu1 %v3765_v60, %s3907_s4 }
 0x3bf   :  { %v3451_v20 = vpop.f32.mrb[80].mxu0 }
 0x3c0   :  { %v3452_v51 = vpop.f32.mrb[81].mxu0 }
 0x3c1   :  { %v4695_v49 = vadd.f32 %v3452_v51, %v3451_v20  ;;  %v3454_v40 = vpop.f32.mrb[82].mxu0 }
 0x3c2   :  { %v3455_v9 = vpop.f32.mrb[83].mxu0  ;;  %2134 = vrot.lane.b32.xlu1 %v3765_v60, %s3908_s16 }
 0x3c3   :  { %3772 = vrcp.f32 %v4695_v49  ;;  %v4699_v24 = vadd.f32 %v3455_v9, %v3454_v40  ;;  %v3224_v9 = vunpack.c.h.bf16 %v3222_v58 }
 0x3c4   :  { %3774 = vrcp.f32 %v4667_v13 }
 0x3c5   :  { %v4701_v18 = vpop.eup %3768  ;;  %3776 = vrcp.f32 %v4676_v59 }
 0x3c6   :  { %2020 = vrot.lane.b32.xlu0 %v4701_v18, %s3907_s4  ;;  %2136 = vrot.lane.b32.xlu1 %v3759_v32, %s3908_s16  ;;  %v3771_v1 = vpop.eup %3770 }
 0x3c7   :  { %v3457_v34 = vpop.f32.mrb[84].mxu0 }
 0x3c8   :  { %v3458_v0 = vpop.f32.mrb[85].mxu0 }
 0x3c9   :  { %v4707_v25 = vadd.f32 %v3458_v0, %v3457_v34  ;;  %v3460_v28 = vpop.f32.mrb[86].mxu0 }
 0x3ca   :  { %v3461_v42 = vpop.f32.mrb[87].mxu0  ;;  %2010 = vrot.lane.b32.xlu1 %v3771_v1, %s3907_s4 }
 0x3cb   :  { %3778 = vrcp.f32 %v4707_v25  ;;  %v4712_v3 = vadd.f32 %v3461_v42, %v3460_v28  ;;  %v3300_v42 = vld [vmem:[%s5266_s5 + $0x8] sm:$0xff]  }
 0x3cc   :  { %3780 = vrcp.f32 %v4687_v19 }
 0x3cd   :  { %v4714_v21 = vpop.eup %3772  ;;  %3782 = vrcp.f32 %v4699_v24 }
 0x3ce   :  { %2024 = vrot.lane.b32.xlu0 %v4714_v21, %s3907_s4  ;;  %2138 = vrot.lane.b32.xlu1 %v3771_v1, %s3908_s16  ;;  %v4720_v39 = vpop.eup %3774 }
 0x3cf   :  { %v3463_v30 = vpop.f32.mrb[88].mxu0  ;;  %v4730_v6 = vpop.eup %3776 }
 0x3d0   :  { %v3464_v47 = vpop.f32.mrb[89].mxu0 }
 0x3d1   :  { %v4722_v5 = vadd.f32 %v3464_v47, %v3463_v30  ;;  %v3466_v44 = vpop.f32.mrb[90].mxu0 }
 0x3d2   :  { %v3467_v46 = vpop.f32.mrb[91].mxu0  ;;  %2014 = vrot.lane.b32.xlu1 %v4720_v39, %s3907_s4 }
 0x3d3   :  { %3784 = vrcp.f32 %v4722_v5  ;;  %v4728_v54 = vadd.f32 %v3467_v46, %v3466_v44 }
 0x3d4   :  { %3786 = vrcp.f32 %v4712_v3 }
 0x3d5   :  { %v4732_v43 = vpop.eup %3778  ;;  %3788 = vrcp.f32 %v4728_v54 }
 0x3d6   :  { %2028 = vrot.lane.b32.xlu0 %v4732_v43, %s3907_s4  ;;  %2018 = vrot.lane.b32.xlu1 %v4730_v6, %s3907_s4  ;;  %v4739_v50 = vpop.eup %3780 }
 0x3d7   :  { %v3469_v45 = vpop.f32.mrb[92].mxu0  ;;  %v4749_v53 = vpop.eup %3782 }
 0x3d8   :  { %v3470_v48 = vpop.f32.mrb[93].mxu0 }
 0x3d9   :  { %v4741_v32 = vadd.f32 %v3470_v48, %v3469_v45  ;;  %v3472_v12 = vpop.f32.mrb[94].mxu0  ;;  %v3227_v45 = vunpack.c.l.bf16 %v3300_v42 }
 0x3da   :  { %2022 = vrot.lane.b32.xlu1 %v4739_v50, %s3907_s4  ;;  %v3473_v63 = vpop.f32.mrb[95].mxu0 }
 0x3db   :  { %3790 = vrcp.f32 %v4741_v32  ;;  %v4747_v2 = vadd.f32 %v3473_v63, %v3472_v12 }
 0x3dd   :  { %v4754_v62 = vpop.eup %3784  ;;  %3792 = vrcp.f32 %v4747_v2 }
 0x3de   :  { %2032 = vrot.lane.b32.xlu0 %v4754_v62, %s3907_s4  ;;  %2026 = vrot.lane.b32.xlu1 %v4749_v53, %s3907_s4  ;;  %v4760_v60 = vpop.eup %3786 }
 0x3df   :  { %v4769_v34 = vpop.eup %3788 }
 0x3e0   :  { %v1977_v57 = vpop.permute.xlu0 %1976  ;;  %v2105_v10 = vpop.permute.xlu1 %2104 }
 0x3e1   :  { %v2072_v20 = vmul.f32 %v4586_v7, %v1977_v57  ;;  %v2200_v51 = vmul.f32 %v4586_v7, %v2105_v10 }
 0x3e2   :  { %2030 = vrot.lane.b32.xlu1 %v4760_v60, %s3907_s4 }
 0x3e3   :  { %v4767_v40 = vsub.f32 %v2200_v51, %v3223_v4  ;;  %v2296_v0 = vsub.f32 %v2072_v20, %v3223_v4  ;;  %v3228_v20 = vunpack.c.h.bf16 %v3300_v42 }
 0x3e4   :  { %v2107_v1 = vpop.permute.xlu0 %2106  ;;  %v1979_v28 = vpop.permute.xlu1 %1978 }
 0x3e5   :  { %v4774_v30 = vpop.eup %3790  ;;  %v2201_v7 = vmul.f32 %v4589_v8, %v2107_v1  ;;  %v2073_v47 = vmul.f32 %v4589_v8, %v1979_v28  ;;  %v2392_v48 = vmul.f32 %v2296_v0, %v2296_v0 }
 0x3e6   :  { %2034 = vrot.lane.b32.xlu1 %v4769_v34, %s3907_s4  ;;  %2036 = vrot.lane.b32.xlu0 %v4774_v30, %s3907_s4 }
 0x3e7   :  { %v4782_v44 = vsub.f32 %v2201_v7, %v3224_v9  ;;  %v2297_v46 = vsub.f32 %v2073_v47, %v3224_v9  ;;  %v3301_v9 = vld [vmem:[%s5266_s5 + $0x10] sm:$0xff]   ;;  %v4793_v0 = vpop.eup %3792 }
 0x3e8   :  { %v2109_v12 = vpop.permute.xlu0 %2108  ;;  %v1981_v63 = vpop.permute.xlu1 %1980  ;;  %v3231_v7 = vunpack.c.l.bf16 %v3301_v9 }
 0x3e9   :  { %v2393_v58 = vmul.f32 %v2297_v46, %v2297_v46  ;;  %v2202_v4 = vmul.f32 %v4592_v11, %v2109_v12  ;;  %v2074_v57 = vmul.f32 %v4592_v11, %v1981_v63 }
 0x3ea   :  { %2456 = vrot.lane.b32.xlu1 %v2392_v48, %s3907_s4 }
 0x3eb   :  { %v4787_v8 = vsub.f32 %v2202_v4, %v3227_v45  ;;  %v2298_v10 = vsub.f32 %v2074_v57, %v3227_v45  ;;  %2458 = vrot.lane.b32.xlu0 %v2393_v58, %s3907_s4  ;;  %v3232_v58 = vunpack.c.h.bf16 %v3301_v9 }
 0x3ec   :  { %v1983_v51 = vpop.permute.xlu1 %1982 }
 0x3ed   :  { %v2394_v1 = vmul.f32 %v2298_v10, %v2298_v10  ;;  %v2075_v28 = vmul.f32 %v4595_v27, %v1983_v51  ;;  %v3302_v10 = vld [vmem:[%s5266_s5 + $0x18] sm:$0xff]  }
 0x3ee   :  { %2038 = vrot.lane.b32.xlu1 %v4793_v0, %s3907_s4  ;;  %v3235_v9 = vunpack.c.l.bf16 %v3302_v10 }
 0x3ef   :  { %v2299_v11 = vsub.f32 %v2075_v28, %v3228_v20  ;;  %2460 = vrot.lane.b32.xlu0 %v2394_v1, %s3907_s4 }
 0x3f0   :  { %v1985_v47 = vpop.permute.xlu0 %1984  ;;  %v2111_v46 = vpop.permute.xlu1 %2110 }
 0x3f1   :  { %v2395_v42 = vmul.f32 %v2299_v11, %v2299_v11  ;;  %v2076_v45 = vmul.f32 %v4600_v33, %v1985_v47  ;;  %v2203_v48 = vmul.f32 %v4595_v27, %v2111_v46 }
 0x3f2   :  { %2140 = vrot.lane.b32.xlu1 %v4678_v38, %s3908_s16 }
 0x3f3   :  { %v2300_v12 = vsub.f32 %v2076_v45, %v3231_v7  ;;  %v4803_v63 = vsub.f32 %v2203_v48, %v3228_v20  ;;  %2462 = vrot.lane.b32.xlu0 %v2395_v42, %s3907_s4 }
 0x3f4   :  { %v2113_v4 = vpop.permute.xlu0 %2112  ;;  %v1987_v57 = vpop.permute.xlu1 %1986 }
 0x3f5   :  { %v2396_v51 = vmul.f32 %v2300_v12, %v2300_v12  ;;  %v2204_v1 = vmul.f32 %v4600_v33, %v2113_v4  ;;  %v2077_v27 = vmul.f32 %v4605_v35, %v1987_v57  ;;  %v3303_v12 = vld [vmem:[%s5266_s5 + $0x20] sm:$0xff]  }
 0x3f6   :  { %2142 = vrot.lane.b32.xlu1 %v4720_v39, %s3908_s16  ;;  %v3239_v57 = vunpack.c.l.bf16 %v3303_v12 }
 0x3f7   :  { %v4813_v38 = vsub.f32 %v2204_v1, %v3231_v7  ;;  %v2301_v20 = vsub.f32 %v2077_v27, %v3232_v58  ;;  %2464 = vrot.lane.b32.xlu0 %v2396_v51, %s3907_s4 }
 0x3f8   :  { %v1989_v28 = vpop.permute.xlu0 %1988  ;;  %v2115_v11 = vpop.permute.xlu1 %2114 }
 0x3f9   :  { %v2397_v47 = vmul.f32 %v2301_v20, %v2301_v20  ;;  %v2078_v46 = vmul.f32 %v4610_v56, %v1989_v28  ;;  %v2205_v42 = vmul.f32 %v4605_v35, %v2115_v11 }
 0x3fa   :  { %2144 = vrot.lane.b32.xlu1 %v4689_v15, %s3908_s16  ;;  %v3236_v15 = vunpack.c.h.bf16 %v3302_v10 }
 0x3fb   :  { %v2302_v33 = vsub.f32 %v2078_v46, %v3235_v9  ;;  %v4820_v45 = vsub.f32 %v2205_v42, %v3232_v58  ;;  %2466 = vrot.lane.b32.xlu0 %v2397_v47, %s3907_s4 }
 0x3fc   :  { %v2117_v39 = vpop.permute.xlu1 %2116 }
 0x3fd   :  { %v2398_v7 = vmul.f32 %v2302_v33, %v2302_v33  ;;  %v2206_v48 = vmul.f32 %v4610_v56, %v2117_v39 }
 0x3fe   :  { %2146 = vrot.lane.b32.xlu1 %v4730_v6, %s3908_s16 }
 0x3ff   :  { %v4829_v35 = vsub.f32 %v2206_v48, %v3235_v9  ;;  %2468 = vrot.lane.b32.xlu0 %v2398_v7, %s3907_s4 }
 0x400   :  { %v1993_v58 = vpop.permute.xlu0 %1992  ;;  %v1991_v4 = vpop.permute.xlu1 %1990 }
 0x401   :  { %v2080_v51 = vmul.f32 %v4618_v14, %v1993_v58  ;;  %v2079_v1 = vmul.f32 %v4614_v55, %v1991_v4 }
 0x402   :  { %2148 = vrot.lane.b32.xlu1 %v4701_v18, %s3908_s16  ;;  %v3304_v18 = vld [vmem:[%s5266_s5 + $0x28] sm:$0xff]  }
 0x403   :  { %v2303_v56 = vsub.f32 %v2079_v1, %v3236_v15  ;;  %v2304_v27 = vsub.f32 %v2080_v51, %v3239_v57  ;;  %v3243_v33 = vunpack.c.l.bf16 %v3304_v18 }
 0x404   :  { %v2119_v6 = vpop.permute.xlu1 %2118 }
 0x405   :  { %v2399_v20 = vmul.f32 %v2303_v56, %v2303_v56  ;;  %v2207_v9 = vmul.f32 %v4614_v55, %v2119_v6  ;;  %v2400_v11 = vmul.f32 %v2304_v27, %v2304_v27 }
 0x406   :  { %2150 = vrot.lane.b32.xlu1 %v4739_v50, %s3908_s16  ;;  %v3240_v50 = vunpack.c.h.bf16 %v3303_v12 }
 0x407   :  { %v4839_v10 = vsub.f32 %v2207_v9, %v3236_v15  ;;  %2470 = vrot.lane.b32.xlu0 %v2399_v20, %s3907_s4 }
 0x408   :  { %v2121_v28 = vpop.permute.xlu1 %2120  ;;  %v1997_v46 = vpop.permute.xlu0 %1996 }
 0x409   :  { %v2208_v47 = vmul.f32 %v4618_v14, %v2121_v28  ;;  %v2082_v39 = vmul.f32 %v4628_v37, %v1997_v46 }
 0x40a   :  { %2152 = vrot.lane.b32.xlu1 %v4714_v21, %s3908_s16 }
 0x40b   :  { %v4848_v55 = vsub.f32 %v2208_v47, %v3239_v57  ;;  %2472 = vrot.lane.b32.xlu0 %v2400_v11, %s3907_s4  ;;  %v2306_v15 = vsub.f32 %v2082_v39, %v3243_v33 }
 0x40c   :  { %v1995_v42 = vpop.permute.xlu1 %1994 }
 0x40d   :  { %v2081_v7 = vmul.f32 %v4624_v17, %v1995_v42  ;;  %v2402_v57 = vmul.f32 %v2306_v15, %v2306_v15 }
 0x40e   :  { %2154 = vrot.lane.b32.xlu1 %v4749_v53, %s3908_s16  ;;  %v3305_v53 = vld [vmem:[%s5266_s5 + $0x30] sm:$0xff]  }
 0x40f   :  { %v2305_v14 = vsub.f32 %v2081_v7, %v3240_v50  ;;  %v3247_v6 = vunpack.c.l.bf16 %v3305_v53 }
 0x410   :  { %v2123_v48 = vpop.permute.xlu1 %2122  ;;  %v2001_v1 = vpop.permute.xlu0 %2000 }
 0x411   :  { %v2401_v58 = vmul.f32 %v2305_v14, %v2305_v14  ;;  %v2209_v21 = vmul.f32 %v4624_v17, %v2123_v48  ;;  %v2084_v27 = vmul.f32 %v4637_v22, %v2001_v1 }
 0x412   :  { %2156 = vrot.lane.b32.xlu1 %v4732_v43, %s3908_s16  ;;  %v3244_v43 = vunpack.c.h.bf16 %v3304_v18 }
 0x413   :  { %v4858_v4 = vsub.f32 %v2209_v21, %v3240_v50  ;;  %2474 = vrot.lane.b32.xlu0 %v2401_v58, %s3907_s4  ;;  %v2308_v28 = vsub.f32 %v2084_v27, %v3247_v6 }
 0x414   :  { %v2125_v12 = vpop.permute.xlu1 %2124 }
 0x415   :  { %v2210_v51 = vmul.f32 %v4628_v37, %v2125_v12  ;;  %v2404_v46 = vmul.f32 %v2308_v28, %v2308_v28 }
 0x416   :  { %2158 = vrot.lane.b32.xlu1 %v4760_v60, %s3908_s16 }
 0x417   :  { %v4867_v17 = vsub.f32 %v2210_v51, %v3243_v33  ;;  %2476 = vrot.lane.b32.xlu0 %v2402_v57, %s3907_s4 }
 0x418   :  { %v1999_v56 = vpop.permute.xlu1 %1998  ;;  %v2005_v42 = vpop.permute.xlu0 %2004 }
 0x419   :  { %v2083_v20 = vmul.f32 %v4632_v23, %v1999_v56  ;;  %v2086_v7 = vmul.f32 %v4645_v31, %v2005_v42 }
 0x41a   :  { %2160 = vrot.lane.b32.xlu1 %v4754_v62, %s3908_s16  ;;  %v3306_v62 = vld [vmem:[%s5266_s5 + $0x38] sm:$0xff]  }
 0x41b   :  { %v2307_v37 = vsub.f32 %v2083_v20, %v3244_v43  ;;  %v3251_v39 = vunpack.c.l.bf16 %v3306_v62 }
 0x41c   :  { %v2127_v9 = vpop.permute.xlu1 %2126 }
 0x41d   :  { %v2403_v11 = vmul.f32 %v2307_v37, %v2307_v37  ;;  %v2211_v60 = vmul.f32 %v4632_v23, %v2127_v9  ;;  %v2310_v15 = vsub.f32 %v2086_v7, %v3251_v39 }
 0x41e   :  { %2162 = vrot.lane.b32.xlu1 %v4769_v34, %s3908_s16  ;;  %v3248_v34 = vunpack.c.h.bf16 %v3305_v53  ;;  %v3307_v53 = vld [vmem:[%s5266_s5 + $0x40] sm:$0xff]  }
 0x41f   :  { %v4877_v47 = vsub.f32 %v2211_v60, %v3244_v43  ;;  %2478 = vrot.lane.b32.xlu0 %v2403_v11, %s3907_s4  ;;  %v2406_v57 = vmul.f32 %v2310_v15, %v2310_v15  ;;  %v3252_v43 = vunpack.c.h.bf16 %v3306_v62 }
 0x420   :  { %v2129_v18 = vpop.permute.xlu1 %2128  ;;  %v2009_v1 = vpop.permute.xlu0 %2008 }
 0x421   :  { %v2212_v50 = vmul.f32 %v4637_v22, %v2129_v18 }
 0x422   :  { %2164 = vrot.lane.b32.xlu1 %v4774_v30, %s3908_s16 }
 0x423   :  { %v4886_v23 = vsub.f32 %v2212_v50, %v3247_v6  ;;  %2480 = vrot.lane.b32.xlu0 %v2404_v46, %s3907_s4  ;;  %v2088_v6 = vmul.f32 %v4654_v26, %v2009_v1  ;;  %v4914_v50 = vld [vmem:[%s5266_s5 + $0x48] sm:$0xff]  }
 0x424   :  { %v2003_v33 = vpop.permute.xlu1 %2002 }
 0x425   :  { %v2085_v14 = vmul.f32 %v4641_v41, %v2003_v33  ;;  %v3259_v33 = vunpack.c.l.bf16 %v4914_v50 }
 0x426   :  { %2166 = vrot.lane.b32.xlu1 %v4793_v0, %s3908_s16 }
 0x427   :  { %v2309_v22 = vsub.f32 %v2085_v14, %v3248_v34 }
 0x428   :  { %v2131_v48 = vpop.permute.xlu1 %2130  ;;  %v2013_v62 = vpop.permute.xlu0 %2012 }
 0x429   :  { %v2405_v58 = vmul.f32 %v2309_v22, %v2309_v22  ;;  %v2213_v30 = vmul.f32 %v4641_v41, %v2131_v48  ;;  %v3255_v41 = vunpack.c.l.bf16 %v3307_v53 }
 0x42b   :  { %v4894_v21 = vsub.f32 %v2213_v30, %v3248_v34  ;;  %2482 = vrot.lane.b32.xlu0 %v2405_v58, %s3907_s4  ;;  %v2312_v9 = vsub.f32 %v2088_v6, %v3255_v41  ;;  %v3256_v34 = vunpack.c.h.bf16 %v3307_v53  ;;  %v4928_v58 = vld [vmem:[%s5266_s5 + $0x50] sm:$0xff]  }
 0x42c   :  { %v2133_v12 = vpop.permute.xlu1 %2132  ;;  %v3263_v1 = vunpack.c.l.bf16 %v4928_v58 }
 0x42d   :  { %v2214_v51 = vmul.f32 %v4645_v31, %v2133_v12  ;;  %v2408_v18 = vmul.f32 %v2312_v9, %v2312_v9 }
 0x42f   :  { %v4901_v0 = vsub.f32 %v2214_v51, %v3251_v39  ;;  %2484 = vrot.lane.b32.xlu0 %v2406_v57, %s3907_s4  ;;  %v2090_v39 = vmul.f32 %v4663_v61, %v2013_v62  ;;  %v3260_v57 = vunpack.c.h.bf16 %v4914_v50 }
 0x430   :  { %v2007_v56 = vpop.permute.xlu1 %2006  ;;  %v2017_v30 = vpop.permute.xlu0 %2016 }
 0x431   :  { %v2087_v27 = vmul.f32 %v4650_v36, %v2007_v56  ;;  %v2314_v22 = vsub.f32 %v2090_v39, %v3259_v33 }
 0x433   :  { %v2311_v20 = vsub.f32 %v2087_v27, %v3252_v43  ;;  %v2410_v53 = vmul.f32 %v2314_v22, %v2314_v22 }
 0x434   :  { %v2135_v37 = vpop.permute.xlu1 %2134 }
 0x435   :  { %v2407_v31 = vmul.f32 %v2311_v20, %v2311_v20  ;;  %v2215_v28 = vmul.f32 %v4650_v36, %v2135_v37  ;;  %v3264_v37 = vunpack.c.h.bf16 %v4928_v58 }
 0x437   :  { %v4907_v11 = vsub.f32 %v2215_v28, %v3252_v43  ;;  %2486 = vrot.lane.b32.xlu0 %v2407_v31, %s3907_s4  ;;  %v2092_v43 = vmul.f32 %v4671_v52, %v2017_v30  ;;  %v4947_v31 = vld [vmem:[%s5266_s5 + $0x58] sm:$0xff]  }
 0x438   :  { %v2137_v60 = vpop.permute.xlu1 %2136  ;;  %v3268_v22 = vunpack.c.h.bf16 %v4947_v31 }
 0x439   :  { %v2216_v46 = vmul.f32 %v4654_v26, %v2137_v60  ;;  %v2316_v27 = vsub.f32 %v2092_v43, %v3263_v1 }
 0x43b   :  { %v4916_v42 = vsub.f32 %v2216_v46, %v3255_v41  ;;  %2488 = vrot.lane.b32.xlu0 %v2408_v18, %s3907_s4  ;;  %v2021_v41 = vpop.permute.xlu0 %2020  ;;  %v2412_v18 = vmul.f32 %v2316_v27, %v2316_v27  ;;  %v3267_v46 = vunpack.c.l.bf16 %v4947_v31 }
 0x43c   :  { %v2011_v36 = vpop.permute.xlu1 %2010  ;;  %v2094_v62 = vmul.f32 %v4683_v16, %v2021_v41 }
 0x43d   :  { %v2089_v7 = vmul.f32 %v4658_v29, %v2011_v36 }
 0x43f   :  { %v2313_v14 = vsub.f32 %v2089_v7, %v3256_v34  ;;  %v2318_v7 = vsub.f32 %v2094_v62, %v3267_v46 }
 0x440   :  { %v2139_v26 = vpop.permute.xlu1 %2138  ;;  %v2025_v28 = vpop.permute.xlu0 %2024 }
 0x441   :  { %v2409_v48 = vmul.f32 %v2313_v14, %v2313_v14  ;;  %v2217_v15 = vmul.f32 %v4658_v29, %v2139_v26  ;;  %v4960_v14 = vld [vmem:[%s5266_s5 + $0x60] sm:$0xff]   ;;  %v2096_v30 = vmul.f32 %v4695_v49, %v2025_v28  ;;  %v2414_v43 = vmul.f32 %v2318_v7, %v2318_v7 }
 0x442   :  { %v2360_v7 = vmul.f32 %v4767_v40, %v4767_v40 }
 0x443   :  { %v4930_v12 = vsub.f32 %v2217_v15, %v3256_v34  ;;  %2490 = vrot.lane.b32.xlu0 %v2409_v48, %s3907_s4  ;;  %v5283_v15 = vunpack.c.l.bf16 %v4960_v14 }
 0x444   :  { %v2015_v51 = vpop.permute.xlu1 %2014 }
 0x445   :  { %v2091_v29 = vmul.f32 %v4667_v13, %v2015_v51 }
 0x447   :  { %v2315_v56 = vsub.f32 %v2091_v29, %v3260_v57  ;;  %2492 = vrot.lane.b32.xlu0 %v2410_v53, %s3907_s4 }
 0x448   :  { %v2019_v6 = vpop.permute.xlu1 %2018  ;;  %v2029_v36 = vpop.permute.xlu0 %2028 }
 0x449   :  { %v2411_v20 = vmul.f32 %v2315_v56, %v2315_v56  ;;  %v2093_v9 = vmul.f32 %v4676_v59, %v2019_v6  ;;  %v4972_v56 = vld [vmem:[%s5266_s5 + $0x70] sm:$0xff]   ;;  %v2320_v6 = vsub.f32 %v2096_v30, %v5283_v15 }
 0x44a   :  { %v5284_v41 = vunpack.c.h.bf16 %v4972_v56 }
 0x44b   :  { %2494 = vrot.lane.b32.xlu0 %v2411_v20, %s3907_s4  ;;  %v2317_v34 = vsub.f32 %v2093_v9, %v3264_v37  ;;  %v4981_v9 = vld [vmem:[%s5266_s5 + $0x68] sm:$0xff]  }
 0x44c   :  { %v2023_v60 = vpop.permute.xlu1 %2022 }
 0x44d   :  { %v2413_v26 = vmul.f32 %v2317_v34, %v2317_v34  ;;  %v2095_v48 = vmul.f32 %v4687_v19, %v2023_v60  ;;  %v5285_v60 = vunpack.c.h.bf16 %v4960_v14 }
 0x44f   :  { %2496 = vrot.lane.b32.xlu0 %v2412_v18, %s3907_s4  ;;  %v2319_v29 = vsub.f32 %v2095_v48, %v3268_v22  ;;  %v5286_v48 = vunpack.c.l.bf16 %v4981_v9 }
 0x450   :  { %v2027_v39 = vpop.permute.xlu1 %2026  ;;  %v2033_v51 = vpop.permute.xlu0 %2032 }
 0x451   :  { %v2415_v28 = vmul.f32 %v2319_v29, %v2319_v29  ;;  %v2097_v18 = vmul.f32 %v4699_v24, %v2027_v39  ;;  %v2098_v29 = vmul.f32 %v4707_v25, %v2029_v36  ;;  %v5289_v36 = vunpack.c.h.bf16 %v4981_v9 }
 0x453   :  { %2498 = vrot.lane.b32.xlu0 %v2413_v26, %s3907_s4  ;;  %v2416_v26 = vmul.f32 %v2320_v6, %v2320_v6  ;;  %v2321_v39 = vsub.f32 %v2097_v18, %v5285_v60  ;;  %v2362_v18 = vmul.f32 %v4787_v8, %v4787_v8  ;;  %v2363_v8 = vmul.f32 %v4803_v63, %v4803_v63 }
 0x454   :  { %v2031_v53 = vpop.permute.xlu1 %2030 }
 0x457   :  { %2500 = vrot.lane.b32.xlu0 %v2414_v43, %s3907_s4  ;;  %v2361_v43 = vmul.f32 %v4782_v44, %v4782_v44 }
 0x458   :  { %v2037_v27 = vpop.permute.xlu0 %2036  ;;  %v2035_v20 = vpop.permute.xlu1 %2034 }
 0x459   :  { %v2101_v62 = vmul.f32 %v4728_v54, %v2035_v20 }
 0x45b   :  { %v2325_v34 = vsub.f32 %v2101_v62, %v5284_v41  ;;  %2502 = vrot.lane.b32.xlu0 %v2415_v28, %s3907_s4  ;;  %v5000_v28 = vld [vmem:[%s5266_s5 + $0x78] sm:$0xff]   ;;  %s3910_s5 = smov [#allocation2]  }
 0x45c   :  { %v2457_v30 = vpop.permute.xlu1 %2456  ;;  %v5288_v44 = vunpack.c.h.bf16 %v5000_v28 }
 0x45d   :  { %v2421_v20 = vmul.f32 %v2325_v34, %v2325_v34  ;;  %v2552_v15 = vadd.f32 %v2457_v30, %v2360_v7  ;;  %v2459_v62 = vpop.permute.xlu0 %2458  ;;  %v2322_v34 = vsub.f32 %v2098_v29, %v5286_v48  ;;  %v2417_v7 = vmul.f32 %v2321_v39, %v2321_v39 }
 0x45e   :  { %v2553_v40 = vadd.f32 %v2459_v62, %v2361_v43  ;;  %v2099_v30 = vmul.f32 %v4712_v3, %v2031_v53  ;;  %v2100_v62 = vmul.f32 %v4722_v5, %v2033_v51 }
 0x45f   :  { %3794 = vrsqrt.f32 %v2552_v15  ;;  %2504 = vrot.lane.b32.xlu0 %v2416_v26, %s3907_s4  ;;  %2514 = vrot.lane.b32.xlu1 %v2421_v20, %s3907_s4  ;;  %v5287_v20 = vunpack.c.l.bf16 %v4972_v56  ;;  %v2418_v29 = vmul.f32 %v2322_v34, %v2322_v34  ;;  %v3283_v34 = vunpack.c.l.bf16 %v5000_v28 }
 0x460   :  { %3796 = vrsqrt.f32 %v2553_v40  ;;  %v2039_v6 = vpop.permute.xlu1 %2038  ;;  %v2323_v53 = vsub.f32 %v2099_v30, %v5289_v36  ;;  %v2102_v30 = vmul.f32 %v4741_v32, %v2037_v27  ;;  %vm2586_vm2 = vcmp.eq.f32.partialorder %v2552_v15, inf }
 0x461   :  { %v2103_v43 = vmul.f32 %v4747_v2, %v2039_v6  ;;  %v2461_v26 = vpop.permute.xlu0 %2460  ;;  %v2324_v48 = vsub.f32 %v2100_v62, %v5287_v20  ;;  %vm2588_vm3 = vcmp.eq.f32.partialorder %v2552_v15, 0.0  ;;  %vm2593_vm4 = vcmp.eq.f32.partialorder %v2553_v40, inf }
 0x462   :  { %v2554_v41 = vadd.f32 %v2461_v26, %v2362_v18  ;;  %v2364_v18 = vmul.f32 %v4813_v38, %v4813_v38  ;;  %v2419_v63 = vmul.f32 %v2323_v53, %v2323_v53  ;;  %v2596_v53 = vand.u32 2147483648, %v2553_v40 }
 0x463   :  { %v2327_v60 = vsub.f32 %v2103_v43, %v5288_v44  ;;  %2506 = vrot.lane.b32.xlu0 %v2417_v7, %s3907_s4  ;;  %v2420_v26 = vmul.f32 %v2324_v48, %v2324_v48  ;;  %v2326_v27 = vsub.f32 %v2102_v30, %v3283_v34  ;;  %vm2595_vm5 = vcmp.eq.f32.partialorder %v2553_v40, 0.0 }
 0x464   :  { %3798 = vrsqrt.f32 %v2554_v41  ;;  %vm2600_vm6 = vcmp.eq.f32.partialorder %v2554_v41, inf  ;;  %v2603_v30 = vand.u32 2147483648, %v2554_v41  ;;  %vm2602_vm7 = vcmp.eq.f32.partialorder %v2554_v41, 0.0 }
 0x465   :  { %v2423_v39 = vmul.f32 %v2327_v60, %v2327_v60  ;;  %v2463_v6 = vpop.permute.xlu0 %2462 }
 0x466   :  { %v2555_v51 = vadd.f32 %v2463_v6, %v2363_v8 }
 0x467   :  { %2508 = vrot.lane.b32.xlu0 %v2418_v29, %s3907_s4  ;;  %2518 = vrot.lane.b32.xlu1 %v2423_v39, %s3907_s4  ;;  %v2365_v29 = vmul.f32 %v4820_v45, %v4820_v45  ;;  %v2589_v39 = vand.u32 2147483648, %v2552_v15 }
 0x468   :  { %3800 = vrsqrt.f32 %v2555_v51  ;;  %vm2607_vm8 = vcmp.eq.f32.partialorder %v2555_v51, inf  ;;  %vm2609_vm9 = vcmp.eq.f32.partialorder %v2555_v51, 0.0 }
 0x469   :  { %v3795_v7 = vpop.eup %3794  ;;  %v2465_v60 = vpop.permute.xlu0 %2464 }
 0x46a   :  { %v3797_v43 = vpop.eup %3796  ;;  %v2585_v62 = vmul.f32 %v3795_v7, %v2552_v15  ;;  %v2556_v8 = vadd.f32 %v2465_v60, %v2364_v18 }
 0x46b   :  { %v2592_v6 = vmul.f32 %v3797_v43, %v2553_v40  ;;  %2510 = vrot.lane.b32.xlu0 %v2419_v63, %s3907_s4 }
 0x46c   :  { %v2587_v38 = vsel %vm2586_vm2, %v2552_v15, %v2585_v62  ;;  %3802 = vrsqrt.f32 %v2556_v8  ;;  %v2366_v15 = vmul.f32 %v4829_v35, %v4829_v35  ;;  %v2422_v62 = vmul.f32 %v2326_v27, %v2326_v27 }
 0x46d   :  { %v2590_v20 = vsel %vm2588_vm3, %v2589_v39, %v2587_v38  ;;  %v2594_v48 = vsel %vm2593_vm4, %v2553_v40, %v2592_v6  ;;  %v2467_v18 = vpop.permute.xlu0 %2466  ;;  %v3909_v27 = vmov 2   ;;  %vm2614_vm10 = vcmp.eq.f32.partialorder %v2556_v8, inf }
 0x46e   :  { %v3799_v7 = vpop.eup %3798  ;;  %v2809_v45 = vsel %vm2808_vm1, %v2590_v20, 0.0  ;;  %v2597_v60 = vsel %vm2595_vm5, %v2596_v53, %v2594_v48  ;;  %v2557_v44 = vadd.f32 %v2467_v18, %v2365_v29  ;;  %v2610_v48 = vand.u32 2147483648, %v2555_v51  ;;  %3509 = vset.pattern.permute.xlu0 %v3909_v27 }
 0x46f   :  { %v2810_v43 = vsel %vm2808_vm1, %v2597_v60, 0.0  ;;  %v2599_v36 = vmul.f32 %v3799_v7, %v2554_v41  ;;  %2512 = vrot.lane.b32.xlu0 %v2420_v26, %s3907_s4  ;;  %v2617_v60 = vand.u32 2147483648, %v2556_v8  ;;  %vm2616_vm11 = vcmp.eq.f32.partialorder %v2556_v8, 0.0 }
 0x470   :  { %v2811_v63 = vadd.f32 %v2810_v43, %v2809_v45  ;;  %3804 = vrsqrt.f32 %v2557_v44  ;;  %v2367_v43 = vmul.f32 %v4839_v10, %v4839_v10  ;;  %vm2621_vm12 = vcmp.eq.f32.partialorder %v2557_v44, inf }
 0x471   :  { %v2601_v40 = vsel %vm2600_vm6, %v2554_v41, %v2599_v36  ;;  %v2469_v39 = vpop.permute.xlu0 %2468  ;;  %vm2623_vm13 = vcmp.eq.f32.partialorder %v2557_v44, 0.0 }
 0x472   :  { %v3801_v6 = vpop.eup %3800  ;;  %v2604_v20 = vsel %vm2602_vm7, %v2603_v30, %v2601_v40  ;;  %v2558_v38 = vadd.f32 %v2469_v39, %v2366_v15 }
 0x473   :  { %v2812_v29 = vsel %vm2808_vm1, %v2604_v20, 0.0  ;;  %v2606_v53 = vmul.f32 %v3801_v6, %v2555_v51  ;;  %2516 = vrot.lane.b32.xlu0 %v2422_v62, %s3907_s4  ;;  %v2368_v6 = vmul.f32 %v4848_v55, %v4848_v55  ;;  %v5048_v55 = vpop.permute.xlu1 %2140  ;;  %s2889_s4 = sshll.u32 %s3910_s5, 4  ;;  %s2890_s4 = int_to_ptr.vmem [resolvable:$true] %s2889_s4 }
 0x474   :  { %v2813_v26 = vadd.f32 %v2812_v29, %v2811_v63  ;;  %3806 = vrsqrt.f32 %v2558_v38  ;;  %v2624_v29 = vand.u32 2147483648, %v2557_v44  ;;  %vm2628_vm14 = vcmp.eq.f32.partialorder %v2558_v38, inf  ;;  %s3858_s22 = scalar_lea.vmem %s2890_s4, 2048  ;;  %p3863_p1 = scmp.lt.s32.totalorder %s2890_s4, %s2890_s4 }
 0x475   :  { %v2608_v35 = vsel %vm2607_vm8, %v2555_v51, %v2606_v53  ;;  %vm2630_vm15 = vcmp.eq.f32.partialorder %v2558_v38, 0.0  ;;  %p3859_p0 = scmp.ne.s32.totalorder %s2890_s4, %s3858_s22  ;;  %p3864_p2 = scmp.lt.s32.totalorder %s3858_s22, %s3858_s22 }
 0x476   :  { %v3803_v18 = vpop.eup %3802  ;;  %v2611_v7 = vsel %vm2609_vm9, %v2610_v48, %v2608_v35 }
 0x477   :  { %v2814_v36 = vsel %vm2808_vm1, %v2611_v7, 0.0  ;;  %v2613_v41 = vmul.f32 %v3803_v18, %v2556_v8  ;;  %p3865_p3 = por %p3864_p2, %p3863_p1 }
 0x478   :  { %v2815_v45 = vadd.f32 %v2814_v36, %v2813_v26  ;;  %v2631_v36 = vand.u32 2147483648, %v2558_v38 }
 0x479   :  { %v2615_v15 = vsel %vm2614_vm10, %v2556_v8, %v2613_v41  ;;  %v2471_v63 = vpop.permute.xlu0 %2470  ;;  %p3866_p4 = pnand %p3865_p3, %p3859_p0 }
 0x47a   :  { %v3805_v30 = vpop.eup %3804  ;;  %v2618_v62 = vsel %vm2616_vm11, %v2617_v60, %v2615_v15  ;;  %v2559_v40 = vadd.f32 %v2471_v63, %v2367_v43 }
 0x47b   :  { %v2816_v51 = vsel %vm2808_vm1, %v2618_v62, 0.0  ;;  %v2620_v39 = vmul.f32 %v3805_v30, %v2557_v44  ;;  %v5053_v62 = vpop.permute.xlu1 %2142 }
 0x47c   :  { %v2817_v20 = vadd.f32 %v2816_v51, %v2815_v45  ;;  %3808 = vrsqrt.f32 %v2559_v40  ;;  %vm2635_vm0 = vcmp.eq.f32.partialorder %v2559_v40, inf  ;;  %v2638_v51 = vand.u32 2147483648, %v2559_v40 }
 0x47d   :  { %v2622_v53 = vsel %vm2621_vm12, %v2557_v44, %v2620_v39  ;;  %v2473_v26 = vpop.permute.xlu0 %2472  ;;  %v2369_v44 = vmul.f32 %v4858_v4, %v4858_v4  ;;  %vm2637_vm2 = vcmp.eq.f32.partialorder %v2559_v40, 0.0 }
 0x47e   :  { %v3807_v10 = vpop.eup %3806  ;;  %v2625_v48 = vsel %vm2623_vm13, %v2624_v29, %v2622_v53  ;;  %v2560_v8 = vadd.f32 %v2473_v26, %v2368_v6 }
 0x47f   :  { %v2818_v35 = vsel %vm2808_vm1, %v2625_v48, 0.0  ;;  %v2627_v18 = vmul.f32 %v3807_v10, %v2558_v38 }
 0x480   :  { %v2819_v7 = vadd.f32 %v2818_v35, %v2817_v20  ;;  %3810 = vrsqrt.f32 %v2560_v8  ;;  %vm2642_vm3 = vcmp.eq.f32.partialorder %v2560_v8, inf  ;;  %v2645_v48 = vand.u32 2147483648, %v2560_v8 }
 0x481   :  { %v2629_v41 = vsel %vm2628_vm14, %v2558_v38, %v2627_v18  ;;  %v2370_v38 = vmul.f32 %v4867_v17, %v4867_v17  ;;  %vm2644_vm4 = vcmp.eq.f32.partialorder %v2560_v8, 0.0  ;;  %v5058_v18 = vpop.permute.xlu1 %2144 }
 0x482   :  { %v2632_v27 = vsel %vm2630_vm15, %v2631_v36, %v2629_v41 }
 0x483   :  { %v2820_v45 = vsel %vm2808_vm1, %v2632_v27, 0.0 }
 0x484   :  { %v2821_v60 = vadd.f32 %v2820_v45, %v2819_v7 }
 0x485   :  { %v2475_v43 = vpop.permute.xlu0 %2474 }
 0x486   :  { %v3809_v15 = vpop.eup %3808  ;;  %v2561_v63 = vadd.f32 %v2475_v43, %v2369_v44  ;;  %v5063_v43 = vpop.permute.xlu1 %2146 }
 0x487   :  { %v2634_v30 = vmul.f32 %v3809_v15, %v2559_v40 }
 0x488   :  { %3812 = vrsqrt.f32 %v2561_v63  ;;  %vm2649_vm5 = vcmp.eq.f32.partialorder %v2561_v63, inf  ;;  %vm2651_vm6 = vcmp.eq.f32.partialorder %v2561_v63, 0.0 }
 0x489   :  { %v2636_v39 = vsel %vm2635_vm0, %v2559_v40, %v2634_v30  ;;  %v2477_v6 = vpop.permute.xlu0 %2476  ;;  %v2371_v40 = vmul.f32 %v4877_v47, %v4877_v47 }
 0x48a   :  { %v3811_v20 = vpop.eup %3810  ;;  %v2639_v29 = vsel %vm2637_vm2, %v2638_v51, %v2636_v39  ;;  %v2562_v53 = vadd.f32 %v2477_v6, %v2370_v38 }
 0x48b   :  { %v2822_v4 = vsel %vm2808_vm1, %v2639_v29, 0.0  ;;  %v2641_v26 = vmul.f32 %v3811_v20, %v2560_v8 }
 0x48c   :  { %v2823_v10 = vadd.f32 %v2822_v4, %v2821_v60  ;;  %3814 = vrsqrt.f32 %v2562_v53  ;;  %v2652_v60 = vand.u32 2147483648, %v2561_v63  ;;  %vm2656_vm7 = vcmp.eq.f32.partialorder %v2562_v53, inf }
 0x48d   :  { %v2643_v35 = vsel %vm2642_vm3, %v2560_v8, %v2641_v26  ;;  %v2372_v8 = vmul.f32 %v4886_v23, %v4886_v23  ;;  %v2659_v29 = vand.u32 2147483648, %v2562_v53  ;;  %vm2658_vm8 = vcmp.eq.f32.partialorder %v2562_v53, 0.0  ;;  %v5068_v26 = vpop.permute.xlu1 %2148 }
 0x48e   :  { %v2646_v7 = vsel %vm2644_vm4, %v2645_v48, %v2643_v35 }
 0x48f   :  { %v2824_v17 = vsel %vm2808_vm1, %v2646_v7, 0.0 }
 0x490   :  { %v2825_v36 = vadd.f32 %v2824_v17, %v2823_v10 }
 0x491   :  { %v2479_v41 = vpop.permute.xlu0 %2478 }
 0x492   :  { %v3813_v27 = vpop.eup %3812  ;;  %v2563_v45 = vadd.f32 %v2479_v41, %v2371_v40  ;;  %v5073_v41 = vpop.permute.xlu1 %2150 }
 0x493   :  { %v2648_v44 = vmul.f32 %v3813_v27, %v2561_v63 }
 0x494   :  { %3816 = vrsqrt.f32 %v2563_v45  ;;  %vm2663_vm9 = vcmp.eq.f32.partialorder %v2563_v45, inf  ;;  %vm2665_vm10 = vcmp.eq.f32.partialorder %v2563_v45, 0.0 }
 0x495   :  { %v2650_v15 = vsel %vm2649_vm5, %v2561_v63, %v2648_v44  ;;  %v2481_v30 = vpop.permute.xlu0 %2480  ;;  %v2373_v63 = vmul.f32 %v4894_v21, %v4894_v21 }
 0x496   :  { %v3815_v51 = vpop.eup %3814  ;;  %v2653_v38 = vsel %vm2651_vm6, %v2652_v60, %v2650_v15  ;;  %v2564_v39 = vadd.f32 %v2481_v30, %v2372_v8 }
 0x497   :  { %v2826_v47 = vsel %vm2808_vm1, %v2653_v38, 0.0  ;;  %v2655_v6 = vmul.f32 %v3815_v51, %v2562_v53 }
 0x498   :  { %v2827_v20 = vadd.f32 %v2826_v47, %v2825_v36  ;;  %3818 = vrsqrt.f32 %v2564_v39  ;;  %v2666_v36 = vand.u32 2147483648, %v2563_v45  ;;  %vm2670_vm11 = vcmp.eq.f32.partialorder %v2564_v39, inf }
 0x499   :  { %v2657_v4 = vsel %vm2656_vm7, %v2562_v53, %v2655_v6  ;;  %v2374_v53 = vmul.f32 %v4901_v0, %v4901_v0  ;;  %v2673_v38 = vand.u32 2147483648, %v2564_v39  ;;  %vm2672_vm12 = vcmp.eq.f32.partialorder %v2564_v39, 0.0  ;;  %v5078_v6 = vpop.permute.xlu1 %2152 }
 0x49a   :  { %v2660_v10 = vsel %vm2658_vm8, %v2659_v29, %v2657_v4 }
 0x49b   :  { %v2828_v23 = vsel %vm2808_vm1, %v2660_v10, 0.0 }
 0x49c   :  { %v2829_v48 = vadd.f32 %v2828_v23, %v2827_v20 }
 0x49d   :  { %v2483_v35 = vpop.permute.xlu0 %2482 }
 0x49e   :  { %v3817_v7 = vpop.eup %3816  ;;  %v2565_v17 = vadd.f32 %v2483_v35, %v2373_v63  ;;  %v5083_v35 = vpop.permute.xlu1 %2154 }
 0x49f   :  { %v2662_v40 = vmul.f32 %v3817_v7, %v2563_v45 }
 0x4a0   :  { %3820 = vrsqrt.f32 %v2565_v17  ;;  %vm2677_vm13 = vcmp.eq.f32.partialorder %v2565_v17, inf  ;;  %vm2679_vm14 = vcmp.eq.f32.partialorder %v2565_v17, 0.0 }
 0x4a1   :  { %v2664_v27 = vsel %vm2663_vm9, %v2563_v45, %v2662_v40  ;;  %v2485_v44 = vpop.permute.xlu0 %2484  ;;  %v2375_v45 = vmul.f32 %v4907_v11, %v4907_v11  ;;  %v2218_v11 = vmul.f32 %v4663_v61, %v5048_v55 }
 0x4a2   :  { %v3819_v60 = vpop.eup %3818  ;;  %v2667_v8 = vsel %vm2665_vm10, %v2666_v36, %v2664_v27  ;;  %v2566_v15 = vadd.f32 %v2485_v44, %v2374_v53 }
 0x4a3   :  { %v2830_v21 = vsel %vm2808_vm1, %v2667_v8, 0.0  ;;  %v2669_v30 = vmul.f32 %v3819_v60, %v2564_v39  ;;  %v2346_v61 = vsub.f32 %v2218_v11, %v3259_v33  ;;  %v2222_v11 = vmul.f32 %v4683_v16, %v5068_v26 }
 0x4a4   :  { %v2831_v51 = vadd.f32 %v2830_v21, %v2829_v48  ;;  %3822 = vrsqrt.f32 %v2566_v15  ;;  %v2680_v48 = vand.u32 2147483648, %v2565_v17  ;;  %vm2684_vm15 = vcmp.eq.f32.partialorder %v2566_v15, inf }
 0x4a5   :  { %v2671_v47 = vsel %vm2670_vm11, %v2564_v39, %v2669_v30  ;;  %v2376_v39 = vmul.f32 %v4916_v42, %v4916_v42  ;;  %v2687_v21 = vand.u32 2147483648, %v2566_v15  ;;  %vm2686_vm0 = vcmp.eq.f32.partialorder %v2566_v15, 0.0 }
 0x4a6   :  { %v2674_v20 = vsel %vm2672_vm12, %v2673_v38, %v2671_v47  ;;  %v2219_v42 = vmul.f32 %v4667_v13, %v5053_v62  ;;  %v2377_v47 = vmul.f32 %v4930_v12, %v4930_v12  ;;  %v2220_v13 = vmul.f32 %v4671_v52, %v5058_v18 }
 0x4a7   :  { %v2832_v0 = vsel %vm2808_vm1, %v2674_v20, 0.0  ;;  %v2378_v33 = vmul.f32 %v2346_v61, %v2346_v61  ;;  %v2221_v52 = vmul.f32 %v4676_v59, %v5063_v43  ;;  %v2223_v16 = vmul.f32 %v4687_v19, %v5073_v41 }
 0x4a8   :  { %v2833_v29 = vadd.f32 %v2832_v0, %v2831_v51  ;;  %v2348_v50 = vsub.f32 %v2220_v13, %v3263_v1  ;;  %v2224_v19 = vmul.f32 %v4695_v49, %v5078_v6  ;;  %v5316_v49 = vunpack.c.l.bf16 %v4960_v14 }
 0x4a9   :  { %v2487_v4 = vpop.permute.xlu0 %2486  ;;  %v2349_v59 = vsub.f32 %v2221_v52, %v3264_v37 }
 0x4aa   :  { %v3821_v10 = vpop.eup %3820  ;;  %v2567_v23 = vadd.f32 %v2487_v4, %v2375_v45  ;;  %v2352_v6 = vsub.f32 %v2224_v19, %v5316_v49 }
 0x4ab   :  { %v2676_v63 = vmul.f32 %v3821_v10, %v2565_v17  ;;  %v2381_v58 = vmul.f32 %v2349_v59, %v2349_v59 }
 0x4ac   :  { %3824 = vrsqrt.f32 %v2567_v23  ;;  %vm2691_vm2 = vcmp.eq.f32.partialorder %v2567_v23, inf  ;;  %v2694_v4 = vand.u32 2147483648, %v2567_v23  ;;  %vm2693_vm3 = vcmp.eq.f32.partialorder %v2567_v23, 0.0 }
 0x4ad   :  { %v2678_v7 = vsel %vm2677_vm13, %v2565_v17, %v2676_v63  ;;  %v2489_v40 = vpop.permute.xlu0 %2488  ;;  %v5092_v17 = vpop.permute.xlu1 %2156  ;;  %v2384_v59 = vmul.f32 %v2352_v6, %v2352_v6  ;;  %v5322_v6 = vunpack.c.l.bf16 %v4972_v56 }
 0x4ae   :  { %v3823_v36 = vpop.eup %3822  ;;  %v2681_v53 = vsel %vm2679_vm14, %v2680_v48, %v2678_v7  ;;  %v2568_v27 = vadd.f32 %v2489_v40, %v2376_v39 }
 0x4af   :  { %v2834_v44 = vsel %vm2808_vm1, %v2681_v53, 0.0  ;;  %v2683_v60 = vmul.f32 %v3823_v36, %v2566_v15 }
 0x4b0   :  { %v2835_v8 = vadd.f32 %v2834_v44, %v2833_v29  ;;  %3826 = vrsqrt.f32 %v2568_v27  ;;  %vm2698_vm4 = vcmp.eq.f32.partialorder %v2568_v27, inf  ;;  %v2701_v36 = vand.u32 2147483648, %v2568_v27 }
 0x4b1   :  { %v2685_v30 = vsel %vm2684_vm15, %v2566_v15, %v2683_v60  ;;  %v2347_v15 = vsub.f32 %v2219_v42, %v3260_v57  ;;  %v5103_v45 = vpop.permute.xlu1 %2158  ;;  %vm2700_vm5 = vcmp.eq.f32.partialorder %v2568_v27, 0.0 }
 0x4b2   :  { %v2688_v51 = vsel %vm2686_vm0, %v2687_v21, %v2685_v30  ;;  %v2380_v21 = vmul.f32 %v2348_v50, %v2348_v50 }
 0x4b3   :  { %v2836_v38 = vsel %vm2808_vm1, %v2688_v51, 0.0  ;;  %v2379_v7 = vmul.f32 %v2347_v15, %v2347_v15  ;;  %v2351_v15 = vsub.f32 %v2223_v16, %v3268_v22 }
 0x4b4   :  { %v2837_v55 = vadd.f32 %v2836_v38, %v2835_v8 }
 0x4b5   :  { %v2491_v20 = vpop.permute.xlu0 %2490  ;;  %v5112_v44 = vpop.permute.xlu1 %2160  ;;  %v2383_v50 = vmul.f32 %v2351_v15, %v2351_v15 }
 0x4b6   :  { %v3825_v0 = vpop.eup %3824  ;;  %v2569_v29 = vadd.f32 %v2491_v20, %v2377_v47  ;;  %v2228_v15 = vmul.f32 %v4722_v5, %v5112_v44 }
 0x4b7   :  { %v2690_v62 = vmul.f32 %v3825_v0, %v2567_v23 }
 0x4b8   :  { %3828 = vrsqrt.f32 %v2569_v29  ;;  %vm2705_vm6 = vcmp.eq.f32.partialorder %v2569_v29, inf  ;;  %v2708_v61 = vand.u32 2147483648, %v2569_v29  ;;  %vm2707_vm7 = vcmp.eq.f32.partialorder %v2569_v29, 0.0 }
 0x4b9   :  { %v2692_v10 = vsel %vm2691_vm2, %v2567_v23, %v2690_v62  ;;  %v2493_v63 = vpop.permute.xlu0 %2492  ;;  %v2163_v38 = vpop.permute.xlu1 %2162 }
 0x4ba   :  { %v3827_v12 = vpop.eup %3826  ;;  %v2695_v48 = vsel %vm2693_vm3, %v2694_v4, %v2692_v10  ;;  %v2570_v39 = vadd.f32 %v2493_v63, %v2378_v33  ;;  %v2225_v63 = vmul.f32 %v4699_v24, %v5083_v35 }
 0x4bb   :  { %v2838_v57 = vsel %vm2808_vm1, %v2695_v48, 0.0  ;;  %v2697_v18 = vmul.f32 %v3827_v12, %v2568_v27 }
 0x4bc   :  { %v2839_v40 = vadd.f32 %v2838_v57, %v2837_v55  ;;  %3830 = vrsqrt.f32 %v2570_v39  ;;  %vm2712_vm8 = vcmp.eq.f32.partialorder %v2570_v39, inf  ;;  %v2715_v4 = vand.u32 2147483648, %v2570_v39 }
 0x4bd   :  { %v2699_v53 = vsel %vm2698_vm4, %v2568_v27, %v2697_v18  ;;  %v2495_v23 = vpop.permute.xlu0 %2494  ;;  %v2350_v27 = vsub.f32 %v2222_v11, %v3267_v46  ;;  %vm2714_vm9 = vcmp.eq.f32.partialorder %v2570_v39, 0.0  ;;  %v5134_v31 = vpop.permute.xlu1 %2164  ;;  %v5317_v18 = vunpack.c.h.bf16 %v4960_v14 }
 0x4be   :  { %v2702_v60 = vsel %vm2700_vm5, %v2701_v36, %v2699_v53  ;;  %v2571_v1 = vadd.f32 %v2495_v23, %v2379_v7  ;;  %v2226_v36 = vmul.f32 %v4707_v25, %v5092_v17  ;;  %v2229_v11 = vmul.f32 %v4728_v54, %v2163_v38 }
 0x4bf   :  { %v2840_v8 = vsel %vm2808_vm1, %v2702_v60, 0.0  ;;  %v2382_v46 = vmul.f32 %v2350_v27, %v2350_v27  ;;  %v2227_v25 = vmul.f32 %v4712_v3, %v5103_v45  ;;  %v5319_v38 = vunpack.c.h.bf16 %v4972_v56 }
 0x4c0   :  { %v2841_v43 = vadd.f32 %v2840_v8, %v2839_v40  ;;  %3832 = vrsqrt.f32 %v2571_v1  ;;  %vm2719_vm10 = vcmp.eq.f32.partialorder %v2571_v1, inf  ;;  %vm2721_vm11 = vcmp.eq.f32.partialorder %v2571_v1, 0.0 }
 0x4c1   :  { %v2497_v30 = vpop.permute.xlu0 %2496  ;;  %v2353_v40 = vsub.f32 %v2225_v63, %v5317_v18 }
 0x4c2   :  { %v3829_v42 = vpop.eup %3828  ;;  %v5119_v51 = vadd.f32 %v2497_v30, %v2380_v21  ;;  %v5318_v30 = vunpack.c.l.bf16 %v4981_v9 }
 0x4c3   :  { %v2704_v26 = vmul.f32 %v3829_v42, %v2569_v29 }
 0x4c4   :  { %3834 = vrsqrt.f32 %v5119_v51  ;;  %vm2726_vm12 = vcmp.eq.f32.partialorder %v5119_v51, inf  ;;  %v2729_v14 = vand.u32 2147483648, %v5119_v51  ;;  %vm2728_vm13 = vcmp.eq.f32.partialorder %v5119_v51, 0.0 }
 0x4c5   :  { %v2706_v37 = vsel %vm2705_vm6, %v2569_v29, %v2704_v26  ;;  %v2499_v55 = vpop.permute.xlu0 %2498  ;;  %v2354_v42 = vsub.f32 %v2226_v36, %v5318_v30  ;;  %v2385_v26 = vmul.f32 %v2353_v40, %v2353_v40 }
 0x4c6   :  { %v3831_v47 = vpop.eup %3830  ;;  %v2709_v20 = vsel %vm2707_vm7, %v2708_v61, %v2706_v37  ;;  %v5124_v0 = vadd.f32 %v2499_v55, %v2381_v58  ;;  %v2357_v61 = vsub.f32 %v2229_v11, %v5319_v38  ;;  %v5320_v55 = vunpack.c.h.bf16 %v4981_v9 }
 0x4c7   :  { %v2842_v41 = vsel %vm2808_vm1, %v2709_v20, 0.0  ;;  %v2711_v13 = vmul.f32 %v3831_v47, %v2570_v39 }
 0x4c8   :  { %v2843_v62 = vadd.f32 %v2842_v41, %v2841_v43  ;;  %3836 = vrsqrt.f32 %v5124_v0  ;;  %v2167_v43 = vpop.permute.xlu1 %2166  ;;  %vm2733_vm14 = vcmp.eq.f32.partialorder %v5124_v0, inf  ;;  %v2355_v47 = vsub.f32 %v2227_v25, %v5320_v55 }
 0x4c9   :  { %v2713_v29 = vsel %vm2712_vm8, %v2570_v39, %v2711_v13  ;;  %v2501_v33 = vpop.permute.xlu0 %2500  ;;  %v2722_v39 = vand.u32 2147483648, %v2571_v1  ;;  %v2231_v58 = vmul.f32 %v4747_v2, %v2167_v43  ;;  %vm2735_vm15 = vcmp.eq.f32.partialorder %v5124_v0, 0.0 }
 0x4ca   :  { %v3833_v10 = vpop.eup %3832  ;;  %v2716_v22 = vsel %vm2714_vm9, %v2715_v4, %v2713_v29  ;;  %v5136_v12 = vadd.f32 %v2501_v33, %v2382_v46  ;;  %v2386_v13 = vmul.f32 %v2354_v42, %v2354_v42  ;;  %v2389_v33 = vmul.f32 %v2357_v61, %v2357_v61 }
 0x4cb   :  { %v2844_v48 = vsel %vm2808_vm1, %v2716_v22, 0.0  ;;  %v2718_v7 = vmul.f32 %v3833_v10, %v2571_v1  ;;  %v2387_v22 = vmul.f32 %v2355_v47, %v2355_v47 }
 0x4cc   :  { %v2845_v52 = vadd.f32 %v2844_v48, %v2843_v62  ;;  %3838 = vrsqrt.f32 %v5136_v12  ;;  %v5321_v62 = vunpack.c.h.bf16 %v5000_v28  ;;  %vm2740_vm0 = vcmp.eq.f32.partialorder %v5136_v12, inf }
 0x4cd   :  { %v2720_v57 = vsel %vm2719_vm10, %v2571_v1, %v2718_v7  ;;  %v2503_v24 = vpop.permute.xlu0 %2502  ;;  %vm2742_vm2 = vcmp.eq.f32.partialorder %v5136_v12, 0.0  ;;  %v2356_v48 = vsub.f32 %v2228_v15, %v5322_v6 }
 0x4ce   :  { %v3835_v35 = vpop.eup %3834  ;;  %v2723_v53 = vsel %vm2721_vm11, %v2722_v39, %v2720_v57  ;;  %v5146_v23 = vadd.f32 %v2503_v24, %v2383_v50  ;;  %v2359_v4 = vsub.f32 %v2231_v58, %v5321_v62  ;;  %v2230_v39 = vmul.f32 %v4741_v32, %v5134_v31 }
 0x4cf   :  { %v2846_v60 = vsel %vm2808_vm1, %v2723_v53, 0.0  ;;  %v2725_v8 = vmul.f32 %v3835_v35, %v5119_v51  ;;  %v2388_v43 = vmul.f32 %v2356_v48, %v2356_v48 }
 0x4d0   :  { %v2847_v1 = vadd.f32 %v2846_v60, %v2845_v52  ;;  %3840 = vrsqrt.f32 %v5146_v23  ;;  %v2391_v35 = vmul.f32 %v2359_v4, %v2359_v4  ;;  %vm2747_vm3 = vcmp.eq.f32.partialorder %v5146_v23, inf }
 0x4d1   :  { %v2727_v17 = vsel %vm2726_vm12, %v5119_v51, %v2725_v8  ;;  %v2505_v54 = vpop.permute.xlu0 %2504  ;;  %v2736_v51 = vand.u32 2147483648, %v5124_v0  ;;  %v2515_v10 = vpop.permute.xlu1 %2514  ;;  %v2750_v40 = vand.u32 2147483648, %v5146_v23  ;;  %vm2749_vm4 = vcmp.eq.f32.partialorder %v5146_v23, 0.0 }
 0x4d2   :  { %v3837_v21 = vpop.eup %3836  ;;  %v2730_v27 = vsel %vm2728_vm13, %v2729_v14, %v2727_v17  ;;  %v5160_v16 = vadd.f32 %v2505_v54, %v2384_v59  ;;  %v5189_v50 = vadd.f32 %v2515_v10, %v2389_v33  ;;  %v2358_v60 = vsub.f32 %v2230_v39, %v3283_v34 }
 0x4d3   :  { %v2848_v3 = vsel %vm2808_vm1, %v2730_v27, 0.0  ;;  %v2732_v45 = vmul.f32 %v3837_v21, %v5124_v0 }
 0x4d4   :  { %v2849_v37 = vadd.f32 %v2848_v3, %v2847_v1  ;;  %3842 = vrsqrt.f32 %v5160_v16  ;;  %vm2754_vm5 = vcmp.eq.f32.partialorder %v5160_v16, inf  ;;  %vm2756_vm6 = vcmp.eq.f32.partialorder %v5160_v16, 0.0 }
 0x4d5   :  { %v2734_v20 = vsel %vm2733_vm14, %v5124_v0, %v2732_v45  ;;  %v2507_v46 = vpop.permute.xlu0 %2506  ;;  %v2743_v0 = vand.u32 2147483648, %v5136_v12  ;;  %v2390_v30 = vmul.f32 %v2358_v60, %v2358_v60  ;;  %vm2789_vm13 = vcmp.eq.f32.partialorder %v5189_v50, inf }
 0x4d6   :  { %v3839_v2 = vpop.eup %3838  ;;  %v2737_v19 = vsel %vm2735_vm15, %v2736_v51, %v2734_v20  ;;  %v5176_v41 = vadd.f32 %v2507_v46, %v2385_v26  ;;  %vm2791_vm15 = vcmp.eq.f32.partialorder %v5189_v50, 0.0 }
 0x4d7   :  { %v2850_v29 = vsel %vm2808_vm1, %v2737_v19, 0.0  ;;  %v2739_v9 = vmul.f32 %v3839_v2, %v5136_v12 }
 0x4d8   :  { %v2851_v63 = vadd.f32 %v2850_v29, %v2849_v37  ;;  %3844 = vrsqrt.f32 %v5176_v41  ;;  %vm2761_vm7 = vcmp.eq.f32.partialorder %v5176_v41, inf  ;;  %v2764_v27 = vand.u32 2147483648, %v5176_v41 }
 0x4d9   :  { %v2741_v5 = vsel %vm2740_vm0, %v5136_v12, %v2739_v9  ;;  %v2509_v44 = vpop.permute.xlu0 %2508  ;;  %v2519_v18 = vpop.permute.xlu1 %2518  ;;  %vm2763_vm8 = vcmp.eq.f32.partialorder %v5176_v41, 0.0 }
 0x4da   :  { %v3841_v49 = vpop.eup %3840  ;;  %v2744_v7 = vsel %vm2742_vm2, %v2743_v0, %v2741_v5  ;;  %v2578_v52 = vadd.f32 %v2509_v44, %v2386_v13  ;;  %v5200_v32 = vadd.f32 %v2519_v18, %v2391_v35  ;;  %v2792_v5 = vand.u32 2147483648, %v5189_v50 }
 0x4db   :  { %v2852_v57 = vsel %vm2808_vm1, %v2744_v7, 0.0  ;;  %v2746_v24 = vmul.f32 %v3841_v49, %v5146_v23 }
 0x4dc   :  { %v2853_v12 = vadd.f32 %v2852_v57, %v2851_v63  ;;  %3846 = vrsqrt.f32 %v2578_v52  ;;  %vm2768_vm9 = vcmp.eq.f32.partialorder %v2578_v52, inf  ;;  %v2771_v55 = vand.u32 2147483648, %v2578_v52 }
 0x4dd   :  { %v2748_v56 = vsel %vm2747_vm3, %v5146_v23, %v2746_v24  ;;  %v2511_v36 = vpop.permute.xlu0 %2510  ;;  %3848 = vrsqrt.f32 %v5189_v50  ;;  %v2757_v23 = vand.u32 2147483648, %v5160_v16  ;;  %vm2770_vm10 = vcmp.eq.f32.partialorder %v2578_v52, 0.0 }
 0x4de   :  { %v3843_v53 = vpop.eup %3842  ;;  %v2751_v11 = vsel %vm2749_vm4, %v2750_v40, %v2748_v56  ;;  %v2579_v31 = vadd.f32 %v2511_v36, %v2387_v22  ;;  %vm2803_vm2 = vcmp.eq.f32.partialorder %v5200_v32, inf  ;;  %v2806_v24 = vand.u32 2147483648, %v5200_v32 }
 0x4df   :  { %v2854_v8 = vsel %vm2808_vm1, %v2751_v11, 0.0  ;;  %v2753_v59 = vmul.f32 %v3843_v53, %v5160_v16 }
 0x4e0   :  { %v2855_v1 = vadd.f32 %v2854_v8, %v2853_v12  ;;  %3850 = vrsqrt.f32 %v2579_v31  ;;  %vm2775_vm11 = vcmp.eq.f32.partialorder %v2579_v31, inf  ;;  %v2778_v62 = vand.u32 2147483648, %v2579_v31 }
 0x4e1   :  { %v2755_v14 = vsel %vm2754_vm5, %v5160_v16, %v2753_v59  ;;  %v2513_v25 = vpop.permute.xlu0 %2512  ;;  %3852 = vrsqrt.f32 %v5200_v32  ;;  %vm2777_vm12 = vcmp.eq.f32.partialorder %v2579_v31, 0.0  ;;  %vm2805_vm5 = vcmp.eq.f32.partialorder %v5200_v32, 0.0 }
 0x4e2   :  { %v3845_v17 = vpop.eup %3844  ;;  %v2758_v54 = vsel %vm2756_vm6, %v2757_v23, %v2755_v14  ;;  %v2580_v28 = vadd.f32 %v2513_v25, %v2388_v43 }
 0x4e3   :  { %v2856_v34 = vsel %vm2808_vm1, %v2758_v54, 0.0  ;;  %v2760_v21 = vmul.f32 %v3845_v17, %v5176_v41 }
 0x4e4   :  { %v2857_v42 = vadd.f32 %v2856_v34, %v2855_v1  ;;  %3854 = vrsqrt.f32 %v2580_v28  ;;  %vm2782_vm14 = vcmp.eq.f32.partialorder %v2580_v28, inf  ;;  %v2785_v44 = vand.u32 2147483648, %v2580_v28 }
 0x4e5   :  { %v2762_v26 = vsel %vm2761_vm7, %v5176_v41, %v2760_v21  ;;  %v2517_v16 = vpop.permute.xlu0 %2516  ;;  %vm2784_vm0 = vcmp.eq.f32.partialorder %v2580_v28, 0.0 }
 0x4e6   :  { %v3847_v38 = vpop.eup %3846  ;;  %v2765_v61 = vsel %vm2763_vm8, %v2764_v27, %v2762_v26  ;;  %v2582_v58 = vadd.f32 %v2517_v16, %v2390_v30 }
 0x4e7   :  { %v2858_v3 = vsel %vm2808_vm1, %v2765_v61, 0.0  ;;  %v2767_v45 = vmul.f32 %v3847_v38, %v2578_v52  ;;  %v3849_v37 = vpop.eup %3848 }
 0x4e8   :  { %v2859_v51 = vadd.f32 %v2858_v3, %v2857_v42  ;;  %3856 = vrsqrt.f32 %v2582_v58  ;;  %v2788_v2 = vmul.f32 %v3849_v37, %v5189_v50  ;;  %vm2796_vm3 = vcmp.eq.f32.partialorder %v2582_v58, inf }
 0x4e9   :  { %v2769_v47 = vsel %vm2768_vm9, %v2578_v52, %v2767_v45  ;;  %v2799_v35 = vand.u32 2147483648, %v2582_v58  ;;  %vm2798_vm4 = vcmp.eq.f32.partialorder %v2582_v58, 0.0 }
 0x4ea   :  { %v3851_v20 = vpop.eup %3850  ;;  %v2772_v46 = vsel %vm2770_vm10, %v2771_v55, %v2769_v47  ;;  %v2790_v33 = vsel %vm2789_vm13, %v5189_v50, %v2788_v2 }
 0x4eb   :  { %v2860_v15 = vsel %vm2808_vm1, %v2772_v46, 0.0  ;;  %v2774_v19 = vmul.f32 %v3851_v20, %v2579_v31  ;;  %v3853_v41 = vpop.eup %3852  ;;  %v2793_v7 = vsel %vm2791_vm15, %v2792_v5, %v2790_v33 }
 0x4ec   :  { %v2861_v13 = vadd.f32 %v2860_v15, %v2859_v51  ;;  %v2802_v10 = vmul.f32 %v3853_v41, %v5200_v32  ;;  %v2866_v50 = vsel %vm2808_vm1, %v2793_v7, 0.0 }
 0x4ed   :  { %v2776_v4 = vsel %vm2775_vm11, %v2579_v31, %v2774_v19 }
 0x4ee   :  { %v3855_v29 = vpop.eup %3854  ;;  %v2779_v9 = vsel %vm2777_vm12, %v2778_v62, %v2776_v4  ;;  %v2804_v39 = vsel %vm2803_vm2, %v5200_v32, %v2802_v10 }
 0x4ef   :  { %v2862_v63 = vsel %vm2808_vm1, %v2779_v9, 0.0  ;;  %v2781_v0 = vmul.f32 %v3855_v29, %v2580_v28  ;;  %v2807_v56 = vsel %vm2805_vm5, %v2806_v24, %v2804_v39 }
 0x4f0   :  { %v2863_v22 = vadd.f32 %v2862_v63, %v2861_v13  ;;  %v2870_v31 = vsel %vm2808_vm1, %v2807_v56, 0.0 }
 0x4f1   :  { %v2783_v49 = vsel %vm2782_vm14, %v2580_v28, %v2781_v0 }
 0x4f2   :  { %v3857_v6 = vpop.eup %3856  ;;  %v2786_v48 = vsel %vm2784_vm0, %v2785_v44, %v2783_v49 }
 0x4f3   :  { %v2795_v52 = vmul.f32 %v3857_v6, %v2582_v58  ;;  %v2864_v57 = vsel %vm2808_vm1, %v2786_v48, 0.0 }
 0x4f4   :  { %v2865_v18 = vadd.f32 %v2864_v57, %v2863_v22 }
 0x4f5   :  { %v2797_v12 = vsel %vm2796_vm3, %v2582_v58, %v2795_v52 }
 0x4f6   :  { %v2800_v40 = vsel %vm2798_vm4, %v2799_v35, %v2797_v12  ;;  %v2867_v36 = vadd.f32 %v2866_v50, %v2865_v18 }
 0x4f7   :  { %v2868_v53 = vsel %vm2808_vm1, %v2800_v40, 0.0 }
 0x4f8   :  { %v2869_v11 = vadd.f32 %v2868_v53, %v2867_v36 }
 0x4fa   :  { %v2871_v60 = vadd.f32 %v2870_v31, %v2869_v11 }
 0x4fc   :  { %v2872_v8 = vrot.slane %v2871_v60, 4 }
 0x4fe   :  { %v2873_v59 = vadd.f32 %v2872_v8, %v2871_v60 }
 0x500   :  { %v2874_v43 = vrot.slane %v2873_v59, 2 }
 0x502   :  { %v2875_v1 = vadd.f32 %v2874_v43, %v2873_v59 }
 0x504   :  { %v2876_v23 = vrot.slane %v2875_v1, 1 }
 0x506   :  { %v2877_v14 = vadd.f32 %v2876_v23, %v2875_v1 }
 0x508   :  { %2880 = vperm.xlu0 %3509, %v2877_v14  }
 0x509   :  { %3869 = shalt.err (!%p3866_p4)
}
 0x50a   :  { %s3870_s25 = scalar_lea.hbm %s5267_s6, 2048 }
 0x50b   :  { %p3871_p5 = scmp.ne.s32.totalorder %s5267_s6, %s3870_s25  ;;  %p3874_p6 = scmp.lt.u32.totalorder %s3870_s25, %s5267_s6 }
 0x50d   :  { %p3876_p7 = pnand %p3874_p6, %p3871_p5 }
 0x50f   :  { %3879 = shalt.err (!%p3876_p7)
}
 0x510   :  { %s3911_s30 = smov 64   ;;  %s3912_s9 = smov 4  }
 0x511   :  { %2895 = dma.vmem_to_hbm [thread:$0]  %s2890_s4, 2048, %s5267_s6, [#allocation3], %s3911_s30, %s3911_s30, %s3912_s9  }
 0x512   :  { %s3913_s12 = smov [#allocation4]  }
 0x513   :  { %s2901_s0 = sshll.u32 %s3913_s12, 4  ;;  %s2902_s0 = int_to_ptr.vmem [resolvable:$true] %s2901_s0 }
 0x514   :  { %s3880_s2 = scalar_lea.vmem %s2902_s0, 4096  ;;  %p3885_p9 = scmp.lt.s32.totalorder %s2902_s0, %s2902_s0 }
 0x515   :  { %p3881_p8 = scmp.ne.s32.totalorder %s2902_s0, %s3880_s2  ;;  %p3886_p10 = scmp.lt.s32.totalorder %s3880_s2, %s3880_s2 }
 0x517   :  { %p3887_p11 = por %p3886_p10, %p3885_p9 }
 0x519   :  { %p3888_p12 = pnand %p3887_p11, %p3881_p8 }
 0x51b   :  { %3891 = shalt.err (!%p3888_p12)
}
 0x51c   :  { %s3892_s14 = scalar_lea.hbm %s5268_s7, 4096 }
 0x51d   :  { %p3893_p13 = scmp.ne.s32.totalorder %s5268_s7, %s3892_s14  ;;  %p3896_p0 = scmp.lt.u32.totalorder %s3892_s14, %s5268_s7 }
 0x51f   :  { %p3898_p1 = pnand %p3896_p0, %p3893_p13 }
 0x521   :  { %3901 = shalt.err (!%p3898_p1)
}
 0x522   :  { %s3914_s18 = smov 128   ;;  %s3915_s1 = smov 8  }
 0x523   :  { %2907 = dma.vmem_to_hbm [thread:$0]  %s2902_s0, 4096, %s5268_s7, [#allocation5], %s3914_s18, %s3914_s18, %s3915_s1  }
 0x587   :  { %v2881_v32 = vpop.permute.xlu0 %2880 }
 0x588   :  { %2883 = vst [vmem:[%s5269_s8] sm:$0xff] %v2881_v32 }
 0x589   :  { %3902 = dma.done.wait [#allocation3], 2048  }
 0x58a   :  { %3903 = vsyncadd [#allocation3], 4294965248 }
 0x58b   :  { %3904 = dma.done.wait [#allocation5], 4096  }
 0x58c   :  { %3905 = vsyncadd [#allocation5], 4294963200 }
 0x58d   :  { %2918 = vsyncpa [#allocation3], 1 }
 0x58e   :  { %2919 = vsyncpa [#allocation5], 1 }

</bundles_post_ra>
